<compile_context>
chip_gen: v7x
topology: tpu7x:2x2x1
jax: 0.10.0
libtpu: 0.0.40
codegen_flags: <defaults>
</compile_context>

<pallas_src>
import jax
import jax.numpy as jnp
import numpy as np
from jax.experimental import pallas as pl
from jax.experimental.pallas import tpu as pltpu

P = 16            # 4x4 output pixels
CRGB = 3          # real RGB channels
CRGB_PAD = 8      # padded per-pixel RGB channels -> output slab width 16*8 = 128
BATCH_TILE = 256  # rows per grid step; run the largest batch you can per call
                  # (128 is plenty on v5e and eases VMEM on v7x at z_dim=512)


# ----------------------------- Pallas kernel -------------------------------

def _generator_kernel(x_ref, w1_ref, b1_ref, w2_ref, b2_ref,
                      wrgb_ref, brgb_ref, o_ref):
    """Fused conv1 -> LReLU/PN -> conv2(9-tap) -> LReLU/PN -> ToRGB.

    The activation lives in VMEM as 16 per-pixel (Nt, C) blocks with pixel
    index p = oh*4 + ow; weights are bf16, all accumulation is f32.
    """
    f32, bf16 = jnp.float32, jnp.bfloat16

    def act_pn(y):                       # LeakyReLU(0.2) + PixelNorm, in f32
        y = jnp.maximum(y, 0.2 * y)
        ms = jnp.mean(y * y, axis=-1, keepdims=True)     # per-pixel channel mean
        return y * jax.lax.rsqrt(ms + 1e-8)

    xb = x_ref[...].astype(bf16)         # (Nt, C)
    b1 = b1_ref[...]                     # (1, C)   f32
    b2 = b2_ref[...]                     # (1, C)   f32
    wr = wrgb_ref[...]                   # (C, 8)   bf16
    br = brgb_ref[...]                   # (1, 8)   f32

    # conv1: 4x4, pad=3 on a 1x1 map -> one (C,C) matmul per output pixel.
    h1 = [act_pn(jnp.dot(xb, w1_ref[p], preferred_element_type=f32) + b1)
          for p in range(P)]
    h1b = [h.astype(bf16) for h in h1]   # cast once; each block feeds 4-9 taps

    # conv2: 3x3, pad=1 on the 4x4 map -> 9 shifted (C,C) taps, skip OOB taps.
    h2 = []
    for ph in range(4):
        for pw in range(4):
            acc = None
            for di in (-1, 0, 1):
                qh = ph + di
                if not 0 <= qh < 4:
                    continue
                for dj in (-1, 0, 1):
                    qw = pw + dj
                    if not 0 <= qw < 4:
                        continue
                    tap = (di + 1) * 3 + (dj + 1)
                    d = jnp.dot(h1b[qh * 4 + qw], w2_ref[tap],
                                preferred_element_type=f32)
                    acc = d if acc is None else acc + d
            h2.append(act_pn(acc + b2))

    # ToRGB: 1x1 conv per pixel block (3 channels padded to 8); the 16 blocks
    # are concatenated and written as a single lane-dense (Nt, 128) store.
    rgb = [jnp.dot(h.astype(bf16), wr, preferred_element_type=f32) + br
           for h in h2]
    o_ref[...] = jnp.concatenate(rgb, axis=-1).astype(o_ref.dtype)


# ----------------------- host-side one-time packing -------------------------

def pack_generator_params(params):
    """Fold WS scales, transpose to (Cin, Cout) matmul layout, split into
    per-pixel / per-tap blocks, cast weights to bf16.  Runs once."""
    w1 = np.asarray(params["conv1_w"], np.float32)   # (C, C, 4, 4)  OIHW
    b1 = np.asarray(params["conv1_b"], np.float32)
    w2 = np.asarray(params["conv2_w"], np.float32)   # (C, C, 3, 3)
    b2 = np.asarray(params["conv2_b"], np.float32)
    wr = np.asarray(params["rgb_w"], np.float32)     # (3, C, 1, 1)
    br = np.asarray(params["rgb_b"], np.float32)

    C = w1.shape[1]
    s1 = np.float32(np.sqrt(2.0 / (C * 4 * 4)))
    s2 = np.float32(np.sqrt(2.0 / (C * 3 * 3)))
    sr = np.float32(np.sqrt(2.0 / (C * 1 * 1)))

    # conv1 on a 1x1 input with pad=3: output pixel (oh, ow) only sees kernel
    # tap (3-oh, 3-ow)  ->  one (Cin, Cout) matrix per output pixel.
    w1t = np.zeros((P, C, C), np.float32)
    for oh in range(4):
        for ow in range(4):
            w1t[oh * 4 + ow] = (s1 * w1[:, :, 3 - oh, 3 - ow]).T

    # conv2 3x3 taps, tap t = i*3 + j, stored as (Cin, Cout).
    w2t = np.zeros((9, C, C), np.float32)
    for i in range(3):
        for j in range(3):
            w2t[i * 3 + j] = (s2 * w2[:, :, i, j]).T

    # ToRGB: only the dense (C, 8) block (cols 3..7 are zero padding).
    wrd = np.zeros((C, CRGB_PAD), np.float32)
    wrd[:, :CRGB] = (sr * wr[:, :, 0, 0]).T

    brp = np.zeros((1, CRGB_PAD), np.float32)
    brp[0, :CRGB] = br

    return dict(
        w1t=jnp.asarray(w1t, jnp.bfloat16),
        b1=jnp.asarray(b1[None, :], jnp.float32),
        w2t=jnp.asarray(w2t, jnp.bfloat16),
        b2=jnp.asarray(b2[None, :], jnp.float32),
        wrd=jnp.asarray(wrd, jnp.bfloat16),
        brgb=jnp.asarray(brp, jnp.float32),
    )


# ------------------------------ forward -------------------------------------

def _resident_spec(shape):
    """Grid-invariant operand: whole array, constant index map, single buffer
    (double-buffering a constant block is pure VMEM waste)."""
    index_map = lambda i: (0,) * len(shape)
    try:
        return pl.BlockSpec(shape, index_map, pipeline_mode=pl.Buffered(1))
    except TypeError:  # Pallas build without per-operand buffering control
        return pl.BlockSpec(shape, index_map)


def _generator_forward(x, packed):
    """Generator.forward with depth=1, alpha=1 (fade branch is dead code).
    x: (N, C, 1, 1) -> (N, 3, 4, 4)."""
    N, C = x.shape[0], x.shape[1]
    x2d = x.reshape(N, C).astype(jnp.float32)

    # Pad the batch to a sublane multiple (8) and tile it so the single weight
    # DMA is amortized over many rows; the batch axis runs "parallel".
    n_pad8 = -(-N // 8) * 8
    nt = min(BATCH_TILE, n_pad8)
    n_pad = -(-n_pad8 // nt) * nt
    if n_pad != N:
        x2d = jnp.pad(x2d, ((0, n_pad - N), (0, 0)))

    # Scoped-VMEM budget: packed weights (x2 margin) + live activation blocks
    # + double-buffered x/out tiles, clamped to [32 MiB, 64 MiB] (v7x cap).
    weight_bytes = sum(int(np.prod(v.shape)) * v.dtype.itemsize
                       for v in packed.values())
    act_bytes = nt * C * 4 * 72          # ~16 f32 + 16 bf16 blocks live, x3 margin
    io_bytes = 2 * (nt * C * 4 + nt * P * CRGB_PAD * 4)
    vmem_limit = int(min(64 << 20,
                         max(32 << 20, 2 * weight_bytes + act_bytes + io_bytes)))

    out = pl.pallas_call(
        _generator_kernel,
        out_shape=jax.ShapeDtypeStruct((n_pad, P * CRGB_PAD), jnp.float32),
        grid=(n_pad // nt,),
        in_specs=[
            pl.BlockSpec((nt, C), lambda i: (i, 0)),       # x batch tile
            _resident_spec((P, C, C)),                     # conv1 per-pixel taps (bf16)
            _resident_spec((1, C)),                        # conv1 bias (f32)
            _resident_spec((9, C, C)),                     # conv2 3x3 taps (bf16)
            _resident_spec((1, C)),                        # conv2 bias (f32)
            _resident_spec((C, CRGB_PAD)),                 # ToRGB dense block (bf16)
            _resident_spec((1, CRGB_PAD)),                 # ToRGB bias (f32)
        ],
        out_specs=pl.BlockSpec((nt, P * CRGB_PAD), lambda i: (i, 0)),
        compiler_params=pltpu.CompilerParams(
            dimension_semantics=("parallel",),
            vmem_limit_bytes=vmem_limit,
        ),
    )(x2d, packed["w1t"], packed["b1"], packed["w2t"], packed["b2"],
      packed["wrd"], packed["brgb"])

    # (N, 16*8) -> (N, 4, 4, 8) -> slice RGB -> NCHW
    return out[:N].reshape(N, 4, 4, CRGB_PAD)[..., :CRGB].transpose(0, 3, 1, 2)


generator_forward = jax.jit(_generator_forward)


# ------------------------- pure-JAX reference -------------------------------

def _ref_wsconv(x, w, b, pad):
    Cin, kh, kw = w.shape[1], w.shape[2], w.shape[3]
    scale = np.sqrt(2.0 / (Cin * kh * kw)).astype(np.float32)
    y = jax.lax.conv_general_dilated(
        x, w * scale, window_strides=(1, 1),
        padding=((pad, pad), (pad, pad)),
        dimension_numbers=("NCHW", "OIHW", "NCHW"))
    return y + b.reshape(1, -1, 1, 1)


def _ref_forward(x, p):
    def act_pn(y):
        y = jnp.where(y >= 0, y, 0.2 * y)
        return y * jax.lax.rsqrt(jnp.mean(y * y, axis=1, keepdims=True) + 1e-8)
    y = act_pn(_ref_wsconv(x, p["conv1_w"], p["conv1_b"], pad=3))
    y = act_pn(_ref_wsconv(y, p["conv2_w"], p["conv2_b"], pad=1))
    return _ref_wsconv(y, p["rgb_w"], p["rgb_b"], pad=0)


# --------------------------------- main --------------------------------------

if __name__ == "__main__":
    z_dim = 32   # small stand-in for the production 512
    batch = 2

    key = jax.random.PRNGKey(0)
    k_x, k_w1, k_w2, k_rgb = jax.random.split(key, 4)

    # Deterministic parameter init (matches module __init__ shapes):
    #   conv1/conv2 weights ~ N(0,1), biases = 0; ToRGB weight ~ N(0,1), bias = 0.
    params = {
        "conv1_w": jax.random.normal(k_w1, (z_dim, z_dim, 4, 4), jnp.float32),
        "conv1_b": jnp.zeros((z_dim,), jnp.float32),
        "conv2_w": jax.random.normal(k_w2, (z_dim, z_dim, 3, 3), jnp.float32),
        "conv2_b": jnp.zeros((z_dim,), jnp.float32),
        "rgb_w":   jax.random.normal(k_rgb, (3, z_dim, 1, 1), jnp.float32),
        "rgb_b":   jnp.zeros((3,), jnp.float32),
    }

    x = jax.random.normal(k_x, (batch, z_dim, 1, 1), jnp.float32)

    packed = pack_generator_params(params)        # one-time host-side packing

    out = generator_forward(x, packed)
    out = jax.block_until_ready(out)
    assert out.shape == (batch, 3, 4, 4), out.shape

    ref = jax.block_until_ready(_ref_forward(x, params))
    # Tolerance loosened vs. the f32-weight version: weights (and the matmul
    # operands) are bf16 now, accumulation stays f32.
    np.testing.assert_allclose(np.asarray(out), np.asarray(ref), rtol=5e-2, atol=5e-2)

    print("KERNEL_OK")
</pallas_src>

<mosaic_0001>
module attributes {stable_mosaic.version = 11 : i64} {
  func.func @_generator_kernel(%arg0: i32, %arg1: memref<8x32xf32, #tpu.memory_space<vmem>>, %arg2: memref<16x32x32xbf16, #tpu.memory_space<vmem>>, %arg3: memref<1x32xf32, #tpu.memory_space<vmem>>, %arg4: memref<9x32x32xbf16, #tpu.memory_space<vmem>>, %arg5: memref<1x32xf32, #tpu.memory_space<vmem>>, %arg6: memref<32x8xbf16, #tpu.memory_space<vmem>>, %arg7: memref<1x8xf32, #tpu.memory_space<vmem>>, %arg8: memref<8x128xf32, #tpu.memory_space<vmem>>) attributes {dimension_semantics = [#tpu.dimension_semantics<parallel>], iteration_bounds = array<i64: 1>, scalar_prefetch = 0 : i64, scratch_operands = 0 : i64, tpu.core_type = #tpu.core_type<tc>, window_params = [{transform_indices = @transform_0, window_bounds = array<i64: 8, 32>}, {pipeline_mode = #tpu.pipeline_mode<synchronous>, transform_indices = @transform_1, window_bounds = array<i64: 16, 32, 32>}, {pipeline_mode = #tpu.pipeline_mode<synchronous>, transform_indices = @transform_2, window_bounds = array<i64: 1, 32>}, {pipeline_mode = #tpu.pipeline_mode<synchronous>, transform_indices = @transform_3, window_bounds = array<i64: 9, 32, 32>}, {pipeline_mode = #tpu.pipeline_mode<synchronous>, transform_indices = @transform_4, window_bounds = array<i64: 1, 32>}, {pipeline_mode = #tpu.pipeline_mode<synchronous>, transform_indices = @transform_5, window_bounds = array<i64: 32, 8>}, {pipeline_mode = #tpu.pipeline_mode<synchronous>, transform_indices = @transform_6, window_bounds = array<i64: 1, 8>}, {transform_indices = @transform_7, window_bounds = array<i64: 8, 128>}]} {
    %c0 = arith.constant 0 : index
    %c0_0 = arith.constant 0 : index
    %0 = vector.load %arg1[%c0, %c0_0] : memref<8x32xf32, #tpu.memory_space<vmem>>, vector<8x32xf32>
    %1 = arith.truncf %0 : vector<8x32xf32> to vector<8x32xbf16>
    %c0_1 = arith.constant 0 : index
    %c0_2 = arith.constant 0 : index
    %2 = vector.load %arg3[%c0_1, %c0_2] : memref<1x32xf32, #tpu.memory_space<vmem>>, vector<1x32xf32>
    %c0_3 = arith.constant 0 : index
    %c0_4 = arith.constant 0 : index
    %3 = vector.load %arg5[%c0_3, %c0_4] : memref<1x32xf32, #tpu.memory_space<vmem>>, vector<1x32xf32>
    %c0_5 = arith.constant 0 : index
    %c0_6 = arith.constant 0 : index
    %4 = vector.load %arg6[%c0_5, %c0_6] : memref<32x8xbf16, #tpu.memory_space<vmem>>, vector<32x8xbf16>
    %c0_7 = arith.constant 0 : index
    %c0_8 = arith.constant 0 : index
    %5 = vector.load %arg7[%c0_7, %c0_8] : memref<1x8xf32, #tpu.memory_space<vmem>>, vector<1x8xf32>
    %c0_9 = arith.constant 0 : index
    %c0_10 = arith.constant 0 : index
    %c0_11 = arith.constant 0 : index
    %6 = vector.load %arg2[%c0_9, %c0_10, %c0_11] : memref<16x32x32xbf16, #tpu.memory_space<vmem>>, vector<1x32x32xbf16>
    %7 = vector.shape_cast %6 : vector<1x32x32xbf16> to vector<32x32xbf16>
    %cst = arith.constant dense<0.000000e+00> : vector<8x32xf32>
    %8 = tpu.matmul %1, %7, %cst {dimension_numbers = #tpu.dot_dimension_numbers<[1], [0], [0], [1], [0, 0, 1, 1], [], []>} : vector<8x32xbf16>, vector<32x32xbf16>, vector<8x32xf32> -> vector<8x32xf32>
    %9 = vector.broadcast %2 : vector<1x32xf32> to vector<8x32xf32>
    %10 = arith.addf %8, %9 : vector<8x32xf32>
    %cst_12 = arith.constant 2.000000e-01 : f32
    %11 = vector.broadcast %cst_12 : f32 to vector<8x32xf32>
    %12 = arith.mulf %11, %10 : vector<8x32xf32>
    %13 = arith.maximumf %10, %12 : vector<8x32xf32>
    %14 = arith.mulf %13, %13 : vector<8x32xf32>
    %cst_13 = arith.constant dense<0.000000e+00> : vector<8xf32>
    %15 = vector.multi_reduction <add>, %14, %cst_13 [1] : vector<8x32xf32> to vector<8xf32>
    %16 = vector.shape_cast %15 : vector<8xf32> to vector<8x1xf32>
    %cst_14 = arith.constant 3.200000e+01 : f32
    %17 = vector.broadcast %cst_14 : f32 to vector<8x1xf32>
    %18 = arith.divf %16, %17 : vector<8x1xf32>
    %cst_15 = arith.constant 9.99999993E-9 : f32
    %19 = vector.broadcast %cst_15 : f32 to vector<8x1xf32>
    %20 = arith.addf %18, %19 : vector<8x1xf32>
    %21 = math.rsqrt %20 : vector<8x1xf32>
    %22 = vector.broadcast %21 : vector<8x1xf32> to vector<8x32xf32>
    %23 = arith.mulf %13, %22 : vector<8x32xf32>
    %c1 = arith.constant 1 : index
    %c0_16 = arith.constant 0 : index
    %c0_17 = arith.constant 0 : index
    %24 = vector.load %arg2[%c1, %c0_16, %c0_17] : memref<16x32x32xbf16, #tpu.memory_space<vmem>>, vector<1x32x32xbf16>
    %25 = vector.shape_cast %24 : vector<1x32x32xbf16> to vector<32x32xbf16>
    %cst_18 = arith.constant dense<0.000000e+00> : vector<8x32xf32>
    %26 = tpu.matmul %1, %25, %cst_18 {dimension_numbers = #tpu.dot_dimension_numbers<[1], [0], [0], [1], [0, 0, 1, 1], [], []>} : vector<8x32xbf16>, vector<32x32xbf16>, vector<8x32xf32> -> vector<8x32xf32>
    %27 = vector.broadcast %2 : vector<1x32xf32> to vector<8x32xf32>
    %28 = arith.addf %26, %27 : vector<8x32xf32>
    %cst_19 = arith.constant 2.000000e-01 : f32
    %29 = vector.broadcast %cst_19 : f32 to vector<8x32xf32>
    %30 = arith.mulf %29, %28 : vector<8x32xf32>
    %31 = arith.maximumf %28, %30 : vector<8x32xf32>
    %32 = arith.mulf %31, %31 : vector<8x32xf32>
    %cst_20 = arith.constant dense<0.000000e+00> : vector<8xf32>
    %33 = vector.multi_reduction <add>, %32, %cst_20 [1] : vector<8x32xf32> to vector<8xf32>
    %34 = vector.shape_cast %33 : vector<8xf32> to vector<8x1xf32>
    %cst_21 = arith.constant 3.200000e+01 : f32
    %35 = vector.broadcast %cst_21 : f32 to vector<8x1xf32>
    %36 = arith.divf %34, %35 : vector<8x1xf32>
    %cst_22 = arith.constant 9.99999993E-9 : f32
    %37 = vector.broadcast %cst_22 : f32 to vector<8x1xf32>
    %38 = arith.addf %36, %37 : vector<8x1xf32>
    %39 = math.rsqrt %38 : vector<8x1xf32>
    %40 = vector.broadcast %39 : vector<8x1xf32> to vector<8x32xf32>
    %41 = arith.mulf %31, %40 : vector<8x32xf32>
    %c2 = arith.constant 2 : index
    %c0_23 = arith.constant 0 : index
    %c0_24 = arith.constant 0 : index
    %42 = vector.load %arg2[%c2, %c0_23, %c0_24] : memref<16x32x32xbf16, #tpu.memory_space<vmem>>, vector<1x32x32xbf16>
    %43 = vector.shape_cast %42 : vector<1x32x32xbf16> to vector<32x32xbf16>
    %cst_25 = arith.constant dense<0.000000e+00> : vector<8x32xf32>
    %44 = tpu.matmul %1, %43, %cst_25 {dimension_numbers = #tpu.dot_dimension_numbers<[1], [0], [0], [1], [0, 0, 1, 1], [], []>} : vector<8x32xbf16>, vector<32x32xbf16>, vector<8x32xf32> -> vector<8x32xf32>
    %45 = vector.broadcast %2 : vector<1x32xf32> to vector<8x32xf32>
    %46 = arith.addf %44, %45 : vector<8x32xf32>
    %cst_26 = arith.constant 2.000000e-01 : f32
    %47 = vector.broadcast %cst_26 : f32 to vector<8x32xf32>
    %48 = arith.mulf %47, %46 : vector<8x32xf32>
    %49 = arith.maximumf %46, %48 : vector<8x32xf32>
    %50 = arith.mulf %49, %49 : vector<8x32xf32>
    %cst_27 = arith.constant dense<0.000000e+00> : vector<8xf32>
    %51 = vector.multi_reduction <add>, %50, %cst_27 [1] : vector<8x32xf32> to vector<8xf32>
    %52 = vector.shape_cast %51 : vector<8xf32> to vector<8x1xf32>
    %cst_28 = arith.constant 3.200000e+01 : f32
    %53 = vector.broadcast %cst_28 : f32 to vector<8x1xf32>
    %54 = arith.divf %52, %53 : vector<8x1xf32>
    %cst_29 = arith.constant 9.99999993E-9 : f32
    %55 = vector.broadcast %cst_29 : f32 to vector<8x1xf32>
    %56 = arith.addf %54, %55 : vector<8x1xf32>
    %57 = math.rsqrt %56 : vector<8x1xf32>
    %58 = vector.broadcast %57 : vector<8x1xf32> to vector<8x32xf32>
    %59 = arith.mulf %49, %58 : vector<8x32xf32>
    %c3 = arith.constant 3 : index
    %c0_30 = arith.constant 0 : index
    %c0_31 = arith.constant 0 : index
    %60 = vector.load %arg2[%c3, %c0_30, %c0_31] : memref<16x32x32xbf16, #tpu.memory_space<vmem>>, vector<1x32x32xbf16>
    %61 = vector.shape_cast %60 : vector<1x32x32xbf16> to vector<32x32xbf16>
    %cst_32 = arith.constant dense<0.000000e+00> : vector<8x32xf32>
    %62 = tpu.matmul %1, %61, %cst_32 {dimension_numbers = #tpu.dot_dimension_numbers<[1], [0], [0], [1], [0, 0, 1, 1], [], []>} : vector<8x32xbf16>, vector<32x32xbf16>, vector<8x32xf32> -> vector<8x32xf32>
    %63 = vector.broadcast %2 : vector<1x32xf32> to vector<8x32xf32>
    %64 = arith.addf %62, %63 : vector<8x32xf32>
    %cst_33 = arith.constant 2.000000e-01 : f32
    %65 = vector.broadcast %cst_33 : f32 to vector<8x32xf32>
    %66 = arith.mulf %65, %64 : vector<8x32xf32>
    %67 = arith.maximumf %64, %66 : vector<8x32xf32>
    %68 = arith.mulf %67, %67 : vector<8x32xf32>
    %cst_34 = arith.constant dense<0.000000e+00> : vector<8xf32>
    %69 = vector.multi_reduction <add>, %68, %cst_34 [1] : vector<8x32xf32> to vector<8xf32>
    %70 = vector.shape_cast %69 : vector<8xf32> to vector<8x1xf32>
    %cst_35 = arith.constant 3.200000e+01 : f32
    %71 = vector.broadcast %cst_35 : f32 to vector<8x1xf32>
    %72 = arith.divf %70, %71 : vector<8x1xf32>
    %cst_36 = arith.constant 9.99999993E-9 : f32
    %73 = vector.broadcast %cst_36 : f32 to vector<8x1xf32>
    %74 = arith.addf %72, %73 : vector<8x1xf32>
    %75 = math.rsqrt %74 : vector<8x1xf32>
    %76 = vector.broadcast %75 : vector<8x1xf32> to vector<8x32xf32>
    %77 = arith.mulf %67, %76 : vector<8x32xf32>
    %c4 = arith.constant 4 : index
    %c0_37 = arith.constant 0 : index
    %c0_38 = arith.constant 0 : index
    %78 = vector.load %arg2[%c4, %c0_37, %c0_38] : memref<16x32x32xbf16, #tpu.memory_space<vmem>>, vector<1x32x32xbf16>
    %79 = vector.shape_cast %78 : vector<1x32x32xbf16> to vector<32x32xbf16>
    %cst_39 = arith.constant dense<0.000000e+00> : vector<8x32xf32>
    %80 = tpu.matmul %1, %79, %cst_39 {dimension_numbers = #tpu.dot_dimension_numbers<[1], [0], [0], [1], [0, 0, 1, 1], [], []>} : vector<8x32xbf16>, vector<32x32xbf16>, vector<8x32xf32> -> vector<8x32xf32>
    %81 = vector.broadcast %2 : vector<1x32xf32> to vector<8x32xf32>
    %82 = arith.addf %80, %81 : vector<8x32xf32>
    %cst_40 = arith.constant 2.000000e-01 : f32
    %83 = vector.broadcast %cst_40 : f32 to vector<8x32xf32>
    %84 = arith.mulf %83, %82 : vector<8x32xf32>
    %85 = arith.maximumf %82, %84 : vector<8x32xf32>
    %86 = arith.mulf %85, %85 : vector<8x32xf32>
    %cst_41 = arith.constant dense<0.000000e+00> : vector<8xf32>
    %87 = vector.multi_reduction <add>, %86, %cst_41 [1] : vector<8x32xf32> to vector<8xf32>
    %88 = vector.shape_cast %87 : vector<8xf32> to vector<8x1xf32>
    %cst_42 = arith.constant 3.200000e+01 : f32
    %89 = vector.broadcast %cst_42 : f32 to vector<8x1xf32>
    %90 = arith.divf %88, %89 : vector<8x1xf32>
    %cst_43 = arith.constant 9.99999993E-9 : f32
    %91 = vector.broadcast %cst_43 : f32 to vector<8x1xf32>
    %92 = arith.addf %90, %91 : vector<8x1xf32>
    %93 = math.rsqrt %92 : vector<8x1xf32>
    %94 = vector.broadcast %93 : vector<8x1xf32> to vector<8x32xf32>
    %95 = arith.mulf %85, %94 : vector<8x32xf32>
    %c5 = arith.constant 5 : index
    %c0_44 = arith.constant 0 : index
    %c0_45 = arith.constant 0 : index
    %96 = vector.load %arg2[%c5, %c0_44, %c0_45] : memref<16x32x32xbf16, #tpu.memory_space<vmem>>, vector<1x32x32xbf16>
    %97 = vector.shape_cast %96 : vector<1x32x32xbf16> to vector<32x32xbf16>
    %cst_46 = arith.constant dense<0.000000e+00> : vector<8x32xf32>
    %98 = tpu.matmul %1, %97, %cst_46 {dimension_numbers = #tpu.dot_dimension_numbers<[1], [0], [0], [1], [0, 0, 1, 1], [], []>} : vector<8x32xbf16>, vector<32x32xbf16>, vector<8x32xf32> -> vector<8x32xf32>
    %99 = vector.broadcast %2 : vector<1x32xf32> to vector<8x32xf32>
    %100 = arith.addf %98, %99 : vector<8x32xf32>
    %cst_47 = arith.constant 2.000000e-01 : f32
    %101 = vector.broadcast %cst_47 : f32 to vector<8x32xf32>
    %102 = arith.mulf %101, %100 : vector<8x32xf32>
    %103 = arith.maximumf %100, %102 : vector<8x32xf32>
    %104 = arith.mulf %103, %103 : vector<8x32xf32>
    %cst_48 = arith.constant dense<0.000000e+00> : vector<8xf32>
    %105 = vector.multi_reduction <add>, %104, %cst_48 [1] : vector<8x32xf32> to vector<8xf32>
    %106 = vector.shape_cast %105 : vector<8xf32> to vector<8x1xf32>
    %cst_49 = arith.constant 3.200000e+01 : f32
    %107 = vector.broadcast %cst_49 : f32 to vector<8x1xf32>
    %108 = arith.divf %106, %107 : vector<8x1xf32>
    %cst_50 = arith.constant 9.99999993E-9 : f32
    %109 = vector.broadcast %cst_50 : f32 to vector<8x1xf32>
    %110 = arith.addf %108, %109 : vector<8x1xf32>
    %111 = math.rsqrt %110 : vector<8x1xf32>
    %112 = vector.broadcast %111 : vector<8x1xf32> to vector<8x32xf32>
    %113 = arith.mulf %103, %112 : vector<8x32xf32>
    %c6 = arith.constant 6 : index
    %c0_51 = arith.constant 0 : index
    %c0_52 = arith.constant 0 : index
    %114 = vector.load %arg2[%c6, %c0_51, %c0_52] : memref<16x32x32xbf16, #tpu.memory_space<vmem>>, vector<1x32x32xbf16>
    %115 = vector.shape_cast %114 : vector<1x32x32xbf16> to vector<32x32xbf16>
    %cst_53 = arith.constant dense<0.000000e+00> : vector<8x32xf32>
    %116 = tpu.matmul %1, %115, %cst_53 {dimension_numbers = #tpu.dot_dimension_numbers<[1], [0], [0], [1], [0, 0, 1, 1], [], []>} : vector<8x32xbf16>, vector<32x32xbf16>, vector<8x32xf32> -> vector<8x32xf32>
    %117 = vector.broadcast %2 : vector<1x32xf32> to vector<8x32xf32>
    %118 = arith.addf %116, %117 : vector<8x32xf32>
    %cst_54 = arith.constant 2.000000e-01 : f32
    %119 = vector.broadcast %cst_54 : f32 to vector<8x32xf32>
    %120 = arith.mulf %119, %118 : vector<8x32xf32>
    %121 = arith.maximumf %118, %120 : vector<8x32xf32>
    %122 = arith.mulf %121, %121 : vector<8x32xf32>
    %cst_55 = arith.constant dense<0.000000e+00> : vector<8xf32>
    %123 = vector.multi_reduction <add>, %122, %cst_55 [1] : vector<8x32xf32> to vector<8xf32>
    %124 = vector.shape_cast %123 : vector<8xf32> to vector<8x1xf32>
    %cst_56 = arith.constant 3.200000e+01 : f32
    %125 = vector.broadcast %cst_56 : f32 to vector<8x1xf32>
    %126 = arith.divf %124, %125 : vector<8x1xf32>
    %cst_57 = arith.constant 9.99999993E-9 : f32
    %127 = vector.broadcast %cst_57 : f32 to vector<8x1xf32>
    %128 = arith.addf %126, %127 : vector<8x1xf32>
    %129 = math.rsqrt %128 : vector<8x1xf32>
    %130 = vector.broadcast %129 : vector<8x1xf32> to vector<8x32xf32>
    %131 = arith.mulf %121, %130 : vector<8x32xf32>
    %c7 = arith.constant 7 : index
    %c0_58 = arith.constant 0 : index
    %c0_59 = arith.constant 0 : index
    %132 = vector.load %arg2[%c7, %c0_58, %c0_59] : memref<16x32x32xbf16, #tpu.memory_space<vmem>>, vector<1x32x32xbf16>
    %133 = vector.shape_cast %132 : vector<1x32x32xbf16> to vector<32x32xbf16>
    %cst_60 = arith.constant dense<0.000000e+00> : vector<8x32xf32>
    %134 = tpu.matmul %1, %133, %cst_60 {dimension_numbers = #tpu.dot_dimension_numbers<[1], [0], [0], [1], [0, 0, 1, 1], [], []>} : vector<8x32xbf16>, vector<32x32xbf16>, vector<8x32xf32> -> vector<8x32xf32>
    %135 = vector.broadcast %2 : vector<1x32xf32> to vector<8x32xf32>
    %136 = arith.addf %134, %135 : vector<8x32xf32>
    %cst_61 = arith.constant 2.000000e-01 : f32
    %137 = vector.broadcast %cst_61 : f32 to vector<8x32xf32>
    %138 = arith.mulf %137, %136 : vector<8x32xf32>
    %139 = arith.maximumf %136, %138 : vector<8x32xf32>
    %140 = arith.mulf %139, %139 : vector<8x32xf32>
    %cst_62 = arith.constant dense<0.000000e+00> : vector<8xf32>
    %141 = vector.multi_reduction <add>, %140, %cst_62 [1] : vector<8x32xf32> to vector<8xf32>
    %142 = vector.shape_cast %141 : vector<8xf32> to vector<8x1xf32>
    %cst_63 = arith.constant 3.200000e+01 : f32
    %143 = vector.broadcast %cst_63 : f32 to vector<8x1xf32>
    %144 = arith.divf %142, %143 : vector<8x1xf32>
    %cst_64 = arith.constant 9.99999993E-9 : f32
    %145 = vector.broadcast %cst_64 : f32 to vector<8x1xf32>
    %146 = arith.addf %144, %145 : vector<8x1xf32>
    %147 = math.rsqrt %146 : vector<8x1xf32>
    %148 = vector.broadcast %147 : vector<8x1xf32> to vector<8x32xf32>
    %149 = arith.mulf %139, %148 : vector<8x32xf32>
    %c8 = arith.constant 8 : index
    %c0_65 = arith.constant 0 : index
    %c0_66 = arith.constant 0 : index
    %150 = vector.load %arg2[%c8, %c0_65, %c0_66] : memref<16x32x32xbf16, #tpu.memory_space<vmem>>, vector<1x32x32xbf16>
    %151 = vector.shape_cast %150 : vector<1x32x32xbf16> to vector<32x32xbf16>
    %cst_67 = arith.constant dense<0.000000e+00> : vector<8x32xf32>
    %152 = tpu.matmul %1, %151, %cst_67 {dimension_numbers = #tpu.dot_dimension_numbers<[1], [0], [0], [1], [0, 0, 1, 1], [], []>} : vector<8x32xbf16>, vector<32x32xbf16>, vector<8x32xf32> -> vector<8x32xf32>
    %153 = vector.broadcast %2 : vector<1x32xf32> to vector<8x32xf32>
    %154 = arith.addf %152, %153 : vector<8x32xf32>
    %cst_68 = arith.constant 2.000000e-01 : f32
    %155 = vector.broadcast %cst_68 : f32 to vector<8x32xf32>
    %156 = arith.mulf %155, %154 : vector<8x32xf32>
    %157 = arith.maximumf %154, %156 : vector<8x32xf32>
    %158 = arith.mulf %157, %157 : vector<8x32xf32>
    %cst_69 = arith.constant dense<0.000000e+00> : vector<8xf32>
    %159 = vector.multi_reduction <add>, %158, %cst_69 [1] : vector<8x32xf32> to vector<8xf32>
    %160 = vector.shape_cast %159 : vector<8xf32> to vector<8x1xf32>
    %cst_70 = arith.constant 3.200000e+01 : f32
    %161 = vector.broadcast %cst_70 : f32 to vector<8x1xf32>
    %162 = arith.divf %160, %161 : vector<8x1xf32>
    %cst_71 = arith.constant 9.99999993E-9 : f32
    %163 = vector.broadcast %cst_71 : f32 to vector<8x1xf32>
    %164 = arith.addf %162, %163 : vector<8x1xf32>
    %165 = math.rsqrt %164 : vector<8x1xf32>
    %166 = vector.broadcast %165 : vector<8x1xf32> to vector<8x32xf32>
    %167 = arith.mulf %157, %166 : vector<8x32xf32>
    %c9 = arith.constant 9 : index
    %c0_72 = arith.constant 0 : index
    %c0_73 = arith.constant 0 : index
    %168 = vector.load %arg2[%c9, %c0_72, %c0_73] : memref<16x32x32xbf16, #tpu.memory_space<vmem>>, vector<1x32x32xbf16>
    %169 = vector.shape_cast %168 : vector<1x32x32xbf16> to vector<32x32xbf16>
    %cst_74 = arith.constant dense<0.000000e+00> : vector<8x32xf32>
    %170 = tpu.matmul %1, %169, %cst_74 {dimension_numbers = #tpu.dot_dimension_numbers<[1], [0], [0], [1], [0, 0, 1, 1], [], []>} : vector<8x32xbf16>, vector<32x32xbf16>, vector<8x32xf32> -> vector<8x32xf32>
    %171 = vector.broadcast %2 : vector<1x32xf32> to vector<8x32xf32>
    %172 = arith.addf %170, %171 : vector<8x32xf32>
    %cst_75 = arith.constant 2.000000e-01 : f32
    %173 = vector.broadcast %cst_75 : f32 to vector<8x32xf32>
    %174 = arith.mulf %173, %172 : vector<8x32xf32>
    %175 = arith.maximumf %172, %174 : vector<8x32xf32>
    %176 = arith.mulf %175, %175 : vector<8x32xf32>
    %cst_76 = arith.constant dense<0.000000e+00> : vector<8xf32>
    %177 = vector.multi_reduction <add>, %176, %cst_76 [1] : vector<8x32xf32> to vector<8xf32>
    %178 = vector.shape_cast %177 : vector<8xf32> to vector<8x1xf32>
    %cst_77 = arith.constant 3.200000e+01 : f32
    %179 = vector.broadcast %cst_77 : f32 to vector<8x1xf32>
    %180 = arith.divf %178, %179 : vector<8x1xf32>
    %cst_78 = arith.constant 9.99999993E-9 : f32
    %181 = vector.broadcast %cst_78 : f32 to vector<8x1xf32>
    %182 = arith.addf %180, %181 : vector<8x1xf32>
    %183 = math.rsqrt %182 : vector<8x1xf32>
    %184 = vector.broadcast %183 : vector<8x1xf32> to vector<8x32xf32>
    %185 = arith.mulf %175, %184 : vector<8x32xf32>
    %c10 = arith.constant 10 : index
    %c0_79 = arith.constant 0 : index
    %c0_80 = arith.constant 0 : index
    %186 = vector.load %arg2[%c10, %c0_79, %c0_80] : memref<16x32x32xbf16, #tpu.memory_space<vmem>>, vector<1x32x32xbf16>
    %187 = vector.shape_cast %186 : vector<1x32x32xbf16> to vector<32x32xbf16>
    %cst_81 = arith.constant dense<0.000000e+00> : vector<8x32xf32>
    %188 = tpu.matmul %1, %187, %cst_81 {dimension_numbers = #tpu.dot_dimension_numbers<[1], [0], [0], [1], [0, 0, 1, 1], [], []>} : vector<8x32xbf16>, vector<32x32xbf16>, vector<8x32xf32> -> vector<8x32xf32>
    %189 = vector.broadcast %2 : vector<1x32xf32> to vector<8x32xf32>
    %190 = arith.addf %188, %189 : vector<8x32xf32>
    %cst_82 = arith.constant 2.000000e-01 : f32
    %191 = vector.broadcast %cst_82 : f32 to vector<8x32xf32>
    %192 = arith.mulf %191, %190 : vector<8x32xf32>
    %193 = arith.maximumf %190, %192 : vector<8x32xf32>
    %194 = arith.mulf %193, %193 : vector<8x32xf32>
    %cst_83 = arith.constant dense<0.000000e+00> : vector<8xf32>
    %195 = vector.multi_reduction <add>, %194, %cst_83 [1] : vector<8x32xf32> to vector<8xf32>
    %196 = vector.shape_cast %195 : vector<8xf32> to vector<8x1xf32>
    %cst_84 = arith.constant 3.200000e+01 : f32
    %197 = vector.broadcast %cst_84 : f32 to vector<8x1xf32>
    %198 = arith.divf %196, %197 : vector<8x1xf32>
    %cst_85 = arith.constant 9.99999993E-9 : f32
    %199 = vector.broadcast %cst_85 : f32 to vector<8x1xf32>
    %200 = arith.addf %198, %199 : vector<8x1xf32>
    %201 = math.rsqrt %200 : vector<8x1xf32>
    %202 = vector.broadcast %201 : vector<8x1xf32> to vector<8x32xf32>
    %203 = arith.mulf %193, %202 : vector<8x32xf32>
    %c11 = arith.constant 11 : index
    %c0_86 = arith.constant 0 : index
    %c0_87 = arith.constant 0 : index
    %204 = vector.load %arg2[%c11, %c0_86, %c0_87] : memref<16x32x32xbf16, #tpu.memory_space<vmem>>, vector<1x32x32xbf16>
    %205 = vector.shape_cast %204 : vector<1x32x32xbf16> to vector<32x32xbf16>
    %cst_88 = arith.constant dense<0.000000e+00> : vector<8x32xf32>
    %206 = tpu.matmul %1, %205, %cst_88 {dimension_numbers = #tpu.dot_dimension_numbers<[1], [0], [0], [1], [0, 0, 1, 1], [], []>} : vector<8x32xbf16>, vector<32x32xbf16>, vector<8x32xf32> -> vector<8x32xf32>
    %207 = vector.broadcast %2 : vector<1x32xf32> to vector<8x32xf32>
    %208 = arith.addf %206, %207 : vector<8x32xf32>
    %cst_89 = arith.constant 2.000000e-01 : f32
    %209 = vector.broadcast %cst_89 : f32 to vector<8x32xf32>
    %210 = arith.mulf %209, %208 : vector<8x32xf32>
    %211 = arith.maximumf %208, %210 : vector<8x32xf32>
    %212 = arith.mulf %211, %211 : vector<8x32xf32>
    %cst_90 = arith.constant dense<0.000000e+00> : vector<8xf32>
    %213 = vector.multi_reduction <add>, %212, %cst_90 [1] : vector<8x32xf32> to vector<8xf32>
    %214 = vector.shape_cast %213 : vector<8xf32> to vector<8x1xf32>
    %cst_91 = arith.constant 3.200000e+01 : f32
    %215 = vector.broadcast %cst_91 : f32 to vector<8x1xf32>
    %216 = arith.divf %214, %215 : vector<8x1xf32>
    %cst_92 = arith.constant 9.99999993E-9 : f32
    %217 = vector.broadcast %cst_92 : f32 to vector<8x1xf32>
    %218 = arith.addf %216, %217 : vector<8x1xf32>
    %219 = math.rsqrt %218 : vector<8x1xf32>
    %220 = vector.broadcast %219 : vector<8x1xf32> to vector<8x32xf32>
    %221 = arith.mulf %211, %220 : vector<8x32xf32>
    %c12 = arith.constant 12 : index
    %c0_93 = arith.constant 0 : index
    %c0_94 = arith.constant 0 : index
    %222 = vector.load %arg2[%c12, %c0_93, %c0_94] : memref<16x32x32xbf16, #tpu.memory_space<vmem>>, vector<1x32x32xbf16>
    %223 = vector.shape_cast %222 : vector<1x32x32xbf16> to vector<32x32xbf16>
    %cst_95 = arith.constant dense<0.000000e+00> : vector<8x32xf32>
    %224 = tpu.matmul %1, %223, %cst_95 {dimension_numbers = #tpu.dot_dimension_numbers<[1], [0], [0], [1], [0, 0, 1, 1], [], []>} : vector<8x32xbf16>, vector<32x32xbf16>, vector<8x32xf32> -> vector<8x32xf32>
    %225 = vector.broadcast %2 : vector<1x32xf32> to vector<8x32xf32>
    %226 = arith.addf %224, %225 : vector<8x32xf32>
    %cst_96 = arith.constant 2.000000e-01 : f32
    %227 = vector.broadcast %cst_96 : f32 to vector<8x32xf32>
    %228 = arith.mulf %227, %226 : vector<8x32xf32>
    %229 = arith.maximumf %226, %228 : vector<8x32xf32>
    %230 = arith.mulf %229, %229 : vector<8x32xf32>
    %cst_97 = arith.constant dense<0.000000e+00> : vector<8xf32>
    %231 = vector.multi_reduction <add>, %230, %cst_97 [1] : vector<8x32xf32> to vector<8xf32>
    %232 = vector.shape_cast %231 : vector<8xf32> to vector<8x1xf32>
    %cst_98 = arith.constant 3.200000e+01 : f32
    %233 = vector.broadcast %cst_98 : f32 to vector<8x1xf32>
    %234 = arith.divf %232, %233 : vector<8x1xf32>
    %cst_99 = arith.constant 9.99999993E-9 : f32
    %235 = vector.broadcast %cst_99 : f32 to vector<8x1xf32>
    %236 = arith.addf %234, %235 : vector<8x1xf32>
    %237 = math.rsqrt %236 : vector<8x1xf32>
    %238 = vector.broadcast %237 : vector<8x1xf32> to vector<8x32xf32>
    %239 = arith.mulf %229, %238 : vector<8x32xf32>
    %c13 = arith.constant 13 : index
    %c0_100 = arith.constant 0 : index
    %c0_101 = arith.constant 0 : index
    %240 = vector.load %arg2[%c13, %c0_100, %c0_101] : memref<16x32x32xbf16, #tpu.memory_space<vmem>>, vector<1x32x32xbf16>
    %241 = vector.shape_cast %240 : vector<1x32x32xbf16> to vector<32x32xbf16>
    %cst_102 = arith.constant dense<0.000000e+00> : vector<8x32xf32>
    %242 = tpu.matmul %1, %241, %cst_102 {dimension_numbers = #tpu.dot_dimension_numbers<[1], [0], [0], [1], [0, 0, 1, 1], [], []>} : vector<8x32xbf16>, vector<32x32xbf16>, vector<8x32xf32> -> vector<8x32xf32>
    %243 = vector.broadcast %2 : vector<1x32xf32> to vector<8x32xf32>
    %244 = arith.addf %242, %243 : vector<8x32xf32>
    %cst_103 = arith.constant 2.000000e-01 : f32
    %245 = vector.broadcast %cst_103 : f32 to vector<8x32xf32>
    %246 = arith.mulf %245, %244 : vector<8x32xf32>
    %247 = arith.maximumf %244, %246 : vector<8x32xf32>
    %248 = arith.mulf %247, %247 : vector<8x32xf32>
    %cst_104 = arith.constant dense<0.000000e+00> : vector<8xf32>
    %249 = vector.multi_reduction <add>, %248, %cst_104 [1] : vector<8x32xf32> to vector<8xf32>
    %250 = vector.shape_cast %249 : vector<8xf32> to vector<8x1xf32>
    %cst_105 = arith.constant 3.200000e+01 : f32
    %251 = vector.broadcast %cst_105 : f32 to vector<8x1xf32>
    %252 = arith.divf %250, %251 : vector<8x1xf32>
    %cst_106 = arith.constant 9.99999993E-9 : f32
    %253 = vector.broadcast %cst_106 : f32 to vector<8x1xf32>
    %254 = arith.addf %252, %253 : vector<8x1xf32>
    %255 = math.rsqrt %254 : vector<8x1xf32>
    %256 = vector.broadcast %255 : vector<8x1xf32> to vector<8x32xf32>
    %257 = arith.mulf %247, %256 : vector<8x32xf32>
    %c14 = arith.constant 14 : index
    %c0_107 = arith.constant 0 : index
    %c0_108 = arith.constant 0 : index
    %258 = vector.load %arg2[%c14, %c0_107, %c0_108] : memref<16x32x32xbf16, #tpu.memory_space<vmem>>, vector<1x32x32xbf16>
    %259 = vector.shape_cast %258 : vector<1x32x32xbf16> to vector<32x32xbf16>
    %cst_109 = arith.constant dense<0.000000e+00> : vector<8x32xf32>
    %260 = tpu.matmul %1, %259, %cst_109 {dimension_numbers = #tpu.dot_dimension_numbers<[1], [0], [0], [1], [0, 0, 1, 1], [], []>} : vector<8x32xbf16>, vector<32x32xbf16>, vector<8x32xf32> -> vector<8x32xf32>
    %261 = vector.broadcast %2 : vector<1x32xf32> to vector<8x32xf32>
    %262 = arith.addf %260, %261 : vector<8x32xf32>
    %cst_110 = arith.constant 2.000000e-01 : f32
    %263 = vector.broadcast %cst_110 : f32 to vector<8x32xf32>
    %264 = arith.mulf %263, %262 : vector<8x32xf32>
    %265 = arith.maximumf %262, %264 : vector<8x32xf32>
    %266 = arith.mulf %265, %265 : vector<8x32xf32>
    %cst_111 = arith.constant dense<0.000000e+00> : vector<8xf32>
    %267 = vector.multi_reduction <add>, %266, %cst_111 [1] : vector<8x32xf32> to vector<8xf32>
    %268 = vector.shape_cast %267 : vector<8xf32> to vector<8x1xf32>
    %cst_112 = arith.constant 3.200000e+01 : f32
    %269 = vector.broadcast %cst_112 : f32 to vector<8x1xf32>
    %270 = arith.divf %268, %269 : vector<8x1xf32>
    %cst_113 = arith.constant 9.99999993E-9 : f32
    %271 = vector.broadcast %cst_113 : f32 to vector<8x1xf32>
    %272 = arith.addf %270, %271 : vector<8x1xf32>
    %273 = math.rsqrt %272 : vector<8x1xf32>
    %274 = vector.broadcast %273 : vector<8x1xf32> to vector<8x32xf32>
    %275 = arith.mulf %265, %274 : vector<8x32xf32>
    %c15 = arith.constant 15 : index
    %c0_114 = arith.constant 0 : index
    %c0_115 = arith.constant 0 : index
    %276 = vector.load %arg2[%c15, %c0_114, %c0_115] : memref<16x32x32xbf16, #tpu.memory_space<vmem>>, vector<1x32x32xbf16>
    %277 = vector.shape_cast %276 : vector<1x32x32xbf16> to vector<32x32xbf16>
    %cst_116 = arith.constant dense<0.000000e+00> : vector<8x32xf32>
    %278 = tpu.matmul %1, %277, %cst_116 {dimension_numbers = #tpu.dot_dimension_numbers<[1], [0], [0], [1], [0, 0, 1, 1], [], []>} : vector<8x32xbf16>, vector<32x32xbf16>, vector<8x32xf32> -> vector<8x32xf32>
    %279 = vector.broadcast %2 : vector<1x32xf32> to vector<8x32xf32>
    %280 = arith.addf %278, %279 : vector<8x32xf32>
    %cst_117 = arith.constant 2.000000e-01 : f32
    %281 = vector.broadcast %cst_117 : f32 to vector<8x32xf32>
    %282 = arith.mulf %281, %280 : vector<8x32xf32>
    %283 = arith.maximumf %280, %282 : vector<8x32xf32>
    %284 = arith.mulf %283, %283 : vector<8x32xf32>
    %cst_118 = arith.constant dense<0.000000e+00> : vector<8xf32>
    %285 = vector.multi_reduction <add>, %284, %cst_118 [1] : vector<8x32xf32> to vector<8xf32>
    %286 = vector.shape_cast %285 : vector<8xf32> to vector<8x1xf32>
    %cst_119 = arith.constant 3.200000e+01 : f32
    %287 = vector.broadcast %cst_119 : f32 to vector<8x1xf32>
    %288 = arith.divf %286, %287 : vector<8x1xf32>
    %cst_120 = arith.constant 9.99999993E-9 : f32
    %289 = vector.broadcast %cst_120 : f32 to vector<8x1xf32>
    %290 = arith.addf %288, %289 : vector<8x1xf32>
    %291 = math.rsqrt %290 : vector<8x1xf32>
    %292 = vector.broadcast %291 : vector<8x1xf32> to vector<8x32xf32>
    %293 = arith.mulf %283, %292 : vector<8x32xf32>
    %294 = arith.truncf %23 : vector<8x32xf32> to vector<8x32xbf16>
    %295 = arith.truncf %41 : vector<8x32xf32> to vector<8x32xbf16>
    %296 = arith.truncf %59 : vector<8x32xf32> to vector<8x32xbf16>
    %297 = arith.truncf %77 : vector<8x32xf32> to vector<8x32xbf16>
    %298 = arith.truncf %95 : vector<8x32xf32> to vector<8x32xbf16>
    %299 = arith.truncf %113 : vector<8x32xf32> to vector<8x32xbf16>
    %300 = arith.truncf %131 : vector<8x32xf32> to vector<8x32xbf16>
    %301 = arith.truncf %149 : vector<8x32xf32> to vector<8x32xbf16>
    %302 = arith.truncf %167 : vector<8x32xf32> to vector<8x32xbf16>
    %303 = arith.truncf %185 : vector<8x32xf32> to vector<8x32xbf16>
    %304 = arith.truncf %203 : vector<8x32xf32> to vector<8x32xbf16>
    %305 = arith.truncf %221 : vector<8x32xf32> to vector<8x32xbf16>
    %306 = arith.truncf %239 : vector<8x32xf32> to vector<8x32xbf16>
    %307 = arith.truncf %257 : vector<8x32xf32> to vector<8x32xbf16>
    %308 = arith.truncf %275 : vector<8x32xf32> to vector<8x32xbf16>
    %309 = arith.truncf %293 : vector<8x32xf32> to vector<8x32xbf16>
    %c4_121 = arith.constant 4 : index
    %c0_122 = arith.constant 0 : index
    %c0_123 = arith.constant 0 : index
    %310 = vector.load %arg4[%c4_121, %c0_122, %c0_123] : memref<9x32x32xbf16, #tpu.memory_space<vmem>>, vector<1x32x32xbf16>
    %311 = vector.shape_cast %310 : vector<1x32x32xbf16> to vector<32x32xbf16>
    %cst_124 = arith.constant dense<0.000000e+00> : vector<8x32xf32>
    %312 = tpu.matmul %294, %311, %cst_124 {dimension_numbers = #tpu.dot_dimension_numbers<[1], [0], [0], [1], [0, 0, 1, 1], [], []>} : vector<8x32xbf16>, vector<32x32xbf16>, vector<8x32xf32> -> vector<8x32xf32>
    %c5_125 = arith.constant 5 : index
    %c0_126 = arith.constant 0 : index
    %c0_127 = arith.constant 0 : index
    %313 = vector.load %arg4[%c5_125, %c0_126, %c0_127] : memref<9x32x32xbf16, #tpu.memory_space<vmem>>, vector<1x32x32xbf16>
    %314 = vector.shape_cast %313 : vector<1x32x32xbf16> to vector<32x32xbf16>
    %cst_128 = arith.constant dense<0.000000e+00> : vector<8x32xf32>
    %315 = tpu.matmul %295, %314, %cst_128 {dimension_numbers = #tpu.dot_dimension_numbers<[1], [0], [0], [1], [0, 0, 1, 1], [], []>} : vector<8x32xbf16>, vector<32x32xbf16>, vector<8x32xf32> -> vector<8x32xf32>
    %316 = arith.addf %312, %315 : vector<8x32xf32>
    %c7_129 = arith.constant 7 : index
    %c0_130 = arith.constant 0 : index
    %c0_131 = arith.constant 0 : index
    %317 = vector.load %arg4[%c7_129, %c0_130, %c0_131] : memref<9x32x32xbf16, #tpu.memory_space<vmem>>, vector<1x32x32xbf16>
    %318 = vector.shape_cast %317 : vector<1x32x32xbf16> to vector<32x32xbf16>
    %cst_132 = arith.constant dense<0.000000e+00> : vector<8x32xf32>
    %319 = tpu.matmul %298, %318, %cst_132 {dimension_numbers = #tpu.dot_dimension_numbers<[1], [0], [0], [1], [0, 0, 1, 1], [], []>} : vector<8x32xbf16>, vector<32x32xbf16>, vector<8x32xf32> -> vector<8x32xf32>
    %320 = arith.addf %316, %319 : vector<8x32xf32>
    %c8_133 = arith.constant 8 : index
    %c0_134 = arith.constant 0 : index
    %c0_135 = arith.constant 0 : index
    %321 = vector.load %arg4[%c8_133, %c0_134, %c0_135] : memref<9x32x32xbf16, #tpu.memory_space<vmem>>, vector<1x32x32xbf16>
    %322 = vector.shape_cast %321 : vector<1x32x32xbf16> to vector<32x32xbf16>
    %cst_136 = arith.constant dense<0.000000e+00> : vector<8x32xf32>
    %323 = tpu.matmul %299, %322, %cst_136 {dimension_numbers = #tpu.dot_dimension_numbers<[1], [0], [0], [1], [0, 0, 1, 1], [], []>} : vector<8x32xbf16>, vector<32x32xbf16>, vector<8x32xf32> -> vector<8x32xf32>
    %324 = arith.addf %320, %323 : vector<8x32xf32>
    %325 = vector.broadcast %3 : vector<1x32xf32> to vector<8x32xf32>
    %326 = arith.addf %324, %325 : vector<8x32xf32>
    %cst_137 = arith.constant 2.000000e-01 : f32
    %327 = vector.broadcast %cst_137 : f32 to vector<8x32xf32>
    %328 = arith.mulf %327, %326 : vector<8x32xf32>
    %329 = arith.maximumf %326, %328 : vector<8x32xf32>
    %330 = arith.mulf %329, %329 : vector<8x32xf32>
    %cst_138 = arith.constant dense<0.000000e+00> : vector<8xf32>
    %331 = vector.multi_reduction <add>, %330, %cst_138 [1] : vector<8x32xf32> to vector<8xf32>
    %332 = vector.shape_cast %331 : vector<8xf32> to vector<8x1xf32>
    %cst_139 = arith.constant 3.200000e+01 : f32
    %333 = vector.broadcast %cst_139 : f32 to vector<8x1xf32>
    %334 = arith.divf %332, %333 : vector<8x1xf32>
    %cst_140 = arith.constant 9.99999993E-9 : f32
    %335 = vector.broadcast %cst_140 : f32 to vector<8x1xf32>
    %336 = arith.addf %334, %335 : vector<8x1xf32>
    %337 = math.rsqrt %336 : vector<8x1xf32>
    %338 = vector.broadcast %337 : vector<8x1xf32> to vector<8x32xf32>
    %339 = arith.mulf %329, %338 : vector<8x32xf32>
    %c3_141 = arith.constant 3 : index
    %c0_142 = arith.constant 0 : index
    %c0_143 = arith.constant 0 : index
    %340 = vector.load %arg4[%c3_141, %c0_142, %c0_143] : memref<9x32x32xbf16, #tpu.memory_space<vmem>>, vector<1x32x32xbf16>
    %341 = vector.shape_cast %340 : vector<1x32x32xbf16> to vector<32x32xbf16>
    %cst_144 = arith.constant dense<0.000000e+00> : vector<8x32xf32>
    %342 = tpu.matmul %294, %341, %cst_144 {dimension_numbers = #tpu.dot_dimension_numbers<[1], [0], [0], [1], [0, 0, 1, 1], [], []>} : vector<8x32xbf16>, vector<32x32xbf16>, vector<8x32xf32> -> vector<8x32xf32>
    %c4_145 = arith.constant 4 : index
    %c0_146 = arith.constant 0 : index
    %c0_147 = arith.constant 0 : index
    %343 = vector.load %arg4[%c4_145, %c0_146, %c0_147] : memref<9x32x32xbf16, #tpu.memory_space<vmem>>, vector<1x32x32xbf16>
    %344 = vector.shape_cast %343 : vector<1x32x32xbf16> to vector<32x32xbf16>
    %cst_148 = arith.constant dense<0.000000e+00> : vector<8x32xf32>
    %345 = tpu.matmul %295, %344, %cst_148 {dimension_numbers = #tpu.dot_dimension_numbers<[1], [0], [0], [1], [0, 0, 1, 1], [], []>} : vector<8x32xbf16>, vector<32x32xbf16>, vector<8x32xf32> -> vector<8x32xf32>
    %346 = arith.addf %342, %345 : vector<8x32xf32>
    %c5_149 = arith.constant 5 : index
    %c0_150 = arith.constant 0 : index
    %c0_151 = arith.constant 0 : index
    %347 = vector.load %arg4[%c5_149, %c0_150, %c0_151] : memref<9x32x32xbf16, #tpu.memory_space<vmem>>, vector<1x32x32xbf16>
    %348 = vector.shape_cast %347 : vector<1x32x32xbf16> to vector<32x32xbf16>
    %cst_152 = arith.constant dense<0.000000e+00> : vector<8x32xf32>
    %349 = tpu.matmul %296, %348, %cst_152 {dimension_numbers = #tpu.dot_dimension_numbers<[1], [0], [0], [1], [0, 0, 1, 1], [], []>} : vector<8x32xbf16>, vector<32x32xbf16>, vector<8x32xf32> -> vector<8x32xf32>
    %350 = arith.addf %346, %349 : vector<8x32xf32>
    %c6_153 = arith.constant 6 : index
    %c0_154 = arith.constant 0 : index
    %c0_155 = arith.constant 0 : index
    %351 = vector.load %arg4[%c6_153, %c0_154, %c0_155] : memref<9x32x32xbf16, #tpu.memory_space<vmem>>, vector<1x32x32xbf16>
    %352 = vector.shape_cast %351 : vector<1x32x32xbf16> to vector<32x32xbf16>
    %cst_156 = arith.constant dense<0.000000e+00> : vector<8x32xf32>
    %353 = tpu.matmul %298, %352, %cst_156 {dimension_numbers = #tpu.dot_dimension_numbers<[1], [0], [0], [1], [0, 0, 1, 1], [], []>} : vector<8x32xbf16>, vector<32x32xbf16>, vector<8x32xf32> -> vector<8x32xf32>
    %354 = arith.addf %350, %353 : vector<8x32xf32>
    %c7_157 = arith.constant 7 : index
    %c0_158 = arith.constant 0 : index
    %c0_159 = arith.constant 0 : index
    %355 = vector.load %arg4[%c7_157, %c0_158, %c0_159] : memref<9x32x32xbf16, #tpu.memory_space<vmem>>, vector<1x32x32xbf16>
    %356 = vector.shape_cast %355 : vector<1x32x32xbf16> to vector<32x32xbf16>
    %cst_160 = arith.constant dense<0.000000e+00> : vector<8x32xf32>
    %357 = tpu.matmul %299, %356, %cst_160 {dimension_numbers = #tpu.dot_dimension_numbers<[1], [0], [0], [1], [0, 0, 1, 1], [], []>} : vector<8x32xbf16>, vector<32x32xbf16>, vector<8x32xf32> -> vector<8x32xf32>
    %358 = arith.addf %354, %357 : vector<8x32xf32>
    %c8_161 = arith.constant 8 : index
    %c0_162 = arith.constant 0 : index
    %c0_163 = arith.constant 0 : index
    %359 = vector.load %arg4[%c8_161, %c0_162, %c0_163] : memref<9x32x32xbf16, #tpu.memory_space<vmem>>, vector<1x32x32xbf16>
    %360 = vector.shape_cast %359 : vector<1x32x32xbf16> to vector<32x32xbf16>
    %cst_164 = arith.constant dense<0.000000e+00> : vector<8x32xf32>
    %361 = tpu.matmul %300, %360, %cst_164 {dimension_numbers = #tpu.dot_dimension_numbers<[1], [0], [0], [1], [0, 0, 1, 1], [], []>} : vector<8x32xbf16>, vector<32x32xbf16>, vector<8x32xf32> -> vector<8x32xf32>
    %362 = arith.addf %358, %361 : vector<8x32xf32>
    %363 = vector.broadcast %3 : vector<1x32xf32> to vector<8x32xf32>
    %364 = arith.addf %362, %363 : vector<8x32xf32>
    %cst_165 = arith.constant 2.000000e-01 : f32
    %365 = vector.broadcast %cst_165 : f32 to vector<8x32xf32>
    %366 = arith.mulf %365, %364 : vector<8x32xf32>
    %367 = arith.maximumf %364, %366 : vector<8x32xf32>
    %368 = arith.mulf %367, %367 : vector<8x32xf32>
    %cst_166 = arith.constant dense<0.000000e+00> : vector<8xf32>
    %369 = vector.multi_reduction <add>, %368, %cst_166 [1] : vector<8x32xf32> to vector<8xf32>
    %370 = vector.shape_cast %369 : vector<8xf32> to vector<8x1xf32>
    %cst_167 = arith.constant 3.200000e+01 : f32
    %371 = vector.broadcast %cst_167 : f32 to vector<8x1xf32>
    %372 = arith.divf %370, %371 : vector<8x1xf32>
    %cst_168 = arith.constant 9.99999993E-9 : f32
    %373 = vector.broadcast %cst_168 : f32 to vector<8x1xf32>
    %374 = arith.addf %372, %373 : vector<8x1xf32>
    %375 = math.rsqrt %374 : vector<8x1xf32>
    %376 = vector.broadcast %375 : vector<8x1xf32> to vector<8x32xf32>
    %377 = arith.mulf %367, %376 : vector<8x32xf32>
    %c3_169 = arith.constant 3 : index
    %c0_170 = arith.constant 0 : index
    %c0_171 = arith.constant 0 : index
    %378 = vector.load %arg4[%c3_169, %c0_170, %c0_171] : memref<9x32x32xbf16, #tpu.memory_space<vmem>>, vector<1x32x32xbf16>
    %379 = vector.shape_cast %378 : vector<1x32x32xbf16> to vector<32x32xbf16>
    %cst_172 = arith.constant dense<0.000000e+00> : vector<8x32xf32>
    %380 = tpu.matmul %295, %379, %cst_172 {dimension_numbers = #tpu.dot_dimension_numbers<[1], [0], [0], [1], [0, 0, 1, 1], [], []>} : vector<8x32xbf16>, vector<32x32xbf16>, vector<8x32xf32> -> vector<8x32xf32>
    %c4_173 = arith.constant 4 : index
    %c0_174 = arith.constant 0 : index
    %c0_175 = arith.constant 0 : index
    %381 = vector.load %arg4[%c4_173, %c0_174, %c0_175] : memref<9x32x32xbf16, #tpu.memory_space<vmem>>, vector<1x32x32xbf16>
    %382 = vector.shape_cast %381 : vector<1x32x32xbf16> to vector<32x32xbf16>
    %cst_176 = arith.constant dense<0.000000e+00> : vector<8x32xf32>
    %383 = tpu.matmul %296, %382, %cst_176 {dimension_numbers = #tpu.dot_dimension_numbers<[1], [0], [0], [1], [0, 0, 1, 1], [], []>} : vector<8x32xbf16>, vector<32x32xbf16>, vector<8x32xf32> -> vector<8x32xf32>
    %384 = arith.addf %380, %383 : vector<8x32xf32>
    %c5_177 = arith.constant 5 : index
    %c0_178 = arith.constant 0 : index
    %c0_179 = arith.constant 0 : index
    %385 = vector.load %arg4[%c5_177, %c0_178, %c0_179] : memref<9x32x32xbf16, #tpu.memory_space<vmem>>, vector<1x32x32xbf16>
    %386 = vector.shape_cast %385 : vector<1x32x32xbf16> to vector<32x32xbf16>
    %cst_180 = arith.constant dense<0.000000e+00> : vector<8x32xf32>
    %387 = tpu.matmul %297, %386, %cst_180 {dimension_numbers = #tpu.dot_dimension_numbers<[1], [0], [0], [1], [0, 0, 1, 1], [], []>} : vector<8x32xbf16>, vector<32x32xbf16>, vector<8x32xf32> -> vector<8x32xf32>
    %388 = arith.addf %384, %387 : vector<8x32xf32>
    %c6_181 = arith.constant 6 : index
    %c0_182 = arith.constant 0 : index
    %c0_183 = arith.constant 0 : index
    %389 = vector.load %arg4[%c6_181, %c0_182, %c0_183] : memref<9x32x32xbf16, #tpu.memory_space<vmem>>, vector<1x32x32xbf16>
    %390 = vector.shape_cast %389 : vector<1x32x32xbf16> to vector<32x32xbf16>
    %cst_184 = arith.constant dense<0.000000e+00> : vector<8x32xf32>
    %391 = tpu.matmul %299, %390, %cst_184 {dimension_numbers = #tpu.dot_dimension_numbers<[1], [0], [0], [1], [0, 0, 1, 1], [], []>} : vector<8x32xbf16>, vector<32x32xbf16>, vector<8x32xf32> -> vector<8x32xf32>
    %392 = arith.addf %388, %391 : vector<8x32xf32>
    %c7_185 = arith.constant 7 : index
    %c0_186 = arith.constant 0 : index
    %c0_187 = arith.constant 0 : index
    %393 = vector.load %arg4[%c7_185, %c0_186, %c0_187] : memref<9x32x32xbf16, #tpu.memory_space<vmem>>, vector<1x32x32xbf16>
    %394 = vector.shape_cast %393 : vector<1x32x32xbf16> to vector<32x32xbf16>
    %cst_188 = arith.constant dense<0.000000e+00> : vector<8x32xf32>
    %395 = tpu.matmul %300, %394, %cst_188 {dimension_numbers = #tpu.dot_dimension_numbers<[1], [0], [0], [1], [0, 0, 1, 1], [], []>} : vector<8x32xbf16>, vector<32x32xbf16>, vector<8x32xf32> -> vector<8x32xf32>
    %396 = arith.addf %392, %395 : vector<8x32xf32>
    %c8_189 = arith.constant 8 : index
    %c0_190 = arith.constant 0 : index
    %c0_191 = arith.constant 0 : index
    %397 = vector.load %arg4[%c8_189, %c0_190, %c0_191] : memref<9x32x32xbf16, #tpu.memory_space<vmem>>, vector<1x32x32xbf16>
    %398 = vector.shape_cast %397 : vector<1x32x32xbf16> to vector<32x32xbf16>
    %cst_192 = arith.constant dense<0.000000e+00> : vector<8x32xf32>
    %399 = tpu.matmul %301, %398, %cst_192 {dimension_numbers = #tpu.dot_dimension_numbers<[1], [0], [0], [1], [0, 0, 1, 1], [], []>} : vector<8x32xbf16>, vector<32x32xbf16>, vector<8x32xf32> -> vector<8x32xf32>
    %400 = arith.addf %396, %399 : vector<8x32xf32>
    %401 = vector.broadcast %3 : vector<1x32xf32> to vector<8x32xf32>
    %402 = arith.addf %400, %401 : vector<8x32xf32>
    %cst_193 = arith.constant 2.000000e-01 : f32
    %403 = vector.broadcast %cst_193 : f32 to vector<8x32xf32>
    %404 = arith.mulf %403, %402 : vector<8x32xf32>
    %405 = arith.maximumf %402, %404 : vector<8x32xf32>
    %406 = arith.mulf %405, %405 : vector<8x32xf32>
    %cst_194 = arith.constant dense<0.000000e+00> : vector<8xf32>
    %407 = vector.multi_reduction <add>, %406, %cst_194 [1] : vector<8x32xf32> to vector<8xf32>
    %408 = vector.shape_cast %407 : vector<8xf32> to vector<8x1xf32>
    %cst_195 = arith.constant 3.200000e+01 : f32
    %409 = vector.broadcast %cst_195 : f32 to vector<8x1xf32>
    %410 = arith.divf %408, %409 : vector<8x1xf32>
    %cst_196 = arith.constant 9.99999993E-9 : f32
    %411 = vector.broadcast %cst_196 : f32 to vector<8x1xf32>
    %412 = arith.addf %410, %411 : vector<8x1xf32>
    %413 = math.rsqrt %412 : vector<8x1xf32>
    %414 = vector.broadcast %413 : vector<8x1xf32> to vector<8x32xf32>
    %415 = arith.mulf %405, %414 : vector<8x32xf32>
    %c3_197 = arith.constant 3 : index
    %c0_198 = arith.constant 0 : index
    %c0_199 = arith.constant 0 : index
    %416 = vector.load %arg4[%c3_197, %c0_198, %c0_199] : memref<9x32x32xbf16, #tpu.memory_space<vmem>>, vector<1x32x32xbf16>
    %417 = vector.shape_cast %416 : vector<1x32x32xbf16> to vector<32x32xbf16>
    %cst_200 = arith.constant dense<0.000000e+00> : vector<8x32xf32>
    %418 = tpu.matmul %296, %417, %cst_200 {dimension_numbers = #tpu.dot_dimension_numbers<[1], [0], [0], [1], [0, 0, 1, 1], [], []>} : vector<8x32xbf16>, vector<32x32xbf16>, vector<8x32xf32> -> vector<8x32xf32>
    %c4_201 = arith.constant 4 : index
    %c0_202 = arith.constant 0 : index
    %c0_203 = arith.constant 0 : index
    %419 = vector.load %arg4[%c4_201, %c0_202, %c0_203] : memref<9x32x32xbf16, #tpu.memory_space<vmem>>, vector<1x32x32xbf16>
    %420 = vector.shape_cast %419 : vector<1x32x32xbf16> to vector<32x32xbf16>
    %cst_204 = arith.constant dense<0.000000e+00> : vector<8x32xf32>
    %421 = tpu.matmul %297, %420, %cst_204 {dimension_numbers = #tpu.dot_dimension_numbers<[1], [0], [0], [1], [0, 0, 1, 1], [], []>} : vector<8x32xbf16>, vector<32x32xbf16>, vector<8x32xf32> -> vector<8x32xf32>
    %422 = arith.addf %418, %421 : vector<8x32xf32>
    %c6_205 = arith.constant 6 : index
    %c0_206 = arith.constant 0 : index
    %c0_207 = arith.constant 0 : index
    %423 = vector.load %arg4[%c6_205, %c0_206, %c0_207] : memref<9x32x32xbf16, #tpu.memory_space<vmem>>, vector<1x32x32xbf16>
    %424 = vector.shape_cast %423 : vector<1x32x32xbf16> to vector<32x32xbf16>
    %cst_208 = arith.constant dense<0.000000e+00> : vector<8x32xf32>
    %425 = tpu.matmul %300, %424, %cst_208 {dimension_numbers = #tpu.dot_dimension_numbers<[1], [0], [0], [1], [0, 0, 1, 1], [], []>} : vector<8x32xbf16>, vector<32x32xbf16>, vector<8x32xf32> -> vector<8x32xf32>
    %426 = arith.addf %422, %425 : vector<8x32xf32>
    %c7_209 = arith.constant 7 : index
    %c0_210 = arith.constant 0 : index
    %c0_211 = arith.constant 0 : index
    %427 = vector.load %arg4[%c7_209, %c0_210, %c0_211] : memref<9x32x32xbf16, #tpu.memory_space<vmem>>, vector<1x32x32xbf16>
    %428 = vector.shape_cast %427 : vector<1x32x32xbf16> to vector<32x32xbf16>
    %cst_212 = arith.constant dense<0.000000e+00> : vector<8x32xf32>
    %429 = tpu.matmul %301, %428, %cst_212 {dimension_numbers = #tpu.dot_dimension_numbers<[1], [0], [0], [1], [0, 0, 1, 1], [], []>} : vector<8x32xbf16>, vector<32x32xbf16>, vector<8x32xf32> -> vector<8x32xf32>
    %430 = arith.addf %426, %429 : vector<8x32xf32>
    %431 = vector.broadcast %3 : vector<1x32xf32> to vector<8x32xf32>
    %432 = arith.addf %430, %431 : vector<8x32xf32>
    %cst_213 = arith.constant 2.000000e-01 : f32
    %433 = vector.broadcast %cst_213 : f32 to vector<8x32xf32>
    %434 = arith.mulf %433, %432 : vector<8x32xf32>
    %435 = arith.maximumf %432, %434 : vector<8x32xf32>
    %436 = arith.mulf %435, %435 : vector<8x32xf32>
    %cst_214 = arith.constant dense<0.000000e+00> : vector<8xf32>
    %437 = vector.multi_reduction <add>, %436, %cst_214 [1] : vector<8x32xf32> to vector<8xf32>
    %438 = vector.shape_cast %437 : vector<8xf32> to vector<8x1xf32>
    %cst_215 = arith.constant 3.200000e+01 : f32
    %439 = vector.broadcast %cst_215 : f32 to vector<8x1xf32>
    %440 = arith.divf %438, %439 : vector<8x1xf32>
    %cst_216 = arith.constant 9.99999993E-9 : f32
    %441 = vector.broadcast %cst_216 : f32 to vector<8x1xf32>
    %442 = arith.addf %440, %441 : vector<8x1xf32>
    %443 = math.rsqrt %442 : vector<8x1xf32>
    %444 = vector.broadcast %443 : vector<8x1xf32> to vector<8x32xf32>
    %445 = arith.mulf %435, %444 : vector<8x32xf32>
    %c1_217 = arith.constant 1 : index
    %c0_218 = arith.constant 0 : index
    %c0_219 = arith.constant 0 : index
    %446 = vector.load %arg4[%c1_217, %c0_218, %c0_219] : memref<9x32x32xbf16, #tpu.memory_space<vmem>>, vector<1x32x32xbf16>
    %447 = vector.shape_cast %446 : vector<1x32x32xbf16> to vector<32x32xbf16>
    %cst_220 = arith.constant dense<0.000000e+00> : vector<8x32xf32>
    %448 = tpu.matmul %294, %447, %cst_220 {dimension_numbers = #tpu.dot_dimension_numbers<[1], [0], [0], [1], [0, 0, 1, 1], [], []>} : vector<8x32xbf16>, vector<32x32xbf16>, vector<8x32xf32> -> vector<8x32xf32>
    %c2_221 = arith.constant 2 : index
    %c0_222 = arith.constant 0 : index
    %c0_223 = arith.constant 0 : index
    %449 = vector.load %arg4[%c2_221, %c0_222, %c0_223] : memref<9x32x32xbf16, #tpu.memory_space<vmem>>, vector<1x32x32xbf16>
    %450 = vector.shape_cast %449 : vector<1x32x32xbf16> to vector<32x32xbf16>
    %cst_224 = arith.constant dense<0.000000e+00> : vector<8x32xf32>
    %451 = tpu.matmul %295, %450, %cst_224 {dimension_numbers = #tpu.dot_dimension_numbers<[1], [0], [0], [1], [0, 0, 1, 1], [], []>} : vector<8x32xbf16>, vector<32x32xbf16>, vector<8x32xf32> -> vector<8x32xf32>
    %452 = arith.addf %448, %451 : vector<8x32xf32>
    %c4_225 = arith.constant 4 : index
    %c0_226 = arith.constant 0 : index
    %c0_227 = arith.constant 0 : index
    %453 = vector.load %arg4[%c4_225, %c0_226, %c0_227] : memref<9x32x32xbf16, #tpu.memory_space<vmem>>, vector<1x32x32xbf16>
    %454 = vector.shape_cast %453 : vector<1x32x32xbf16> to vector<32x32xbf16>
    %cst_228 = arith.constant dense<0.000000e+00> : vector<8x32xf32>
    %455 = tpu.matmul %298, %454, %cst_228 {dimension_numbers = #tpu.dot_dimension_numbers<[1], [0], [0], [1], [0, 0, 1, 1], [], []>} : vector<8x32xbf16>, vector<32x32xbf16>, vector<8x32xf32> -> vector<8x32xf32>
    %456 = arith.addf %452, %455 : vector<8x32xf32>
    %c5_229 = arith.constant 5 : index
    %c0_230 = arith.constant 0 : index
    %c0_231 = arith.constant 0 : index
    %457 = vector.load %arg4[%c5_229, %c0_230, %c0_231] : memref<9x32x32xbf16, #tpu.memory_space<vmem>>, vector<1x32x32xbf16>
    %458 = vector.shape_cast %457 : vector<1x32x32xbf16> to vector<32x32xbf16>
    %cst_232 = arith.constant dense<0.000000e+00> : vector<8x32xf32>
    %459 = tpu.matmul %299, %458, %cst_232 {dimension_numbers = #tpu.dot_dimension_numbers<[1], [0], [0], [1], [0, 0, 1, 1], [], []>} : vector<8x32xbf16>, vector<32x32xbf16>, vector<8x32xf32> -> vector<8x32xf32>
    %460 = arith.addf %456, %459 : vector<8x32xf32>
    %c7_233 = arith.constant 7 : index
    %c0_234 = arith.constant 0 : index
    %c0_235 = arith.constant 0 : index
    %461 = vector.load %arg4[%c7_233, %c0_234, %c0_235] : memref<9x32x32xbf16, #tpu.memory_space<vmem>>, vector<1x32x32xbf16>
    %462 = vector.shape_cast %461 : vector<1x32x32xbf16> to vector<32x32xbf16>
    %cst_236 = arith.constant dense<0.000000e+00> : vector<8x32xf32>
    %463 = tpu.matmul %302, %462, %cst_236 {dimension_numbers = #tpu.dot_dimension_numbers<[1], [0], [0], [1], [0, 0, 1, 1], [], []>} : vector<8x32xbf16>, vector<32x32xbf16>, vector<8x32xf32> -> vector<8x32xf32>
    %464 = arith.addf %460, %463 : vector<8x32xf32>
    %c8_237 = arith.constant 8 : index
    %c0_238 = arith.constant 0 : index
    %c0_239 = arith.constant 0 : index
    %465 = vector.load %arg4[%c8_237, %c0_238, %c0_239] : memref<9x32x32xbf16, #tpu.memory_space<vmem>>, vector<1x32x32xbf16>
    %466 = vector.shape_cast %465 : vector<1x32x32xbf16> to vector<32x32xbf16>
    %cst_240 = arith.constant dense<0.000000e+00> : vector<8x32xf32>
    %467 = tpu.matmul %303, %466, %cst_240 {dimension_numbers = #tpu.dot_dimension_numbers<[1], [0], [0], [1], [0, 0, 1, 1], [], []>} : vector<8x32xbf16>, vector<32x32xbf16>, vector<8x32xf32> -> vector<8x32xf32>
    %468 = arith.addf %464, %467 : vector<8x32xf32>
    %469 = vector.broadcast %3 : vector<1x32xf32> to vector<8x32xf32>
    %470 = arith.addf %468, %469 : vector<8x32xf32>
    %cst_241 = arith.constant 2.000000e-01 : f32
    %471 = vector.broadcast %cst_241 : f32 to vector<8x32xf32>
    %472 = arith.mulf %471, %470 : vector<8x32xf32>
    %473 = arith.maximumf %470, %472 : vector<8x32xf32>
    %474 = arith.mulf %473, %473 : vector<8x32xf32>
    %cst_242 = arith.constant dense<0.000000e+00> : vector<8xf32>
    %475 = vector.multi_reduction <add>, %474, %cst_242 [1] : vector<8x32xf32> to vector<8xf32>
    %476 = vector.shape_cast %475 : vector<8xf32> to vector<8x1xf32>
    %cst_243 = arith.constant 3.200000e+01 : f32
    %477 = vector.broadcast %cst_243 : f32 to vector<8x1xf32>
    %478 = arith.divf %476, %477 : vector<8x1xf32>
    %cst_244 = arith.constant 9.99999993E-9 : f32
    %479 = vector.broadcast %cst_244 : f32 to vector<8x1xf32>
    %480 = arith.addf %478, %479 : vector<8x1xf32>
    %481 = math.rsqrt %480 : vector<8x1xf32>
    %482 = vector.broadcast %481 : vector<8x1xf32> to vector<8x32xf32>
    %483 = arith.mulf %473, %482 : vector<8x32xf32>
    %c0_245 = arith.constant 0 : index
    %c0_246 = arith.constant 0 : index
    %c0_247 = arith.constant 0 : index
    %484 = vector.load %arg4[%c0_245, %c0_246, %c0_247] : memref<9x32x32xbf16, #tpu.memory_space<vmem>>, vector<1x32x32xbf16>
    %485 = vector.shape_cast %484 : vector<1x32x32xbf16> to vector<32x32xbf16>
    %cst_248 = arith.constant dense<0.000000e+00> : vector<8x32xf32>
    %486 = tpu.matmul %294, %485, %cst_248 {dimension_numbers = #tpu.dot_dimension_numbers<[1], [0], [0], [1], [0, 0, 1, 1], [], []>} : vector<8x32xbf16>, vector<32x32xbf16>, vector<8x32xf32> -> vector<8x32xf32>
    %c1_249 = arith.constant 1 : index
    %c0_250 = arith.constant 0 : index
    %c0_251 = arith.constant 0 : index
    %487 = vector.load %arg4[%c1_249, %c0_250, %c0_251] : memref<9x32x32xbf16, #tpu.memory_space<vmem>>, vector<1x32x32xbf16>
    %488 = vector.shape_cast %487 : vector<1x32x32xbf16> to vector<32x32xbf16>
    %cst_252 = arith.constant dense<0.000000e+00> : vector<8x32xf32>
    %489 = tpu.matmul %295, %488, %cst_252 {dimension_numbers = #tpu.dot_dimension_numbers<[1], [0], [0], [1], [0, 0, 1, 1], [], []>} : vector<8x32xbf16>, vector<32x32xbf16>, vector<8x32xf32> -> vector<8x32xf32>
    %490 = arith.addf %486, %489 : vector<8x32xf32>
    %c2_253 = arith.constant 2 : index
    %c0_254 = arith.constant 0 : index
    %c0_255 = arith.constant 0 : index
    %491 = vector.load %arg4[%c2_253, %c0_254, %c0_255] : memref<9x32x32xbf16, #tpu.memory_space<vmem>>, vector<1x32x32xbf16>
    %492 = vector.shape_cast %491 : vector<1x32x32xbf16> to vector<32x32xbf16>
    %cst_256 = arith.constant dense<0.000000e+00> : vector<8x32xf32>
    %493 = tpu.matmul %296, %492, %cst_256 {dimension_numbers = #tpu.dot_dimension_numbers<[1], [0], [0], [1], [0, 0, 1, 1], [], []>} : vector<8x32xbf16>, vector<32x32xbf16>, vector<8x32xf32> -> vector<8x32xf32>
    %494 = arith.addf %490, %493 : vector<8x32xf32>
    %c3_257 = arith.constant 3 : index
    %c0_258 = arith.constant 0 : index
    %c0_259 = arith.constant 0 : index
    %495 = vector.load %arg4[%c3_257, %c0_258, %c0_259] : memref<9x32x32xbf16, #tpu.memory_space<vmem>>, vector<1x32x32xbf16>
    %496 = vector.shape_cast %495 : vector<1x32x32xbf16> to vector<32x32xbf16>
    %cst_260 = arith.constant dense<0.000000e+00> : vector<8x32xf32>
    %497 = tpu.matmul %298, %496, %cst_260 {dimension_numbers = #tpu.dot_dimension_numbers<[1], [0], [0], [1], [0, 0, 1, 1], [], []>} : vector<8x32xbf16>, vector<32x32xbf16>, vector<8x32xf32> -> vector<8x32xf32>
    %498 = arith.addf %494, %497 : vector<8x32xf32>
    %c4_261 = arith.constant 4 : index
    %c0_262 = arith.constant 0 : index
    %c0_263 = arith.constant 0 : index
    %499 = vector.load %arg4[%c4_261, %c0_262, %c0_263] : memref<9x32x32xbf16, #tpu.memory_space<vmem>>, vector<1x32x32xbf16>
    %500 = vector.shape_cast %499 : vector<1x32x32xbf16> to vector<32x32xbf16>
    %cst_264 = arith.constant dense<0.000000e+00> : vector<8x32xf32>
    %501 = tpu.matmul %299, %500, %cst_264 {dimension_numbers = #tpu.dot_dimension_numbers<[1], [0], [0], [1], [0, 0, 1, 1], [], []>} : vector<8x32xbf16>, vector<32x32xbf16>, vector<8x32xf32> -> vector<8x32xf32>
    %502 = arith.addf %498, %501 : vector<8x32xf32>
    %c5_265 = arith.constant 5 : index
    %c0_266 = arith.constant 0 : index
    %c0_267 = arith.constant 0 : index
    %503 = vector.load %arg4[%c5_265, %c0_266, %c0_267] : memref<9x32x32xbf16, #tpu.memory_space<vmem>>, vector<1x32x32xbf16>
    %504 = vector.shape_cast %503 : vector<1x32x32xbf16> to vector<32x32xbf16>
    %cst_268 = arith.constant dense<0.000000e+00> : vector<8x32xf32>
    %505 = tpu.matmul %300, %504, %cst_268 {dimension_numbers = #tpu.dot_dimension_numbers<[1], [0], [0], [1], [0, 0, 1, 1], [], []>} : vector<8x32xbf16>, vector<32x32xbf16>, vector<8x32xf32> -> vector<8x32xf32>
    %506 = arith.addf %502, %505 : vector<8x32xf32>
    %c6_269 = arith.constant 6 : index
    %c0_270 = arith.constant 0 : index
    %c0_271 = arith.constant 0 : index
    %507 = vector.load %arg4[%c6_269, %c0_270, %c0_271] : memref<9x32x32xbf16, #tpu.memory_space<vmem>>, vector<1x32x32xbf16>
    %508 = vector.shape_cast %507 : vector<1x32x32xbf16> to vector<32x32xbf16>
    %cst_272 = arith.constant dense<0.000000e+00> : vector<8x32xf32>
    %509 = tpu.matmul %302, %508, %cst_272 {dimension_numbers = #tpu.dot_dimension_numbers<[1], [0], [0], [1], [0, 0, 1, 1], [], []>} : vector<8x32xbf16>, vector<32x32xbf16>, vector<8x32xf32> -> vector<8x32xf32>
    %510 = arith.addf %506, %509 : vector<8x32xf32>
    %c7_273 = arith.constant 7 : index
    %c0_274 = arith.constant 0 : index
    %c0_275 = arith.constant 0 : index
    %511 = vector.load %arg4[%c7_273, %c0_274, %c0_275] : memref<9x32x32xbf16, #tpu.memory_space<vmem>>, vector<1x32x32xbf16>
    %512 = vector.shape_cast %511 : vector<1x32x32xbf16> to vector<32x32xbf16>
    %cst_276 = arith.constant dense<0.000000e+00> : vector<8x32xf32>
    %513 = tpu.matmul %303, %512, %cst_276 {dimension_numbers = #tpu.dot_dimension_numbers<[1], [0], [0], [1], [0, 0, 1, 1], [], []>} : vector<8x32xbf16>, vector<32x32xbf16>, vector<8x32xf32> -> vector<8x32xf32>
    %514 = arith.addf %510, %513 : vector<8x32xf32>
    %c8_277 = arith.constant 8 : index
    %c0_278 = arith.constant 0 : index
    %c0_279 = arith.constant 0 : index
    %515 = vector.load %arg4[%c8_277, %c0_278, %c0_279] : memref<9x32x32xbf16, #tpu.memory_space<vmem>>, vector<1x32x32xbf16>
    %516 = vector.shape_cast %515 : vector<1x32x32xbf16> to vector<32x32xbf16>
    %cst_280 = arith.constant dense<0.000000e+00> : vector<8x32xf32>
    %517 = tpu.matmul %304, %516, %cst_280 {dimension_numbers = #tpu.dot_dimension_numbers<[1], [0], [0], [1], [0, 0, 1, 1], [], []>} : vector<8x32xbf16>, vector<32x32xbf16>, vector<8x32xf32> -> vector<8x32xf32>
    %518 = arith.addf %514, %517 : vector<8x32xf32>
    %519 = vector.broadcast %3 : vector<1x32xf32> to vector<8x32xf32>
    %520 = arith.addf %518, %519 : vector<8x32xf32>
    %cst_281 = arith.constant 2.000000e-01 : f32
    %521 = vector.broadcast %cst_281 : f32 to vector<8x32xf32>
    %522 = arith.mulf %521, %520 : vector<8x32xf32>
    %523 = arith.maximumf %520, %522 : vector<8x32xf32>
    %524 = arith.mulf %523, %523 : vector<8x32xf32>
    %cst_282 = arith.constant dense<0.000000e+00> : vector<8xf32>
    %525 = vector.multi_reduction <add>, %524, %cst_282 [1] : vector<8x32xf32> to vector<8xf32>
    %526 = vector.shape_cast %525 : vector<8xf32> to vector<8x1xf32>
    %cst_283 = arith.constant 3.200000e+01 : f32
    %527 = vector.broadcast %cst_283 : f32 to vector<8x1xf32>
    %528 = arith.divf %526, %527 : vector<8x1xf32>
    %cst_284 = arith.constant 9.99999993E-9 : f32
    %529 = vector.broadcast %cst_284 : f32 to vector<8x1xf32>
    %530 = arith.addf %528, %529 : vector<8x1xf32>
    %531 = math.rsqrt %530 : vector<8x1xf32>
    %532 = vector.broadcast %531 : vector<8x1xf32> to vector<8x32xf32>
    %533 = arith.mulf %523, %532 : vector<8x32xf32>
    %c0_285 = arith.constant 0 : index
    %c0_286 = arith.constant 0 : index
    %c0_287 = arith.constant 0 : index
    %534 = vector.load %arg4[%c0_285, %c0_286, %c0_287] : memref<9x32x32xbf16, #tpu.memory_space<vmem>>, vector<1x32x32xbf16>
    %535 = vector.shape_cast %534 : vector<1x32x32xbf16> to vector<32x32xbf16>
    %cst_288 = arith.constant dense<0.000000e+00> : vector<8x32xf32>
    %536 = tpu.matmul %295, %535, %cst_288 {dimension_numbers = #tpu.dot_dimension_numbers<[1], [0], [0], [1], [0, 0, 1, 1], [], []>} : vector<8x32xbf16>, vector<32x32xbf16>, vector<8x32xf32> -> vector<8x32xf32>
    %c1_289 = arith.constant 1 : index
    %c0_290 = arith.constant 0 : index
    %c0_291 = arith.constant 0 : index
    %537 = vector.load %arg4[%c1_289, %c0_290, %c0_291] : memref<9x32x32xbf16, #tpu.memory_space<vmem>>, vector<1x32x32xbf16>
    %538 = vector.shape_cast %537 : vector<1x32x32xbf16> to vector<32x32xbf16>
    %cst_292 = arith.constant dense<0.000000e+00> : vector<8x32xf32>
    %539 = tpu.matmul %296, %538, %cst_292 {dimension_numbers = #tpu.dot_dimension_numbers<[1], [0], [0], [1], [0, 0, 1, 1], [], []>} : vector<8x32xbf16>, vector<32x32xbf16>, vector<8x32xf32> -> vector<8x32xf32>
    %540 = arith.addf %536, %539 : vector<8x32xf32>
    %c2_293 = arith.constant 2 : index
    %c0_294 = arith.constant 0 : index
    %c0_295 = arith.constant 0 : index
    %541 = vector.load %arg4[%c2_293, %c0_294, %c0_295] : memref<9x32x32xbf16, #tpu.memory_space<vmem>>, vector<1x32x32xbf16>
    %542 = vector.shape_cast %541 : vector<1x32x32xbf16> to vector<32x32xbf16>
    %cst_296 = arith.constant dense<0.000000e+00> : vector<8x32xf32>
    %543 = tpu.matmul %297, %542, %cst_296 {dimension_numbers = #tpu.dot_dimension_numbers<[1], [0], [0], [1], [0, 0, 1, 1], [], []>} : vector<8x32xbf16>, vector<32x32xbf16>, vector<8x32xf32> -> vector<8x32xf32>
    %544 = arith.addf %540, %543 : vector<8x32xf32>
    %c3_297 = arith.constant 3 : index
    %c0_298 = arith.constant 0 : index
    %c0_299 = arith.constant 0 : index
    %545 = vector.load %arg4[%c3_297, %c0_298, %c0_299] : memref<9x32x32xbf16, #tpu.memory_space<vmem>>, vector<1x32x32xbf16>
    %546 = vector.shape_cast %545 : vector<1x32x32xbf16> to vector<32x32xbf16>
    %cst_300 = arith.constant dense<0.000000e+00> : vector<8x32xf32>
    %547 = tpu.matmul %299, %546, %cst_300 {dimension_numbers = #tpu.dot_dimension_numbers<[1], [0], [0], [1], [0, 0, 1, 1], [], []>} : vector<8x32xbf16>, vector<32x32xbf16>, vector<8x32xf32> -> vector<8x32xf32>
    %548 = arith.addf %544, %547 : vector<8x32xf32>
    %c4_301 = arith.constant 4 : index
    %c0_302 = arith.constant 0 : index
    %c0_303 = arith.constant 0 : index
    %549 = vector.load %arg4[%c4_301, %c0_302, %c0_303] : memref<9x32x32xbf16, #tpu.memory_space<vmem>>, vector<1x32x32xbf16>
    %550 = vector.shape_cast %549 : vector<1x32x32xbf16> to vector<32x32xbf16>
    %cst_304 = arith.constant dense<0.000000e+00> : vector<8x32xf32>
    %551 = tpu.matmul %300, %550, %cst_304 {dimension_numbers = #tpu.dot_dimension_numbers<[1], [0], [0], [1], [0, 0, 1, 1], [], []>} : vector<8x32xbf16>, vector<32x32xbf16>, vector<8x32xf32> -> vector<8x32xf32>
    %552 = arith.addf %548, %551 : vector<8x32xf32>
    %c5_305 = arith.constant 5 : index
    %c0_306 = arith.constant 0 : index
    %c0_307 = arith.constant 0 : index
    %553 = vector.load %arg4[%c5_305, %c0_306, %c0_307] : memref<9x32x32xbf16, #tpu.memory_space<vmem>>, vector<1x32x32xbf16>
    %554 = vector.shape_cast %553 : vector<1x32x32xbf16> to vector<32x32xbf16>
    %cst_308 = arith.constant dense<0.000000e+00> : vector<8x32xf32>
    %555 = tpu.matmul %301, %554, %cst_308 {dimension_numbers = #tpu.dot_dimension_numbers<[1], [0], [0], [1], [0, 0, 1, 1], [], []>} : vector<8x32xbf16>, vector<32x32xbf16>, vector<8x32xf32> -> vector<8x32xf32>
    %556 = arith.addf %552, %555 : vector<8x32xf32>
    %c6_309 = arith.constant 6 : index
    %c0_310 = arith.constant 0 : index
    %c0_311 = arith.constant 0 : index
    %557 = vector.load %arg4[%c6_309, %c0_310, %c0_311] : memref<9x32x32xbf16, #tpu.memory_space<vmem>>, vector<1x32x32xbf16>
    %558 = vector.shape_cast %557 : vector<1x32x32xbf16> to vector<32x32xbf16>
    %cst_312 = arith.constant dense<0.000000e+00> : vector<8x32xf32>
    %559 = tpu.matmul %303, %558, %cst_312 {dimension_numbers = #tpu.dot_dimension_numbers<[1], [0], [0], [1], [0, 0, 1, 1], [], []>} : vector<8x32xbf16>, vector<32x32xbf16>, vector<8x32xf32> -> vector<8x32xf32>
    %560 = arith.addf %556, %559 : vector<8x32xf32>
    %c7_313 = arith.constant 7 : index
    %c0_314 = arith.constant 0 : index
    %c0_315 = arith.constant 0 : index
    %561 = vector.load %arg4[%c7_313, %c0_314, %c0_315] : memref<9x32x32xbf16, #tpu.memory_space<vmem>>, vector<1x32x32xbf16>
    %562 = vector.shape_cast %561 : vector<1x32x32xbf16> to vector<32x32xbf16>
    %cst_316 = arith.constant dense<0.000000e+00> : vector<8x32xf32>
    %563 = tpu.matmul %304, %562, %cst_316 {dimension_numbers = #tpu.dot_dimension_numbers<[1], [0], [0], [1], [0, 0, 1, 1], [], []>} : vector<8x32xbf16>, vector<32x32xbf16>, vector<8x32xf32> -> vector<8x32xf32>
    %564 = arith.addf %560, %563 : vector<8x32xf32>
    %c8_317 = arith.constant 8 : index
    %c0_318 = arith.constant 0 : index
    %c0_319 = arith.constant 0 : index
    %565 = vector.load %arg4[%c8_317, %c0_318, %c0_319] : memref<9x32x32xbf16, #tpu.memory_space<vmem>>, vector<1x32x32xbf16>
    %566 = vector.shape_cast %565 : vector<1x32x32xbf16> to vector<32x32xbf16>
    %cst_320 = arith.constant dense<0.000000e+00> : vector<8x32xf32>
    %567 = tpu.matmul %305, %566, %cst_320 {dimension_numbers = #tpu.dot_dimension_numbers<[1], [0], [0], [1], [0, 0, 1, 1], [], []>} : vector<8x32xbf16>, vector<32x32xbf16>, vector<8x32xf32> -> vector<8x32xf32>
    %568 = arith.addf %564, %567 : vector<8x32xf32>
    %569 = vector.broadcast %3 : vector<1x32xf32> to vector<8x32xf32>
    %570 = arith.addf %568, %569 : vector<8x32xf32>
    %cst_321 = arith.constant 2.000000e-01 : f32
    %571 = vector.broadcast %cst_321 : f32 to vector<8x32xf32>
    %572 = arith.mulf %571, %570 : vector<8x32xf32>
    %573 = arith.maximumf %570, %572 : vector<8x32xf32>
    %574 = arith.mulf %573, %573 : vector<8x32xf32>
    %cst_322 = arith.constant dense<0.000000e+00> : vector<8xf32>
    %575 = vector.multi_reduction <add>, %574, %cst_322 [1] : vector<8x32xf32> to vector<8xf32>
    %576 = vector.shape_cast %575 : vector<8xf32> to vector<8x1xf32>
    %cst_323 = arith.constant 3.200000e+01 : f32
    %577 = vector.broadcast %cst_323 : f32 to vector<8x1xf32>
    %578 = arith.divf %576, %577 : vector<8x1xf32>
    %cst_324 = arith.constant 9.99999993E-9 : f32
    %579 = vector.broadcast %cst_324 : f32 to vector<8x1xf32>
    %580 = arith.addf %578, %579 : vector<8x1xf32>
    %581 = math.rsqrt %580 : vector<8x1xf32>
    %582 = vector.broadcast %581 : vector<8x1xf32> to vector<8x32xf32>
    %583 = arith.mulf %573, %582 : vector<8x32xf32>
    %c0_325 = arith.constant 0 : index
    %c0_326 = arith.constant 0 : index
    %c0_327 = arith.constant 0 : index
    %584 = vector.load %arg4[%c0_325, %c0_326, %c0_327] : memref<9x32x32xbf16, #tpu.memory_space<vmem>>, vector<1x32x32xbf16>
    %585 = vector.shape_cast %584 : vector<1x32x32xbf16> to vector<32x32xbf16>
    %cst_328 = arith.constant dense<0.000000e+00> : vector<8x32xf32>
    %586 = tpu.matmul %296, %585, %cst_328 {dimension_numbers = #tpu.dot_dimension_numbers<[1], [0], [0], [1], [0, 0, 1, 1], [], []>} : vector<8x32xbf16>, vector<32x32xbf16>, vector<8x32xf32> -> vector<8x32xf32>
    %c1_329 = arith.constant 1 : index
    %c0_330 = arith.constant 0 : index
    %c0_331 = arith.constant 0 : index
    %587 = vector.load %arg4[%c1_329, %c0_330, %c0_331] : memref<9x32x32xbf16, #tpu.memory_space<vmem>>, vector<1x32x32xbf16>
    %588 = vector.shape_cast %587 : vector<1x32x32xbf16> to vector<32x32xbf16>
    %cst_332 = arith.constant dense<0.000000e+00> : vector<8x32xf32>
    %589 = tpu.matmul %297, %588, %cst_332 {dimension_numbers = #tpu.dot_dimension_numbers<[1], [0], [0], [1], [0, 0, 1, 1], [], []>} : vector<8x32xbf16>, vector<32x32xbf16>, vector<8x32xf32> -> vector<8x32xf32>
    %590 = arith.addf %586, %589 : vector<8x32xf32>
    %c3_333 = arith.constant 3 : index
    %c0_334 = arith.constant 0 : index
    %c0_335 = arith.constant 0 : index
    %591 = vector.load %arg4[%c3_333, %c0_334, %c0_335] : memref<9x32x32xbf16, #tpu.memory_space<vmem>>, vector<1x32x32xbf16>
    %592 = vector.shape_cast %591 : vector<1x32x32xbf16> to vector<32x32xbf16>
    %cst_336 = arith.constant dense<0.000000e+00> : vector<8x32xf32>
    %593 = tpu.matmul %300, %592, %cst_336 {dimension_numbers = #tpu.dot_dimension_numbers<[1], [0], [0], [1], [0, 0, 1, 1], [], []>} : vector<8x32xbf16>, vector<32x32xbf16>, vector<8x32xf32> -> vector<8x32xf32>
    %594 = arith.addf %590, %593 : vector<8x32xf32>
    %c4_337 = arith.constant 4 : index
    %c0_338 = arith.constant 0 : index
    %c0_339 = arith.constant 0 : index
    %595 = vector.load %arg4[%c4_337, %c0_338, %c0_339] : memref<9x32x32xbf16, #tpu.memory_space<vmem>>, vector<1x32x32xbf16>
    %596 = vector.shape_cast %595 : vector<1x32x32xbf16> to vector<32x32xbf16>
    %cst_340 = arith.constant dense<0.000000e+00> : vector<8x32xf32>
    %597 = tpu.matmul %301, %596, %cst_340 {dimension_numbers = #tpu.dot_dimension_numbers<[1], [0], [0], [1], [0, 0, 1, 1], [], []>} : vector<8x32xbf16>, vector<32x32xbf16>, vector<8x32xf32> -> vector<8x32xf32>
    %598 = arith.addf %594, %597 : vector<8x32xf32>
    %c6_341 = arith.constant 6 : index
    %c0_342 = arith.constant 0 : index
    %c0_343 = arith.constant 0 : index
    %599 = vector.load %arg4[%c6_341, %c0_342, %c0_343] : memref<9x32x32xbf16, #tpu.memory_space<vmem>>, vector<1x32x32xbf16>
    %600 = vector.shape_cast %599 : vector<1x32x32xbf16> to vector<32x32xbf16>
    %cst_344 = arith.constant dense<0.000000e+00> : vector<8x32xf32>
    %601 = tpu.matmul %304, %600, %cst_344 {dimension_numbers = #tpu.dot_dimension_numbers<[1], [0], [0], [1], [0, 0, 1, 1], [], []>} : vector<8x32xbf16>, vector<32x32xbf16>, vector<8x32xf32> -> vector<8x32xf32>
    %602 = arith.addf %598, %601 : vector<8x32xf32>
    %c7_345 = arith.constant 7 : index
    %c0_346 = arith.constant 0 : index
    %c0_347 = arith.constant 0 : index
    %603 = vector.load %arg4[%c7_345, %c0_346, %c0_347] : memref<9x32x32xbf16, #tpu.memory_space<vmem>>, vector<1x32x32xbf16>
    %604 = vector.shape_cast %603 : vector<1x32x32xbf16> to vector<32x32xbf16>
    %cst_348 = arith.constant dense<0.000000e+00> : vector<8x32xf32>
    %605 = tpu.matmul %305, %604, %cst_348 {dimension_numbers = #tpu.dot_dimension_numbers<[1], [0], [0], [1], [0, 0, 1, 1], [], []>} : vector<8x32xbf16>, vector<32x32xbf16>, vector<8x32xf32> -> vector<8x32xf32>
    %606 = arith.addf %602, %605 : vector<8x32xf32>
    %607 = vector.broadcast %3 : vector<1x32xf32> to vector<8x32xf32>
    %608 = arith.addf %606, %607 : vector<8x32xf32>
    %cst_349 = arith.constant 2.000000e-01 : f32
    %609 = vector.broadcast %cst_349 : f32 to vector<8x32xf32>
    %610 = arith.mulf %609, %608 : vector<8x32xf32>
    %611 = arith.maximumf %608, %610 : vector<8x32xf32>
    %612 = arith.mulf %611, %611 : vector<8x32xf32>
    %cst_350 = arith.constant dense<0.000000e+00> : vector<8xf32>
    %613 = vector.multi_reduction <add>, %612, %cst_350 [1] : vector<8x32xf32> to vector<8xf32>
    %614 = vector.shape_cast %613 : vector<8xf32> to vector<8x1xf32>
    %cst_351 = arith.constant 3.200000e+01 : f32
    %615 = vector.broadcast %cst_351 : f32 to vector<8x1xf32>
    %616 = arith.divf %614, %615 : vector<8x1xf32>
    %cst_352 = arith.constant 9.99999993E-9 : f32
    %617 = vector.broadcast %cst_352 : f32 to vector<8x1xf32>
    %618 = arith.addf %616, %617 : vector<8x1xf32>
    %619 = math.rsqrt %618 : vector<8x1xf32>
    %620 = vector.broadcast %619 : vector<8x1xf32> to vector<8x32xf32>
    %621 = arith.mulf %611, %620 : vector<8x32xf32>
    %c1_353 = arith.constant 1 : index
    %c0_354 = arith.constant 0 : index
    %c0_355 = arith.constant 0 : index
    %622 = vector.load %arg4[%c1_353, %c0_354, %c0_355] : memref<9x32x32xbf16, #tpu.memory_space<vmem>>, vector<1x32x32xbf16>
    %623 = vector.shape_cast %622 : vector<1x32x32xbf16> to vector<32x32xbf16>
    %cst_356 = arith.constant dense<0.000000e+00> : vector<8x32xf32>
    %624 = tpu.matmul %298, %623, %cst_356 {dimension_numbers = #tpu.dot_dimension_numbers<[1], [0], [0], [1], [0, 0, 1, 1], [], []>} : vector<8x32xbf16>, vector<32x32xbf16>, vector<8x32xf32> -> vector<8x32xf32>
    %c2_357 = arith.constant 2 : index
    %c0_358 = arith.constant 0 : index
    %c0_359 = arith.constant 0 : index
    %625 = vector.load %arg4[%c2_357, %c0_358, %c0_359] : memref<9x32x32xbf16, #tpu.memory_space<vmem>>, vector<1x32x32xbf16>
    %626 = vector.shape_cast %625 : vector<1x32x32xbf16> to vector<32x32xbf16>
    %cst_360 = arith.constant dense<0.000000e+00> : vector<8x32xf32>
    %627 = tpu.matmul %299, %626, %cst_360 {dimension_numbers = #tpu.dot_dimension_numbers<[1], [0], [0], [1], [0, 0, 1, 1], [], []>} : vector<8x32xbf16>, vector<32x32xbf16>, vector<8x32xf32> -> vector<8x32xf32>
    %628 = arith.addf %624, %627 : vector<8x32xf32>
    %c4_361 = arith.constant 4 : index
    %c0_362 = arith.constant 0 : index
    %c0_363 = arith.constant 0 : index
    %629 = vector.load %arg4[%c4_361, %c0_362, %c0_363] : memref<9x32x32xbf16, #tpu.memory_space<vmem>>, vector<1x32x32xbf16>
    %630 = vector.shape_cast %629 : vector<1x32x32xbf16> to vector<32x32xbf16>
    %cst_364 = arith.constant dense<0.000000e+00> : vector<8x32xf32>
    %631 = tpu.matmul %302, %630, %cst_364 {dimension_numbers = #tpu.dot_dimension_numbers<[1], [0], [0], [1], [0, 0, 1, 1], [], []>} : vector<8x32xbf16>, vector<32x32xbf16>, vector<8x32xf32> -> vector<8x32xf32>
    %632 = arith.addf %628, %631 : vector<8x32xf32>
    %c5_365 = arith.constant 5 : index
    %c0_366 = arith.constant 0 : index
    %c0_367 = arith.constant 0 : index
    %633 = vector.load %arg4[%c5_365, %c0_366, %c0_367] : memref<9x32x32xbf16, #tpu.memory_space<vmem>>, vector<1x32x32xbf16>
    %634 = vector.shape_cast %633 : vector<1x32x32xbf16> to vector<32x32xbf16>
    %cst_368 = arith.constant dense<0.000000e+00> : vector<8x32xf32>
    %635 = tpu.matmul %303, %634, %cst_368 {dimension_numbers = #tpu.dot_dimension_numbers<[1], [0], [0], [1], [0, 0, 1, 1], [], []>} : vector<8x32xbf16>, vector<32x32xbf16>, vector<8x32xf32> -> vector<8x32xf32>
    %636 = arith.addf %632, %635 : vector<8x32xf32>
    %c7_369 = arith.constant 7 : index
    %c0_370 = arith.constant 0 : index
    %c0_371 = arith.constant 0 : index
    %637 = vector.load %arg4[%c7_369, %c0_370, %c0_371] : memref<9x32x32xbf16, #tpu.memory_space<vmem>>, vector<1x32x32xbf16>
    %638 = vector.shape_cast %637 : vector<1x32x32xbf16> to vector<32x32xbf16>
    %cst_372 = arith.constant dense<0.000000e+00> : vector<8x32xf32>
    %639 = tpu.matmul %306, %638, %cst_372 {dimension_numbers = #tpu.dot_dimension_numbers<[1], [0], [0], [1], [0, 0, 1, 1], [], []>} : vector<8x32xbf16>, vector<32x32xbf16>, vector<8x32xf32> -> vector<8x32xf32>
    %640 = arith.addf %636, %639 : vector<8x32xf32>
    %c8_373 = arith.constant 8 : index
    %c0_374 = arith.constant 0 : index
    %c0_375 = arith.constant 0 : index
    %641 = vector.load %arg4[%c8_373, %c0_374, %c0_375] : memref<9x32x32xbf16, #tpu.memory_space<vmem>>, vector<1x32x32xbf16>
    %642 = vector.shape_cast %641 : vector<1x32x32xbf16> to vector<32x32xbf16>
    %cst_376 = arith.constant dense<0.000000e+00> : vector<8x32xf32>
    %643 = tpu.matmul %307, %642, %cst_376 {dimension_numbers = #tpu.dot_dimension_numbers<[1], [0], [0], [1], [0, 0, 1, 1], [], []>} : vector<8x32xbf16>, vector<32x32xbf16>, vector<8x32xf32> -> vector<8x32xf32>
    %644 = arith.addf %640, %643 : vector<8x32xf32>
    %645 = vector.broadcast %3 : vector<1x32xf32> to vector<8x32xf32>
    %646 = arith.addf %644, %645 : vector<8x32xf32>
    %cst_377 = arith.constant 2.000000e-01 : f32
    %647 = vector.broadcast %cst_377 : f32 to vector<8x32xf32>
    %648 = arith.mulf %647, %646 : vector<8x32xf32>
    %649 = arith.maximumf %646, %648 : vector<8x32xf32>
    %650 = arith.mulf %649, %649 : vector<8x32xf32>
    %cst_378 = arith.constant dense<0.000000e+00> : vector<8xf32>
    %651 = vector.multi_reduction <add>, %650, %cst_378 [1] : vector<8x32xf32> to vector<8xf32>
    %652 = vector.shape_cast %651 : vector<8xf32> to vector<8x1xf32>
    %cst_379 = arith.constant 3.200000e+01 : f32
    %653 = vector.broadcast %cst_379 : f32 to vector<8x1xf32>
    %654 = arith.divf %652, %653 : vector<8x1xf32>
    %cst_380 = arith.constant 9.99999993E-9 : f32
    %655 = vector.broadcast %cst_380 : f32 to vector<8x1xf32>
    %656 = arith.addf %654, %655 : vector<8x1xf32>
    %657 = math.rsqrt %656 : vector<8x1xf32>
    %658 = vector.broadcast %657 : vector<8x1xf32> to vector<8x32xf32>
    %659 = arith.mulf %649, %658 : vector<8x32xf32>
    %c0_381 = arith.constant 0 : index
    %c0_382 = arith.constant 0 : index
    %c0_383 = arith.constant 0 : index
    %660 = vector.load %arg4[%c0_381, %c0_382, %c0_383] : memref<9x32x32xbf16, #tpu.memory_space<vmem>>, vector<1x32x32xbf16>
    %661 = vector.shape_cast %660 : vector<1x32x32xbf16> to vector<32x32xbf16>
    %cst_384 = arith.constant dense<0.000000e+00> : vector<8x32xf32>
    %662 = tpu.matmul %298, %661, %cst_384 {dimension_numbers = #tpu.dot_dimension_numbers<[1], [0], [0], [1], [0, 0, 1, 1], [], []>} : vector<8x32xbf16>, vector<32x32xbf16>, vector<8x32xf32> -> vector<8x32xf32>
    %c1_385 = arith.constant 1 : index
    %c0_386 = arith.constant 0 : index
    %c0_387 = arith.constant 0 : index
    %663 = vector.load %arg4[%c1_385, %c0_386, %c0_387] : memref<9x32x32xbf16, #tpu.memory_space<vmem>>, vector<1x32x32xbf16>
    %664 = vector.shape_cast %663 : vector<1x32x32xbf16> to vector<32x32xbf16>
    %cst_388 = arith.constant dense<0.000000e+00> : vector<8x32xf32>
    %665 = tpu.matmul %299, %664, %cst_388 {dimension_numbers = #tpu.dot_dimension_numbers<[1], [0], [0], [1], [0, 0, 1, 1], [], []>} : vector<8x32xbf16>, vector<32x32xbf16>, vector<8x32xf32> -> vector<8x32xf32>
    %666 = arith.addf %662, %665 : vector<8x32xf32>
    %c2_389 = arith.constant 2 : index
    %c0_390 = arith.constant 0 : index
    %c0_391 = arith.constant 0 : index
    %667 = vector.load %arg4[%c2_389, %c0_390, %c0_391] : memref<9x32x32xbf16, #tpu.memory_space<vmem>>, vector<1x32x32xbf16>
    %668 = vector.shape_cast %667 : vector<1x32x32xbf16> to vector<32x32xbf16>
    %cst_392 = arith.constant dense<0.000000e+00> : vector<8x32xf32>
    %669 = tpu.matmul %300, %668, %cst_392 {dimension_numbers = #tpu.dot_dimension_numbers<[1], [0], [0], [1], [0, 0, 1, 1], [], []>} : vector<8x32xbf16>, vector<32x32xbf16>, vector<8x32xf32> -> vector<8x32xf32>
    %670 = arith.addf %666, %669 : vector<8x32xf32>
    %c3_393 = arith.constant 3 : index
    %c0_394 = arith.constant 0 : index
    %c0_395 = arith.constant 0 : index
    %671 = vector.load %arg4[%c3_393, %c0_394, %c0_395] : memref<9x32x32xbf16, #tpu.memory_space<vmem>>, vector<1x32x32xbf16>
    %672 = vector.shape_cast %671 : vector<1x32x32xbf16> to vector<32x32xbf16>
    %cst_396 = arith.constant dense<0.000000e+00> : vector<8x32xf32>
    %673 = tpu.matmul %302, %672, %cst_396 {dimension_numbers = #tpu.dot_dimension_numbers<[1], [0], [0], [1], [0, 0, 1, 1], [], []>} : vector<8x32xbf16>, vector<32x32xbf16>, vector<8x32xf32> -> vector<8x32xf32>
    %674 = arith.addf %670, %673 : vector<8x32xf32>
    %c4_397 = arith.constant 4 : index
    %c0_398 = arith.constant 0 : index
    %c0_399 = arith.constant 0 : index
    %675 = vector.load %arg4[%c4_397, %c0_398, %c0_399] : memref<9x32x32xbf16, #tpu.memory_space<vmem>>, vector<1x32x32xbf16>
    %676 = vector.shape_cast %675 : vector<1x32x32xbf16> to vector<32x32xbf16>
    %cst_400 = arith.constant dense<0.000000e+00> : vector<8x32xf32>
    %677 = tpu.matmul %303, %676, %cst_400 {dimension_numbers = #tpu.dot_dimension_numbers<[1], [0], [0], [1], [0, 0, 1, 1], [], []>} : vector<8x32xbf16>, vector<32x32xbf16>, vector<8x32xf32> -> vector<8x32xf32>
    %678 = arith.addf %674, %677 : vector<8x32xf32>
    %c5_401 = arith.constant 5 : index
    %c0_402 = arith.constant 0 : index
    %c0_403 = arith.constant 0 : index
    %679 = vector.load %arg4[%c5_401, %c0_402, %c0_403] : memref<9x32x32xbf16, #tpu.memory_space<vmem>>, vector<1x32x32xbf16>
    %680 = vector.shape_cast %679 : vector<1x32x32xbf16> to vector<32x32xbf16>
    %cst_404 = arith.constant dense<0.000000e+00> : vector<8x32xf32>
    %681 = tpu.matmul %304, %680, %cst_404 {dimension_numbers = #tpu.dot_dimension_numbers<[1], [0], [0], [1], [0, 0, 1, 1], [], []>} : vector<8x32xbf16>, vector<32x32xbf16>, vector<8x32xf32> -> vector<8x32xf32>
    %682 = arith.addf %678, %681 : vector<8x32xf32>
    %c6_405 = arith.constant 6 : index
    %c0_406 = arith.constant 0 : index
    %c0_407 = arith.constant 0 : index
    %683 = vector.load %arg4[%c6_405, %c0_406, %c0_407] : memref<9x32x32xbf16, #tpu.memory_space<vmem>>, vector<1x32x32xbf16>
    %684 = vector.shape_cast %683 : vector<1x32x32xbf16> to vector<32x32xbf16>
    %cst_408 = arith.constant dense<0.000000e+00> : vector<8x32xf32>
    %685 = tpu.matmul %306, %684, %cst_408 {dimension_numbers = #tpu.dot_dimension_numbers<[1], [0], [0], [1], [0, 0, 1, 1], [], []>} : vector<8x32xbf16>, vector<32x32xbf16>, vector<8x32xf32> -> vector<8x32xf32>
    %686 = arith.addf %682, %685 : vector<8x32xf32>
    %c7_409 = arith.constant 7 : index
    %c0_410 = arith.constant 0 : index
    %c0_411 = arith.constant 0 : index
    %687 = vector.load %arg4[%c7_409, %c0_410, %c0_411] : memref<9x32x32xbf16, #tpu.memory_space<vmem>>, vector<1x32x32xbf16>
    %688 = vector.shape_cast %687 : vector<1x32x32xbf16> to vector<32x32xbf16>
    %cst_412 = arith.constant dense<0.000000e+00> : vector<8x32xf32>
    %689 = tpu.matmul %307, %688, %cst_412 {dimension_numbers = #tpu.dot_dimension_numbers<[1], [0], [0], [1], [0, 0, 1, 1], [], []>} : vector<8x32xbf16>, vector<32x32xbf16>, vector<8x32xf32> -> vector<8x32xf32>
    %690 = arith.addf %686, %689 : vector<8x32xf32>
    %c8_413 = arith.constant 8 : index
    %c0_414 = arith.constant 0 : index
    %c0_415 = arith.constant 0 : index
    %691 = vector.load %arg4[%c8_413, %c0_414, %c0_415] : memref<9x32x32xbf16, #tpu.memory_space<vmem>>, vector<1x32x32xbf16>
    %692 = vector.shape_cast %691 : vector<1x32x32xbf16> to vector<32x32xbf16>
    %cst_416 = arith.constant dense<0.000000e+00> : vector<8x32xf32>
    %693 = tpu.matmul %308, %692, %cst_416 {dimension_numbers = #tpu.dot_dimension_numbers<[1], [0], [0], [1], [0, 0, 1, 1], [], []>} : vector<8x32xbf16>, vector<32x32xbf16>, vector<8x32xf32> -> vector<8x32xf32>
    %694 = arith.addf %690, %693 : vector<8x32xf32>
    %695 = vector.broadcast %3 : vector<1x32xf32> to vector<8x32xf32>
    %696 = arith.addf %694, %695 : vector<8x32xf32>
    %cst_417 = arith.constant 2.000000e-01 : f32
    %697 = vector.broadcast %cst_417 : f32 to vector<8x32xf32>
    %698 = arith.mulf %697, %696 : vector<8x32xf32>
    %699 = arith.maximumf %696, %698 : vector<8x32xf32>
    %700 = arith.mulf %699, %699 : vector<8x32xf32>
    %cst_418 = arith.constant dense<0.000000e+00> : vector<8xf32>
    %701 = vector.multi_reduction <add>, %700, %cst_418 [1] : vector<8x32xf32> to vector<8xf32>
    %702 = vector.shape_cast %701 : vector<8xf32> to vector<8x1xf32>
    %cst_419 = arith.constant 3.200000e+01 : f32
    %703 = vector.broadcast %cst_419 : f32 to vector<8x1xf32>
    %704 = arith.divf %702, %703 : vector<8x1xf32>
    %cst_420 = arith.constant 9.99999993E-9 : f32
    %705 = vector.broadcast %cst_420 : f32 to vector<8x1xf32>
    %706 = arith.addf %704, %705 : vector<8x1xf32>
    %707 = math.rsqrt %706 : vector<8x1xf32>
    %708 = vector.broadcast %707 : vector<8x1xf32> to vector<8x32xf32>
    %709 = arith.mulf %699, %708 : vector<8x32xf32>
    %c0_421 = arith.constant 0 : index
    %c0_422 = arith.constant 0 : index
    %c0_423 = arith.constant 0 : index
    %710 = vector.load %arg4[%c0_421, %c0_422, %c0_423] : memref<9x32x32xbf16, #tpu.memory_space<vmem>>, vector<1x32x32xbf16>
    %711 = vector.shape_cast %710 : vector<1x32x32xbf16> to vector<32x32xbf16>
    %cst_424 = arith.constant dense<0.000000e+00> : vector<8x32xf32>
    %712 = tpu.matmul %299, %711, %cst_424 {dimension_numbers = #tpu.dot_dimension_numbers<[1], [0], [0], [1], [0, 0, 1, 1], [], []>} : vector<8x32xbf16>, vector<32x32xbf16>, vector<8x32xf32> -> vector<8x32xf32>
    %c1_425 = arith.constant 1 : index
    %c0_426 = arith.constant 0 : index
    %c0_427 = arith.constant 0 : index
    %713 = vector.load %arg4[%c1_425, %c0_426, %c0_427] : memref<9x32x32xbf16, #tpu.memory_space<vmem>>, vector<1x32x32xbf16>
    %714 = vector.shape_cast %713 : vector<1x32x32xbf16> to vector<32x32xbf16>
    %cst_428 = arith.constant dense<0.000000e+00> : vector<8x32xf32>
    %715 = tpu.matmul %300, %714, %cst_428 {dimension_numbers = #tpu.dot_dimension_numbers<[1], [0], [0], [1], [0, 0, 1, 1], [], []>} : vector<8x32xbf16>, vector<32x32xbf16>, vector<8x32xf32> -> vector<8x32xf32>
    %716 = arith.addf %712, %715 : vector<8x32xf32>
    %c2_429 = arith.constant 2 : index
    %c0_430 = arith.constant 0 : index
    %c0_431 = arith.constant 0 : index
    %717 = vector.load %arg4[%c2_429, %c0_430, %c0_431] : memref<9x32x32xbf16, #tpu.memory_space<vmem>>, vector<1x32x32xbf16>
    %718 = vector.shape_cast %717 : vector<1x32x32xbf16> to vector<32x32xbf16>
    %cst_432 = arith.constant dense<0.000000e+00> : vector<8x32xf32>
    %719 = tpu.matmul %301, %718, %cst_432 {dimension_numbers = #tpu.dot_dimension_numbers<[1], [0], [0], [1], [0, 0, 1, 1], [], []>} : vector<8x32xbf16>, vector<32x32xbf16>, vector<8x32xf32> -> vector<8x32xf32>
    %720 = arith.addf %716, %719 : vector<8x32xf32>
    %c3_433 = arith.constant 3 : index
    %c0_434 = arith.constant 0 : index
    %c0_435 = arith.constant 0 : index
    %721 = vector.load %arg4[%c3_433, %c0_434, %c0_435] : memref<9x32x32xbf16, #tpu.memory_space<vmem>>, vector<1x32x32xbf16>
    %722 = vector.shape_cast %721 : vector<1x32x32xbf16> to vector<32x32xbf16>
    %cst_436 = arith.constant dense<0.000000e+00> : vector<8x32xf32>
    %723 = tpu.matmul %303, %722, %cst_436 {dimension_numbers = #tpu.dot_dimension_numbers<[1], [0], [0], [1], [0, 0, 1, 1], [], []>} : vector<8x32xbf16>, vector<32x32xbf16>, vector<8x32xf32> -> vector<8x32xf32>
    %724 = arith.addf %720, %723 : vector<8x32xf32>
    %c4_437 = arith.constant 4 : index
    %c0_438 = arith.constant 0 : index
    %c0_439 = arith.constant 0 : index
    %725 = vector.load %arg4[%c4_437, %c0_438, %c0_439] : memref<9x32x32xbf16, #tpu.memory_space<vmem>>, vector<1x32x32xbf16>
    %726 = vector.shape_cast %725 : vector<1x32x32xbf16> to vector<32x32xbf16>
    %cst_440 = arith.constant dense<0.000000e+00> : vector<8x32xf32>
    %727 = tpu.matmul %304, %726, %cst_440 {dimension_numbers = #tpu.dot_dimension_numbers<[1], [0], [0], [1], [0, 0, 1, 1], [], []>} : vector<8x32xbf16>, vector<32x32xbf16>, vector<8x32xf32> -> vector<8x32xf32>
    %728 = arith.addf %724, %727 : vector<8x32xf32>
    %c5_441 = arith.constant 5 : index
    %c0_442 = arith.constant 0 : index
    %c0_443 = arith.constant 0 : index
    %729 = vector.load %arg4[%c5_441, %c0_442, %c0_443] : memref<9x32x32xbf16, #tpu.memory_space<vmem>>, vector<1x32x32xbf16>
    %730 = vector.shape_cast %729 : vector<1x32x32xbf16> to vector<32x32xbf16>
    %cst_444 = arith.constant dense<0.000000e+00> : vector<8x32xf32>
    %731 = tpu.matmul %305, %730, %cst_444 {dimension_numbers = #tpu.dot_dimension_numbers<[1], [0], [0], [1], [0, 0, 1, 1], [], []>} : vector<8x32xbf16>, vector<32x32xbf16>, vector<8x32xf32> -> vector<8x32xf32>
    %732 = arith.addf %728, %731 : vector<8x32xf32>
    %c6_445 = arith.constant 6 : index
    %c0_446 = arith.constant 0 : index
    %c0_447 = arith.constant 0 : index
    %733 = vector.load %arg4[%c6_445, %c0_446, %c0_447] : memref<9x32x32xbf16, #tpu.memory_space<vmem>>, vector<1x32x32xbf16>
    %734 = vector.shape_cast %733 : vector<1x32x32xbf16> to vector<32x32xbf16>
    %cst_448 = arith.constant dense<0.000000e+00> : vector<8x32xf32>
    %735 = tpu.matmul %307, %734, %cst_448 {dimension_numbers = #tpu.dot_dimension_numbers<[1], [0], [0], [1], [0, 0, 1, 1], [], []>} : vector<8x32xbf16>, vector<32x32xbf16>, vector<8x32xf32> -> vector<8x32xf32>
    %736 = arith.addf %732, %735 : vector<8x32xf32>
    %c7_449 = arith.constant 7 : index
    %c0_450 = arith.constant 0 : index
    %c0_451 = arith.constant 0 : index
    %737 = vector.load %arg4[%c7_449, %c0_450, %c0_451] : memref<9x32x32xbf16, #tpu.memory_space<vmem>>, vector<1x32x32xbf16>
    %738 = vector.shape_cast %737 : vector<1x32x32xbf16> to vector<32x32xbf16>
    %cst_452 = arith.constant dense<0.000000e+00> : vector<8x32xf32>
    %739 = tpu.matmul %308, %738, %cst_452 {dimension_numbers = #tpu.dot_dimension_numbers<[1], [0], [0], [1], [0, 0, 1, 1], [], []>} : vector<8x32xbf16>, vector<32x32xbf16>, vector<8x32xf32> -> vector<8x32xf32>
    %740 = arith.addf %736, %739 : vector<8x32xf32>
    %c8_453 = arith.constant 8 : index
    %c0_454 = arith.constant 0 : index
    %c0_455 = arith.constant 0 : index
    %741 = vector.load %arg4[%c8_453, %c0_454, %c0_455] : memref<9x32x32xbf16, #tpu.memory_space<vmem>>, vector<1x32x32xbf16>
    %742 = vector.shape_cast %741 : vector<1x32x32xbf16> to vector<32x32xbf16>
    %cst_456 = arith.constant dense<0.000000e+00> : vector<8x32xf32>
    %743 = tpu.matmul %309, %742, %cst_456 {dimension_numbers = #tpu.dot_dimension_numbers<[1], [0], [0], [1], [0, 0, 1, 1], [], []>} : vector<8x32xbf16>, vector<32x32xbf16>, vector<8x32xf32> -> vector<8x32xf32>
    %744 = arith.addf %740, %743 : vector<8x32xf32>
    %745 = vector.broadcast %3 : vector<1x32xf32> to vector<8x32xf32>
    %746 = arith.addf %744, %745 : vector<8x32xf32>
    %cst_457 = arith.constant 2.000000e-01 : f32
    %747 = vector.broadcast %cst_457 : f32 to vector<8x32xf32>
    %748 = arith.mulf %747, %746 : vector<8x32xf32>
    %749 = arith.maximumf %746, %748 : vector<8x32xf32>
    %750 = arith.mulf %749, %749 : vector<8x32xf32>
    %cst_458 = arith.constant dense<0.000000e+00> : vector<8xf32>
    %751 = vector.multi_reduction <add>, %750, %cst_458 [1] : vector<8x32xf32> to vector<8xf32>
    %752 = vector.shape_cast %751 : vector<8xf32> to vector<8x1xf32>
    %cst_459 = arith.constant 3.200000e+01 : f32
    %753 = vector.broadcast %cst_459 : f32 to vector<8x1xf32>
    %754 = arith.divf %752, %753 : vector<8x1xf32>
    %cst_460 = arith.constant 9.99999993E-9 : f32
    %755 = vector.broadcast %cst_460 : f32 to vector<8x1xf32>
    %756 = arith.addf %754, %755 : vector<8x1xf32>
    %757 = math.rsqrt %756 : vector<8x1xf32>
    %758 = vector.broadcast %757 : vector<8x1xf32> to vector<8x32xf32>
    %759 = arith.mulf %749, %758 : vector<8x32xf32>
    %c0_461 = arith.constant 0 : index
    %c0_462 = arith.constant 0 : index
    %c0_463 = arith.constant 0 : index
    %760 = vector.load %arg4[%c0_461, %c0_462, %c0_463] : memref<9x32x32xbf16, #tpu.memory_space<vmem>>, vector<1x32x32xbf16>
    %761 = vector.shape_cast %760 : vector<1x32x32xbf16> to vector<32x32xbf16>
    %cst_464 = arith.constant dense<0.000000e+00> : vector<8x32xf32>
    %762 = tpu.matmul %300, %761, %cst_464 {dimension_numbers = #tpu.dot_dimension_numbers<[1], [0], [0], [1], [0, 0, 1, 1], [], []>} : vector<8x32xbf16>, vector<32x32xbf16>, vector<8x32xf32> -> vector<8x32xf32>
    %c1_465 = arith.constant 1 : index
    %c0_466 = arith.constant 0 : index
    %c0_467 = arith.constant 0 : index
    %763 = vector.load %arg4[%c1_465, %c0_466, %c0_467] : memref<9x32x32xbf16, #tpu.memory_space<vmem>>, vector<1x32x32xbf16>
    %764 = vector.shape_cast %763 : vector<1x32x32xbf16> to vector<32x32xbf16>
    %cst_468 = arith.constant dense<0.000000e+00> : vector<8x32xf32>
    %765 = tpu.matmul %301, %764, %cst_468 {dimension_numbers = #tpu.dot_dimension_numbers<[1], [0], [0], [1], [0, 0, 1, 1], [], []>} : vector<8x32xbf16>, vector<32x32xbf16>, vector<8x32xf32> -> vector<8x32xf32>
    %766 = arith.addf %762, %765 : vector<8x32xf32>
    %c3_469 = arith.constant 3 : index
    %c0_470 = arith.constant 0 : index
    %c0_471 = arith.constant 0 : index
    %767 = vector.load %arg4[%c3_469, %c0_470, %c0_471] : memref<9x32x32xbf16, #tpu.memory_space<vmem>>, vector<1x32x32xbf16>
    %768 = vector.shape_cast %767 : vector<1x32x32xbf16> to vector<32x32xbf16>
    %cst_472 = arith.constant dense<0.000000e+00> : vector<8x32xf32>
    %769 = tpu.matmul %304, %768, %cst_472 {dimension_numbers = #tpu.dot_dimension_numbers<[1], [0], [0], [1], [0, 0, 1, 1], [], []>} : vector<8x32xbf16>, vector<32x32xbf16>, vector<8x32xf32> -> vector<8x32xf32>
    %770 = arith.addf %766, %769 : vector<8x32xf32>
    %c4_473 = arith.constant 4 : index
    %c0_474 = arith.constant 0 : index
    %c0_475 = arith.constant 0 : index
    %771 = vector.load %arg4[%c4_473, %c0_474, %c0_475] : memref<9x32x32xbf16, #tpu.memory_space<vmem>>, vector<1x32x32xbf16>
    %772 = vector.shape_cast %771 : vector<1x32x32xbf16> to vector<32x32xbf16>
    %cst_476 = arith.constant dense<0.000000e+00> : vector<8x32xf32>
    %773 = tpu.matmul %305, %772, %cst_476 {dimension_numbers = #tpu.dot_dimension_numbers<[1], [0], [0], [1], [0, 0, 1, 1], [], []>} : vector<8x32xbf16>, vector<32x32xbf16>, vector<8x32xf32> -> vector<8x32xf32>
    %774 = arith.addf %770, %773 : vector<8x32xf32>
    %c6_477 = arith.constant 6 : index
    %c0_478 = arith.constant 0 : index
    %c0_479 = arith.constant 0 : index
    %775 = vector.load %arg4[%c6_477, %c0_478, %c0_479] : memref<9x32x32xbf16, #tpu.memory_space<vmem>>, vector<1x32x32xbf16>
    %776 = vector.shape_cast %775 : vector<1x32x32xbf16> to vector<32x32xbf16>
    %cst_480 = arith.constant dense<0.000000e+00> : vector<8x32xf32>
    %777 = tpu.matmul %308, %776, %cst_480 {dimension_numbers = #tpu.dot_dimension_numbers<[1], [0], [0], [1], [0, 0, 1, 1], [], []>} : vector<8x32xbf16>, vector<32x32xbf16>, vector<8x32xf32> -> vector<8x32xf32>
    %778 = arith.addf %774, %777 : vector<8x32xf32>
    %c7_481 = arith.constant 7 : index
    %c0_482 = arith.constant 0 : index
    %c0_483 = arith.constant 0 : index
    %779 = vector.load %arg4[%c7_481, %c0_482, %c0_483] : memref<9x32x32xbf16, #tpu.memory_space<vmem>>, vector<1x32x32xbf16>
    %780 = vector.shape_cast %779 : vector<1x32x32xbf16> to vector<32x32xbf16>
    %cst_484 = arith.constant dense<0.000000e+00> : vector<8x32xf32>
    %781 = tpu.matmul %309, %780, %cst_484 {dimension_numbers = #tpu.dot_dimension_numbers<[1], [0], [0], [1], [0, 0, 1, 1], [], []>} : vector<8x32xbf16>, vector<32x32xbf16>, vector<8x32xf32> -> vector<8x32xf32>
    %782 = arith.addf %778, %781 : vector<8x32xf32>
    %783 = vector.broadcast %3 : vector<1x32xf32> to vector<8x32xf32>
    %784 = arith.addf %782, %783 : vector<8x32xf32>
    %cst_485 = arith.constant 2.000000e-01 : f32
    %785 = vector.broadcast %cst_485 : f32 to vector<8x32xf32>
    %786 = arith.mulf %785, %784 : vector<8x32xf32>
    %787 = arith.maximumf %784, %786 : vector<8x32xf32>
    %788 = arith.mulf %787, %787 : vector<8x32xf32>
    %cst_486 = arith.constant dense<0.000000e+00> : vector<8xf32>
    %789 = vector.multi_reduction <add>, %788, %cst_486 [1] : vector<8x32xf32> to vector<8xf32>
    %790 = vector.shape_cast %789 : vector<8xf32> to vector<8x1xf32>
    %cst_487 = arith.constant 3.200000e+01 : f32
    %791 = vector.broadcast %cst_487 : f32 to vector<8x1xf32>
    %792 = arith.divf %790, %791 : vector<8x1xf32>
    %cst_488 = arith.constant 9.99999993E-9 : f32
    %793 = vector.broadcast %cst_488 : f32 to vector<8x1xf32>
    %794 = arith.addf %792, %793 : vector<8x1xf32>
    %795 = math.rsqrt %794 : vector<8x1xf32>
    %796 = vector.broadcast %795 : vector<8x1xf32> to vector<8x32xf32>
    %797 = arith.mulf %787, %796 : vector<8x32xf32>
    %c1_489 = arith.constant 1 : index
    %c0_490 = arith.constant 0 : index
    %c0_491 = arith.constant 0 : index
    %798 = vector.load %arg4[%c1_489, %c0_490, %c0_491] : memref<9x32x32xbf16, #tpu.memory_space<vmem>>, vector<1x32x32xbf16>
    %799 = vector.shape_cast %798 : vector<1x32x32xbf16> to vector<32x32xbf16>
    %cst_492 = arith.constant dense<0.000000e+00> : vector<8x32xf32>
    %800 = tpu.matmul %302, %799, %cst_492 {dimension_numbers = #tpu.dot_dimension_numbers<[1], [0], [0], [1], [0, 0, 1, 1], [], []>} : vector<8x32xbf16>, vector<32x32xbf16>, vector<8x32xf32> -> vector<8x32xf32>
    %c2_493 = arith.constant 2 : index
    %c0_494 = arith.constant 0 : index
    %c0_495 = arith.constant 0 : index
    %801 = vector.load %arg4[%c2_493, %c0_494, %c0_495] : memref<9x32x32xbf16, #tpu.memory_space<vmem>>, vector<1x32x32xbf16>
    %802 = vector.shape_cast %801 : vector<1x32x32xbf16> to vector<32x32xbf16>
    %cst_496 = arith.constant dense<0.000000e+00> : vector<8x32xf32>
    %803 = tpu.matmul %303, %802, %cst_496 {dimension_numbers = #tpu.dot_dimension_numbers<[1], [0], [0], [1], [0, 0, 1, 1], [], []>} : vector<8x32xbf16>, vector<32x32xbf16>, vector<8x32xf32> -> vector<8x32xf32>
    %804 = arith.addf %800, %803 : vector<8x32xf32>
    %c4_497 = arith.constant 4 : index
    %c0_498 = arith.constant 0 : index
    %c0_499 = arith.constant 0 : index
    %805 = vector.load %arg4[%c4_497, %c0_498, %c0_499] : memref<9x32x32xbf16, #tpu.memory_space<vmem>>, vector<1x32x32xbf16>
    %806 = vector.shape_cast %805 : vector<1x32x32xbf16> to vector<32x32xbf16>
    %cst_500 = arith.constant dense<0.000000e+00> : vector<8x32xf32>
    %807 = tpu.matmul %306, %806, %cst_500 {dimension_numbers = #tpu.dot_dimension_numbers<[1], [0], [0], [1], [0, 0, 1, 1], [], []>} : vector<8x32xbf16>, vector<32x32xbf16>, vector<8x32xf32> -> vector<8x32xf32>
    %808 = arith.addf %804, %807 : vector<8x32xf32>
    %c5_501 = arith.constant 5 : index
    %c0_502 = arith.constant 0 : index
    %c0_503 = arith.constant 0 : index
    %809 = vector.load %arg4[%c5_501, %c0_502, %c0_503] : memref<9x32x32xbf16, #tpu.memory_space<vmem>>, vector<1x32x32xbf16>
    %810 = vector.shape_cast %809 : vector<1x32x32xbf16> to vector<32x32xbf16>
    %cst_504 = arith.constant dense<0.000000e+00> : vector<8x32xf32>
    %811 = tpu.matmul %307, %810, %cst_504 {dimension_numbers = #tpu.dot_dimension_numbers<[1], [0], [0], [1], [0, 0, 1, 1], [], []>} : vector<8x32xbf16>, vector<32x32xbf16>, vector<8x32xf32> -> vector<8x32xf32>
    %812 = arith.addf %808, %811 : vector<8x32xf32>
    %813 = vector.broadcast %3 : vector<1x32xf32> to vector<8x32xf32>
    %814 = arith.addf %812, %813 : vector<8x32xf32>
    %cst_505 = arith.constant 2.000000e-01 : f32
    %815 = vector.broadcast %cst_505 : f32 to vector<8x32xf32>
    %816 = arith.mulf %815, %814 : vector<8x32xf32>
    %817 = arith.maximumf %814, %816 : vector<8x32xf32>
    %818 = arith.mulf %817, %817 : vector<8x32xf32>
    %cst_506 = arith.constant dense<0.000000e+00> : vector<8xf32>
    %819 = vector.multi_reduction <add>, %818, %cst_506 [1] : vector<8x32xf32> to vector<8xf32>
    %820 = vector.shape_cast %819 : vector<8xf32> to vector<8x1xf32>
    %cst_507 = arith.constant 3.200000e+01 : f32
    %821 = vector.broadcast %cst_507 : f32 to vector<8x1xf32>
    %822 = arith.divf %820, %821 : vector<8x1xf32>
    %cst_508 = arith.constant 9.99999993E-9 : f32
    %823 = vector.broadcast %cst_508 : f32 to vector<8x1xf32>
    %824 = arith.addf %822, %823 : vector<8x1xf32>
    %825 = math.rsqrt %824 : vector<8x1xf32>
    %826 = vector.broadcast %825 : vector<8x1xf32> to vector<8x32xf32>
    %827 = arith.mulf %817, %826 : vector<8x32xf32>
    %c0_509 = arith.constant 0 : index
    %c0_510 = arith.constant 0 : index
    %c0_511 = arith.constant 0 : index
    %828 = vector.load %arg4[%c0_509, %c0_510, %c0_511] : memref<9x32x32xbf16, #tpu.memory_space<vmem>>, vector<1x32x32xbf16>
    %829 = vector.shape_cast %828 : vector<1x32x32xbf16> to vector<32x32xbf16>
    %cst_512 = arith.constant dense<0.000000e+00> : vector<8x32xf32>
    %830 = tpu.matmul %302, %829, %cst_512 {dimension_numbers = #tpu.dot_dimension_numbers<[1], [0], [0], [1], [0, 0, 1, 1], [], []>} : vector<8x32xbf16>, vector<32x32xbf16>, vector<8x32xf32> -> vector<8x32xf32>
    %c1_513 = arith.constant 1 : index
    %c0_514 = arith.constant 0 : index
    %c0_515 = arith.constant 0 : index
    %831 = vector.load %arg4[%c1_513, %c0_514, %c0_515] : memref<9x32x32xbf16, #tpu.memory_space<vmem>>, vector<1x32x32xbf16>
    %832 = vector.shape_cast %831 : vector<1x32x32xbf16> to vector<32x32xbf16>
    %cst_516 = arith.constant dense<0.000000e+00> : vector<8x32xf32>
    %833 = tpu.matmul %303, %832, %cst_516 {dimension_numbers = #tpu.dot_dimension_numbers<[1], [0], [0], [1], [0, 0, 1, 1], [], []>} : vector<8x32xbf16>, vector<32x32xbf16>, vector<8x32xf32> -> vector<8x32xf32>
    %834 = arith.addf %830, %833 : vector<8x32xf32>
    %c2_517 = arith.constant 2 : index
    %c0_518 = arith.constant 0 : index
    %c0_519 = arith.constant 0 : index
    %835 = vector.load %arg4[%c2_517, %c0_518, %c0_519] : memref<9x32x32xbf16, #tpu.memory_space<vmem>>, vector<1x32x32xbf16>
    %836 = vector.shape_cast %835 : vector<1x32x32xbf16> to vector<32x32xbf16>
    %cst_520 = arith.constant dense<0.000000e+00> : vector<8x32xf32>
    %837 = tpu.matmul %304, %836, %cst_520 {dimension_numbers = #tpu.dot_dimension_numbers<[1], [0], [0], [1], [0, 0, 1, 1], [], []>} : vector<8x32xbf16>, vector<32x32xbf16>, vector<8x32xf32> -> vector<8x32xf32>
    %838 = arith.addf %834, %837 : vector<8x32xf32>
    %c3_521 = arith.constant 3 : index
    %c0_522 = arith.constant 0 : index
    %c0_523 = arith.constant 0 : index
    %839 = vector.load %arg4[%c3_521, %c0_522, %c0_523] : memref<9x32x32xbf16, #tpu.memory_space<vmem>>, vector<1x32x32xbf16>
    %840 = vector.shape_cast %839 : vector<1x32x32xbf16> to vector<32x32xbf16>
    %cst_524 = arith.constant dense<0.000000e+00> : vector<8x32xf32>
    %841 = tpu.matmul %306, %840, %cst_524 {dimension_numbers = #tpu.dot_dimension_numbers<[1], [0], [0], [1], [0, 0, 1, 1], [], []>} : vector<8x32xbf16>, vector<32x32xbf16>, vector<8x32xf32> -> vector<8x32xf32>
    %842 = arith.addf %838, %841 : vector<8x32xf32>
    %c4_525 = arith.constant 4 : index
    %c0_526 = arith.constant 0 : index
    %c0_527 = arith.constant 0 : index
    %843 = vector.load %arg4[%c4_525, %c0_526, %c0_527] : memref<9x32x32xbf16, #tpu.memory_space<vmem>>, vector<1x32x32xbf16>
    %844 = vector.shape_cast %843 : vector<1x32x32xbf16> to vector<32x32xbf16>
    %cst_528 = arith.constant dense<0.000000e+00> : vector<8x32xf32>
    %845 = tpu.matmul %307, %844, %cst_528 {dimension_numbers = #tpu.dot_dimension_numbers<[1], [0], [0], [1], [0, 0, 1, 1], [], []>} : vector<8x32xbf16>, vector<32x32xbf16>, vector<8x32xf32> -> vector<8x32xf32>
    %846 = arith.addf %842, %845 : vector<8x32xf32>
    %c5_529 = arith.constant 5 : index
    %c0_530 = arith.constant 0 : index
    %c0_531 = arith.constant 0 : index
    %847 = vector.load %arg4[%c5_529, %c0_530, %c0_531] : memref<9x32x32xbf16, #tpu.memory_space<vmem>>, vector<1x32x32xbf16>
    %848 = vector.shape_cast %847 : vector<1x32x32xbf16> to vector<32x32xbf16>
    %cst_532 = arith.constant dense<0.000000e+00> : vector<8x32xf32>
    %849 = tpu.matmul %308, %848, %cst_532 {dimension_numbers = #tpu.dot_dimension_numbers<[1], [0], [0], [1], [0, 0, 1, 1], [], []>} : vector<8x32xbf16>, vector<32x32xbf16>, vector<8x32xf32> -> vector<8x32xf32>
    %850 = arith.addf %846, %849 : vector<8x32xf32>
    %851 = vector.broadcast %3 : vector<1x32xf32> to vector<8x32xf32>
    %852 = arith.addf %850, %851 : vector<8x32xf32>
    %cst_533 = arith.constant 2.000000e-01 : f32
    %853 = vector.broadcast %cst_533 : f32 to vector<8x32xf32>
    %854 = arith.mulf %853, %852 : vector<8x32xf32>
    %855 = arith.maximumf %852, %854 : vector<8x32xf32>
    %856 = arith.mulf %855, %855 : vector<8x32xf32>
    %cst_534 = arith.constant dense<0.000000e+00> : vector<8xf32>
    %857 = vector.multi_reduction <add>, %856, %cst_534 [1] : vector<8x32xf32> to vector<8xf32>
    %858 = vector.shape_cast %857 : vector<8xf32> to vector<8x1xf32>
    %cst_535 = arith.constant 3.200000e+01 : f32
    %859 = vector.broadcast %cst_535 : f32 to vector<8x1xf32>
    %860 = arith.divf %858, %859 : vector<8x1xf32>
    %cst_536 = arith.constant 9.99999993E-9 : f32
    %861 = vector.broadcast %cst_536 : f32 to vector<8x1xf32>
    %862 = arith.addf %860, %861 : vector<8x1xf32>
    %863 = math.rsqrt %862 : vector<8x1xf32>
    %864 = vector.broadcast %863 : vector<8x1xf32> to vector<8x32xf32>
    %865 = arith.mulf %855, %864 : vector<8x32xf32>
    %c0_537 = arith.constant 0 : index
    %c0_538 = arith.constant 0 : index
    %c0_539 = arith.constant 0 : index
    %866 = vector.load %arg4[%c0_537, %c0_538, %c0_539] : memref<9x32x32xbf16, #tpu.memory_space<vmem>>, vector<1x32x32xbf16>
    %867 = vector.shape_cast %866 : vector<1x32x32xbf16> to vector<32x32xbf16>
    %cst_540 = arith.constant dense<0.000000e+00> : vector<8x32xf32>
    %868 = tpu.matmul %303, %867, %cst_540 {dimension_numbers = #tpu.dot_dimension_numbers<[1], [0], [0], [1], [0, 0, 1, 1], [], []>} : vector<8x32xbf16>, vector<32x32xbf16>, vector<8x32xf32> -> vector<8x32xf32>
    %c1_541 = arith.constant 1 : index
    %c0_542 = arith.constant 0 : index
    %c0_543 = arith.constant 0 : index
    %869 = vector.load %arg4[%c1_541, %c0_542, %c0_543] : memref<9x32x32xbf16, #tpu.memory_space<vmem>>, vector<1x32x32xbf16>
    %870 = vector.shape_cast %869 : vector<1x32x32xbf16> to vector<32x32xbf16>
    %cst_544 = arith.constant dense<0.000000e+00> : vector<8x32xf32>
    %871 = tpu.matmul %304, %870, %cst_544 {dimension_numbers = #tpu.dot_dimension_numbers<[1], [0], [0], [1], [0, 0, 1, 1], [], []>} : vector<8x32xbf16>, vector<32x32xbf16>, vector<8x32xf32> -> vector<8x32xf32>
    %872 = arith.addf %868, %871 : vector<8x32xf32>
    %c2_545 = arith.constant 2 : index
    %c0_546 = arith.constant 0 : index
    %c0_547 = arith.constant 0 : index
    %873 = vector.load %arg4[%c2_545, %c0_546, %c0_547] : memref<9x32x32xbf16, #tpu.memory_space<vmem>>, vector<1x32x32xbf16>
    %874 = vector.shape_cast %873 : vector<1x32x32xbf16> to vector<32x32xbf16>
    %cst_548 = arith.constant dense<0.000000e+00> : vector<8x32xf32>
    %875 = tpu.matmul %305, %874, %cst_548 {dimension_numbers = #tpu.dot_dimension_numbers<[1], [0], [0], [1], [0, 0, 1, 1], [], []>} : vector<8x32xbf16>, vector<32x32xbf16>, vector<8x32xf32> -> vector<8x32xf32>
    %876 = arith.addf %872, %875 : vector<8x32xf32>
    %c3_549 = arith.constant 3 : index
    %c0_550 = arith.constant 0 : index
    %c0_551 = arith.constant 0 : index
    %877 = vector.load %arg4[%c3_549, %c0_550, %c0_551] : memref<9x32x32xbf16, #tpu.memory_space<vmem>>, vector<1x32x32xbf16>
    %878 = vector.shape_cast %877 : vector<1x32x32xbf16> to vector<32x32xbf16>
    %cst_552 = arith.constant dense<0.000000e+00> : vector<8x32xf32>
    %879 = tpu.matmul %307, %878, %cst_552 {dimension_numbers = #tpu.dot_dimension_numbers<[1], [0], [0], [1], [0, 0, 1, 1], [], []>} : vector<8x32xbf16>, vector<32x32xbf16>, vector<8x32xf32> -> vector<8x32xf32>
    %880 = arith.addf %876, %879 : vector<8x32xf32>
    %c4_553 = arith.constant 4 : index
    %c0_554 = arith.constant 0 : index
    %c0_555 = arith.constant 0 : index
    %881 = vector.load %arg4[%c4_553, %c0_554, %c0_555] : memref<9x32x32xbf16, #tpu.memory_space<vmem>>, vector<1x32x32xbf16>
    %882 = vector.shape_cast %881 : vector<1x32x32xbf16> to vector<32x32xbf16>
    %cst_556 = arith.constant dense<0.000000e+00> : vector<8x32xf32>
    %883 = tpu.matmul %308, %882, %cst_556 {dimension_numbers = #tpu.dot_dimension_numbers<[1], [0], [0], [1], [0, 0, 1, 1], [], []>} : vector<8x32xbf16>, vector<32x32xbf16>, vector<8x32xf32> -> vector<8x32xf32>
    %884 = arith.addf %880, %883 : vector<8x32xf32>
    %c5_557 = arith.constant 5 : index
    %c0_558 = arith.constant 0 : index
    %c0_559 = arith.constant 0 : index
    %885 = vector.load %arg4[%c5_557, %c0_558, %c0_559] : memref<9x32x32xbf16, #tpu.memory_space<vmem>>, vector<1x32x32xbf16>
    %886 = vector.shape_cast %885 : vector<1x32x32xbf16> to vector<32x32xbf16>
    %cst_560 = arith.constant dense<0.000000e+00> : vector<8x32xf32>
    %887 = tpu.matmul %309, %886, %cst_560 {dimension_numbers = #tpu.dot_dimension_numbers<[1], [0], [0], [1], [0, 0, 1, 1], [], []>} : vector<8x32xbf16>, vector<32x32xbf16>, vector<8x32xf32> -> vector<8x32xf32>
    %888 = arith.addf %884, %887 : vector<8x32xf32>
    %889 = vector.broadcast %3 : vector<1x32xf32> to vector<8x32xf32>
    %890 = arith.addf %888, %889 : vector<8x32xf32>
    %cst_561 = arith.constant 2.000000e-01 : f32
    %891 = vector.broadcast %cst_561 : f32 to vector<8x32xf32>
    %892 = arith.mulf %891, %890 : vector<8x32xf32>
    %893 = arith.maximumf %890, %892 : vector<8x32xf32>
    %894 = arith.mulf %893, %893 : vector<8x32xf32>
    %cst_562 = arith.constant dense<0.000000e+00> : vector<8xf32>
    %895 = vector.multi_reduction <add>, %894, %cst_562 [1] : vector<8x32xf32> to vector<8xf32>
    %896 = vector.shape_cast %895 : vector<8xf32> to vector<8x1xf32>
    %cst_563 = arith.constant 3.200000e+01 : f32
    %897 = vector.broadcast %cst_563 : f32 to vector<8x1xf32>
    %898 = arith.divf %896, %897 : vector<8x1xf32>
    %cst_564 = arith.constant 9.99999993E-9 : f32
    %899 = vector.broadcast %cst_564 : f32 to vector<8x1xf32>
    %900 = arith.addf %898, %899 : vector<8x1xf32>
    %901 = math.rsqrt %900 : vector<8x1xf32>
    %902 = vector.broadcast %901 : vector<8x1xf32> to vector<8x32xf32>
    %903 = arith.mulf %893, %902 : vector<8x32xf32>
    %c0_565 = arith.constant 0 : index
    %c0_566 = arith.constant 0 : index
    %c0_567 = arith.constant 0 : index
    %904 = vector.load %arg4[%c0_565, %c0_566, %c0_567] : memref<9x32x32xbf16, #tpu.memory_space<vmem>>, vector<1x32x32xbf16>
    %905 = vector.shape_cast %904 : vector<1x32x32xbf16> to vector<32x32xbf16>
    %cst_568 = arith.constant dense<0.000000e+00> : vector<8x32xf32>
    %906 = tpu.matmul %304, %905, %cst_568 {dimension_numbers = #tpu.dot_dimension_numbers<[1], [0], [0], [1], [0, 0, 1, 1], [], []>} : vector<8x32xbf16>, vector<32x32xbf16>, vector<8x32xf32> -> vector<8x32xf32>
    %c1_569 = arith.constant 1 : index
    %c0_570 = arith.constant 0 : index
    %c0_571 = arith.constant 0 : index
    %907 = vector.load %arg4[%c1_569, %c0_570, %c0_571] : memref<9x32x32xbf16, #tpu.memory_space<vmem>>, vector<1x32x32xbf16>
    %908 = vector.shape_cast %907 : vector<1x32x32xbf16> to vector<32x32xbf16>
    %cst_572 = arith.constant dense<0.000000e+00> : vector<8x32xf32>
    %909 = tpu.matmul %305, %908, %cst_572 {dimension_numbers = #tpu.dot_dimension_numbers<[1], [0], [0], [1], [0, 0, 1, 1], [], []>} : vector<8x32xbf16>, vector<32x32xbf16>, vector<8x32xf32> -> vector<8x32xf32>
    %910 = arith.addf %906, %909 : vector<8x32xf32>
    %c3_573 = arith.constant 3 : index
    %c0_574 = arith.constant 0 : index
    %c0_575 = arith.constant 0 : index
    %911 = vector.load %arg4[%c3_573, %c0_574, %c0_575] : memref<9x32x32xbf16, #tpu.memory_space<vmem>>, vector<1x32x32xbf16>
    %912 = vector.shape_cast %911 : vector<1x32x32xbf16> to vector<32x32xbf16>
    %cst_576 = arith.constant dense<0.000000e+00> : vector<8x32xf32>
    %913 = tpu.matmul %308, %912, %cst_576 {dimension_numbers = #tpu.dot_dimension_numbers<[1], [0], [0], [1], [0, 0, 1, 1], [], []>} : vector<8x32xbf16>, vector<32x32xbf16>, vector<8x32xf32> -> vector<8x32xf32>
    %914 = arith.addf %910, %913 : vector<8x32xf32>
    %c4_577 = arith.constant 4 : index
    %c0_578 = arith.constant 0 : index
    %c0_579 = arith.constant 0 : index
    %915 = vector.load %arg4[%c4_577, %c0_578, %c0_579] : memref<9x32x32xbf16, #tpu.memory_space<vmem>>, vector<1x32x32xbf16>
    %916 = vector.shape_cast %915 : vector<1x32x32xbf16> to vector<32x32xbf16>
    %cst_580 = arith.constant dense<0.000000e+00> : vector<8x32xf32>
    %917 = tpu.matmul %309, %916, %cst_580 {dimension_numbers = #tpu.dot_dimension_numbers<[1], [0], [0], [1], [0, 0, 1, 1], [], []>} : vector<8x32xbf16>, vector<32x32xbf16>, vector<8x32xf32> -> vector<8x32xf32>
    %918 = arith.addf %914, %917 : vector<8x32xf32>
    %919 = vector.broadcast %3 : vector<1x32xf32> to vector<8x32xf32>
    %920 = arith.addf %918, %919 : vector<8x32xf32>
    %cst_581 = arith.constant 2.000000e-01 : f32
    %921 = vector.broadcast %cst_581 : f32 to vector<8x32xf32>
    %922 = arith.mulf %921, %920 : vector<8x32xf32>
    %923 = arith.maximumf %920, %922 : vector<8x32xf32>
    %924 = arith.mulf %923, %923 : vector<8x32xf32>
    %cst_582 = arith.constant dense<0.000000e+00> : vector<8xf32>
    %925 = vector.multi_reduction <add>, %924, %cst_582 [1] : vector<8x32xf32> to vector<8xf32>
    %926 = vector.shape_cast %925 : vector<8xf32> to vector<8x1xf32>
    %cst_583 = arith.constant 3.200000e+01 : f32
    %927 = vector.broadcast %cst_583 : f32 to vector<8x1xf32>
    %928 = arith.divf %926, %927 : vector<8x1xf32>
    %cst_584 = arith.constant 9.99999993E-9 : f32
    %929 = vector.broadcast %cst_584 : f32 to vector<8x1xf32>
    %930 = arith.addf %928, %929 : vector<8x1xf32>
    %931 = math.rsqrt %930 : vector<8x1xf32>
    %932 = vector.broadcast %931 : vector<8x1xf32> to vector<8x32xf32>
    %933 = arith.mulf %923, %932 : vector<8x32xf32>
    %934 = arith.truncf %339 : vector<8x32xf32> to vector<8x32xbf16>
    %cst_585 = arith.constant dense<0.000000e+00> : vector<8x8xf32>
    %935 = tpu.matmul %934, %4, %cst_585 {dimension_numbers = #tpu.dot_dimension_numbers<[1], [0], [0], [1], [0, 0, 1, 1], [], []>} : vector<8x32xbf16>, vector<32x8xbf16>, vector<8x8xf32> -> vector<8x8xf32>
    %936 = vector.broadcast %5 : vector<1x8xf32> to vector<8x8xf32>
    %937 = arith.addf %935, %936 : vector<8x8xf32>
    %938 = arith.truncf %377 : vector<8x32xf32> to vector<8x32xbf16>
    %cst_586 = arith.constant dense<0.000000e+00> : vector<8x8xf32>
    %939 = tpu.matmul %938, %4, %cst_586 {dimension_numbers = #tpu.dot_dimension_numbers<[1], [0], [0], [1], [0, 0, 1, 1], [], []>} : vector<8x32xbf16>, vector<32x8xbf16>, vector<8x8xf32> -> vector<8x8xf32>
    %940 = vector.broadcast %5 : vector<1x8xf32> to vector<8x8xf32>
    %941 = arith.addf %939, %940 : vector<8x8xf32>
    %942 = arith.truncf %415 : vector<8x32xf32> to vector<8x32xbf16>
    %cst_587 = arith.constant dense<0.000000e+00> : vector<8x8xf32>
    %943 = tpu.matmul %942, %4, %cst_587 {dimension_numbers = #tpu.dot_dimension_numbers<[1], [0], [0], [1], [0, 0, 1, 1], [], []>} : vector<8x32xbf16>, vector<32x8xbf16>, vector<8x8xf32> -> vector<8x8xf32>
    %944 = vector.broadcast %5 : vector<1x8xf32> to vector<8x8xf32>
    %945 = arith.addf %943, %944 : vector<8x8xf32>
    %946 = arith.truncf %445 : vector<8x32xf32> to vector<8x32xbf16>
    %cst_588 = arith.constant dense<0.000000e+00> : vector<8x8xf32>
    %947 = tpu.matmul %946, %4, %cst_588 {dimension_numbers = #tpu.dot_dimension_numbers<[1], [0], [0], [1], [0, 0, 1, 1], [], []>} : vector<8x32xbf16>, vector<32x8xbf16>, vector<8x8xf32> -> vector<8x8xf32>
    %948 = vector.broadcast %5 : vector<1x8xf32> to vector<8x8xf32>
    %949 = arith.addf %947, %948 : vector<8x8xf32>
    %950 = arith.truncf %483 : vector<8x32xf32> to vector<8x32xbf16>
    %cst_589 = arith.constant dense<0.000000e+00> : vector<8x8xf32>
    %951 = tpu.matmul %950, %4, %cst_589 {dimension_numbers = #tpu.dot_dimension_numbers<[1], [0], [0], [1], [0, 0, 1, 1], [], []>} : vector<8x32xbf16>, vector<32x8xbf16>, vector<8x8xf32> -> vector<8x8xf32>
    %952 = vector.broadcast %5 : vector<1x8xf32> to vector<8x8xf32>
    %953 = arith.addf %951, %952 : vector<8x8xf32>
    %954 = arith.truncf %533 : vector<8x32xf32> to vector<8x32xbf16>
    %cst_590 = arith.constant dense<0.000000e+00> : vector<8x8xf32>
    %955 = tpu.matmul %954, %4, %cst_590 {dimension_numbers = #tpu.dot_dimension_numbers<[1], [0], [0], [1], [0, 0, 1, 1], [], []>} : vector<8x32xbf16>, vector<32x8xbf16>, vector<8x8xf32> -> vector<8x8xf32>
    %956 = vector.broadcast %5 : vector<1x8xf32> to vector<8x8xf32>
    %957 = arith.addf %955, %956 : vector<8x8xf32>
    %958 = arith.truncf %583 : vector<8x32xf32> to vector<8x32xbf16>
    %cst_591 = arith.constant dense<0.000000e+00> : vector<8x8xf32>
    %959 = tpu.matmul %958, %4, %cst_591 {dimension_numbers = #tpu.dot_dimension_numbers<[1], [0], [0], [1], [0, 0, 1, 1], [], []>} : vector<8x32xbf16>, vector<32x8xbf16>, vector<8x8xf32> -> vector<8x8xf32>
    %960 = vector.broadcast %5 : vector<1x8xf32> to vector<8x8xf32>
    %961 = arith.addf %959, %960 : vector<8x8xf32>
    %962 = arith.truncf %621 : vector<8x32xf32> to vector<8x32xbf16>
    %cst_592 = arith.constant dense<0.000000e+00> : vector<8x8xf32>
    %963 = tpu.matmul %962, %4, %cst_592 {dimension_numbers = #tpu.dot_dimension_numbers<[1], [0], [0], [1], [0, 0, 1, 1], [], []>} : vector<8x32xbf16>, vector<32x8xbf16>, vector<8x8xf32> -> vector<8x8xf32>
    %964 = vector.broadcast %5 : vector<1x8xf32> to vector<8x8xf32>
    %965 = arith.addf %963, %964 : vector<8x8xf32>
    %966 = arith.truncf %659 : vector<8x32xf32> to vector<8x32xbf16>
    %cst_593 = arith.constant dense<0.000000e+00> : vector<8x8xf32>
    %967 = tpu.matmul %966, %4, %cst_593 {dimension_numbers = #tpu.dot_dimension_numbers<[1], [0], [0], [1], [0, 0, 1, 1], [], []>} : vector<8x32xbf16>, vector<32x8xbf16>, vector<8x8xf32> -> vector<8x8xf32>
    %968 = vector.broadcast %5 : vector<1x8xf32> to vector<8x8xf32>
    %969 = arith.addf %967, %968 : vector<8x8xf32>
    %970 = arith.truncf %709 : vector<8x32xf32> to vector<8x32xbf16>
    %cst_594 = arith.constant dense<0.000000e+00> : vector<8x8xf32>
    %971 = tpu.matmul %970, %4, %cst_594 {dimension_numbers = #tpu.dot_dimension_numbers<[1], [0], [0], [1], [0, 0, 1, 1], [], []>} : vector<8x32xbf16>, vector<32x8xbf16>, vector<8x8xf32> -> vector<8x8xf32>
    %972 = vector.broadcast %5 : vector<1x8xf32> to vector<8x8xf32>
    %973 = arith.addf %971, %972 : vector<8x8xf32>
    %974 = arith.truncf %759 : vector<8x32xf32> to vector<8x32xbf16>
    %cst_595 = arith.constant dense<0.000000e+00> : vector<8x8xf32>
    %975 = tpu.matmul %974, %4, %cst_595 {dimension_numbers = #tpu.dot_dimension_numbers<[1], [0], [0], [1], [0, 0, 1, 1], [], []>} : vector<8x32xbf16>, vector<32x8xbf16>, vector<8x8xf32> -> vector<8x8xf32>
    %976 = vector.broadcast %5 : vector<1x8xf32> to vector<8x8xf32>
    %977 = arith.addf %975, %976 : vector<8x8xf32>
    %978 = arith.truncf %797 : vector<8x32xf32> to vector<8x32xbf16>
    %cst_596 = arith.constant dense<0.000000e+00> : vector<8x8xf32>
    %979 = tpu.matmul %978, %4, %cst_596 {dimension_numbers = #tpu.dot_dimension_numbers<[1], [0], [0], [1], [0, 0, 1, 1], [], []>} : vector<8x32xbf16>, vector<32x8xbf16>, vector<8x8xf32> -> vector<8x8xf32>
    %980 = vector.broadcast %5 : vector<1x8xf32> to vector<8x8xf32>
    %981 = arith.addf %979, %980 : vector<8x8xf32>
    %982 = arith.truncf %827 : vector<8x32xf32> to vector<8x32xbf16>
    %cst_597 = arith.constant dense<0.000000e+00> : vector<8x8xf32>
    %983 = tpu.matmul %982, %4, %cst_597 {dimension_numbers = #tpu.dot_dimension_numbers<[1], [0], [0], [1], [0, 0, 1, 1], [], []>} : vector<8x32xbf16>, vector<32x8xbf16>, vector<8x8xf32> -> vector<8x8xf32>
    %984 = vector.broadcast %5 : vector<1x8xf32> to vector<8x8xf32>
    %985 = arith.addf %983, %984 : vector<8x8xf32>
    %986 = arith.truncf %865 : vector<8x32xf32> to vector<8x32xbf16>
    %cst_598 = arith.constant dense<0.000000e+00> : vector<8x8xf32>
    %987 = tpu.matmul %986, %4, %cst_598 {dimension_numbers = #tpu.dot_dimension_numbers<[1], [0], [0], [1], [0, 0, 1, 1], [], []>} : vector<8x32xbf16>, vector<32x8xbf16>, vector<8x8xf32> -> vector<8x8xf32>
    %988 = vector.broadcast %5 : vector<1x8xf32> to vector<8x8xf32>
    %989 = arith.addf %987, %988 : vector<8x8xf32>
    %990 = arith.truncf %903 : vector<8x32xf32> to vector<8x32xbf16>
    %cst_599 = arith.constant dense<0.000000e+00> : vector<8x8xf32>
    %991 = tpu.matmul %990, %4, %cst_599 {dimension_numbers = #tpu.dot_dimension_numbers<[1], [0], [0], [1], [0, 0, 1, 1], [], []>} : vector<8x32xbf16>, vector<32x8xbf16>, vector<8x8xf32> -> vector<8x8xf32>
    %992 = vector.broadcast %5 : vector<1x8xf32> to vector<8x8xf32>
    %993 = arith.addf %991, %992 : vector<8x8xf32>
    %994 = arith.truncf %933 : vector<8x32xf32> to vector<8x32xbf16>
    %cst_600 = arith.constant dense<0.000000e+00> : vector<8x8xf32>
    %995 = tpu.matmul %994, %4, %cst_600 {dimension_numbers = #tpu.dot_dimension_numbers<[1], [0], [0], [1], [0, 0, 1, 1], [], []>} : vector<8x32xbf16>, vector<32x8xbf16>, vector<8x8xf32> -> vector<8x8xf32>
    %996 = vector.broadcast %5 : vector<1x8xf32> to vector<8x8xf32>
    %997 = arith.addf %995, %996 : vector<8x8xf32>
    %998 = tpu.concatenate %937, %941, %945, %949, %953, %957, %961, %965, %969, %973, %977, %981, %985, %989, %993, %997 in 1 : vector<8x8xf32>, vector<8x8xf32>, vector<8x8xf32>, vector<8x8xf32>, vector<8x8xf32>, vector<8x8xf32>, vector<8x8xf32>, vector<8x8xf32>, vector<8x8xf32>, vector<8x8xf32>, vector<8x8xf32>, vector<8x8xf32>, vector<8x8xf32>, vector<8x8xf32>, vector<8x8xf32>, vector<8x8xf32> -> vector<8x128xf32>
    %c0_601 = arith.constant 0 : index
    %c0_602 = arith.constant 0 : index
    %999 = vector.load %arg8[%c0_601, %c0_602] : memref<8x128xf32, #tpu.memory_space<vmem>>, vector<8x128xf32>
    tpu.vector_store %arg8[%c0_601, %c0_602], %998 {strides = array<i32>} : memref<8x128xf32, #tpu.memory_space<vmem>>, vector<8x128xf32>,
    return
  }
  func.func @transform_0(%arg0: i32) -> (i32, i32) {
    %c0_i32 = arith.constant 0 : i32
    %c0_i32_0 = arith.constant 0 : i32
    return %arg0, %c0_i32 : i32, i32
  }
  func.func @transform_1(%arg0: i32) -> (i32, i32, i32) {
    %c0_i32 = arith.constant 0 : i32
    %c0_i32_0 = arith.constant 0 : i32
    %c0_i32_1 = arith.constant 0 : i32
    %c0_i32_2 = arith.constant 0 : i32
    return %c0_i32, %c0_i32_0, %c0_i32_1 : i32, i32, i32
  }
  func.func @transform_2(%arg0: i32) -> (i32, i32) {
    %c0_i32 = arith.constant 0 : i32
    %c0_i32_0 = arith.constant 0 : i32
    %c0_i32_1 = arith.constant 0 : i32
    return %c0_i32, %c0_i32_0 : i32, i32
  }
  func.func @transform_3(%arg0: i32) -> (i32, i32, i32) {
    %c0_i32 = arith.constant 0 : i32
    %c0_i32_0 = arith.constant 0 : i32
    %c0_i32_1 = arith.constant 0 : i32
    %c0_i32_2 = arith.constant 0 : i32
    return %c0_i32, %c0_i32_0, %c0_i32_1 : i32, i32, i32
  }
  func.func @transform_4(%arg0: i32) -> (i32, i32) {
    %c0_i32 = arith.constant 0 : i32
    %c0_i32_0 = arith.constant 0 : i32
    %c0_i32_1 = arith.constant 0 : i32
    return %c0_i32, %c0_i32_0 : i32, i32
  }
  func.func @transform_5(%arg0: i32) -> (i32, i32) {
    %c0_i32 = arith.constant 0 : i32
    %c0_i32_0 = arith.constant 0 : i32
    %c0_i32_1 = arith.constant 0 : i32
    return %c0_i32, %c0_i32_0 : i32, i32
  }
  func.func @transform_6(%arg0: i32) -> (i32, i32) {
    %c0_i32 = arith.constant 0 : i32
    %c0_i32_0 = arith.constant 0 : i32
    %c0_i32_1 = arith.constant 0 : i32
    return %c0_i32, %c0_i32_0 : i32, i32
  }
  func.func @transform_7(%arg0: i32) -> (i32, i32) {
    %c0_i32 = arith.constant 0 : i32
    %c0_i32_0 = arith.constant 0 : i32
    return %arg0, %c0_i32 : i32, i32
  }
}

</mosaic_0001>

<bundles_post_ra>
// kernel: _generator_forward.1
= control target key start
LH: loop header
LB: loop body
LE: loop exit
PB: predicated region body
PF: predicated region fallthrough
CT: control target
= control target key end

     0   :  { %12 = vsyncpa [#allocation3], 0  ;;  %s9757_s0 = inlined_call_operand.vmem [shape: f32[8,32], index: 0, kind: input, shape index: {}]   ;;  %s9758_s1 = inlined_call_operand.hbm [shape: bf16[16,32,32], index: 1, kind: input, shape index: {}]   ;;  %s9759_s2 = inlined_call_operand.vmem [shape: f32[1,32], index: 2, kind: input, shape index: {}]   ;;  %s9760_s3 = inlined_call_operand.hbm [shape: bf16[9,32,32], index: 3, kind: input, shape index: {}]   ;;  %s9761_s4 = inlined_call_operand.vmem [shape: f32[1,32], index: 4, kind: input, shape index: {}]   ;;  %s9762_s5 = inlined_call_operand.vmem [shape: bf16[32,8], index: 5, kind: input, shape index: {}]   ;;  %s9763_s6 = inlined_call_operand.vmem [shape: f32[1,8], index: 6, kind: input, shape index: {}]   ;;  %s9764_s7 = inlined_call_operand.vmem [shape: f32[8,128], index: 7, kind: output, shape index: {}]  }
   0x1   :  { %13 = vsyncpa [#allocation5], 0  ;;  %s8274_s24 = smov [#allocation2]   ;;  %s8226_s28 = scalar_lea.hbm %s9758_s1, 4096 }
   0x2   :  { %s21_s25 = sshll.u32 %s8274_s24, 4  ;;  %p8227_p0 = scmp.ne.s32.totalorder %s9758_s1, %s8226_s28  ;;  %s22_s25 = int_to_ptr.vmem [resolvable:$true] %s21_s25 }
   0x3   :  { %p8230_p1 = scmp.lt.u32.totalorder %s8226_s28, %s9758_s1 }
   0x5   :  { %p8232_p2 = pnand %p8230_p1, %p8227_p0 }
   0x7   :  { %8235 = shalt.err (!%p8232_p2)
}
   0x8   :  { %s8236_s10 = scalar_lea.vmem %s22_s25, 4096  ;;  %p8241_p4 = scmp.lt.s32.totalorder %s22_s25, %s22_s25 }
   0x9   :  { %p8237_p3 = scmp.ne.s32.totalorder %s22_s25, %s8236_s10  ;;  %p8242_p5 = scmp.lt.s32.totalorder %s8236_s10, %s8236_s10 }
   0xb   :  { %p8243_p6 = por %p8242_p5, %p8241_p4 }
   0xd   :  { %p8244_p7 = pnand %p8243_p6, %p8237_p3 }
   0xf   :  { %8247 = shalt.err (!%p8244_p7)
}
  0x10   :  { %s8275_s11 = smov 64   ;;  %s8276_s12 = smov 4  }
  0x11   :  { %27 = dma.hbm_to_vmem [thread:$0]  %s9758_s1, 4096, %s22_s25, [#allocation3], %s8275_s11, %s8275_s11, %s8276_s12  }
  0x12   :  { %s8277_s15 = smov [#allocation4]   ;;  %s8248_s19 = scalar_lea.hbm %s9760_s3, 2304 }
  0x13   :  { %s35_s16 = sshll.u32 %s8277_s15, 4  ;;  %p8249_p8 = scmp.ne.s32.totalorder %s9760_s3, %s8248_s19  ;;  %s36_s16 = int_to_ptr.vmem [resolvable:$true] %s35_s16 }
  0x14   :  { %p8252_p9 = scmp.lt.u32.totalorder %s8248_s19, %s9760_s3 }
  0x16   :  { %p8254_p10 = pnand %p8252_p9, %p8249_p8 }
  0x18   :  { %8257 = shalt.err (!%p8254_p10)
}
  0x19   :  { %s8258_s24 = scalar_lea.vmem %s36_s16, 2304  ;;  %p8263_p12 = scmp.lt.s32.totalorder %s36_s16, %s36_s16 }
  0x1a   :  { %p8259_p11 = scmp.ne.s32.totalorder %s36_s16, %s8258_s24  ;;  %p8264_p13 = scmp.lt.s32.totalorder %s8258_s24, %s8258_s24 }
  0x1c   :  { %p8265_p0 = por %p8264_p13, %p8263_p12 }
  0x1e   :  { %p8266_p1 = pnand %p8265_p0, %p8259_p11 }
  0x20   :  { %8269 = shalt.err (!%p8266_p1)
}
  0x21   :  { %41 = dma.hbm_to_vmem [thread:$0]  %s9760_s3, 2304, %s36_s16, [#allocation5], %s8275_s11, %s8275_s11, %s8276_s12  }
  0x22   :  { %8270 = dma.done.wait [#allocation3], 4096  }
  0x23   :  { %8271 = vsyncadd [#allocation3], 4294963200 }
  0x24   :  { %8272 = dma.done.wait [#allocation5], 2304  }
  0x25   :  { %8273 = vsyncadd [#allocation5], 4294964992  ;;  %v8278_v0 = vmov 0.0   ;;  %vm8279_vm0 = vmmov 0   ;;  %v8089_v1 = vld [vmem:[#allocation2] sm:$0xff]   ;;  %v8090_v2 = vld [vmem:[#allocation2 + $0x10] sm:$0xff]  }
  0x26   :  { %7013 = vmatprep.subr.bf16.mxu0 %v8278_v0  ;;  %7021 = vmatprep.subr.bf16.mxu1 %v8278_v0  ;;  %v8091_v3 = vld [vmem:[#allocation2 + $0x8] sm:$0xff]   ;;  %v8092_v4 = vld [vmem:[#allocation2 + $0x18] sm:$0xff]   ;;  %v55_v5 = vld [vmem:[%s9757_s0] sm:$0xff]  ;;  %vm86_vm1 = vcmask 261120   ;;  %s8280_s14 = smov 8   ;;  %s8282_s15 = smov 24  }
  0x27   :  { %7017 = vmatprep.mubr.msk.bf16.mxu0 %vm8279_vm0, %v8278_v0  ;;  %7025 = vmatprep.mubr.msk.bf16.mxu1 %vm8279_vm0, %v8278_v0  ;;  %v8373_v6 = vpack.c.bf16 %v55_v5, %v55_v5  ;;  %v8093_v7 = vld [vmem:[#allocation2 + $0x20] sm:$0xff]   ;;  %v8094_v8 = vld [vmem:[#allocation2 + $0x30] sm:$0xff]   ;;  %v8095_v9 = vld [vmem:[#allocation2 + $0x28] sm:$0xff]   ;;  %s8283_s16 = smov 32   ;;  %s8285_s21 = smov 48   ;;  %vm6394_vm2 = vcmask 64512  }
  0x28   :  { %7014 = vmatpush3.bf16.msra.mxu0 %v8089_v1  ;;  %7022 = vmatpush3.bf16.msra.mxu1 %v8090_v2  ;;  %v8096_v10 = vld [vmem:[#allocation2 + $0x38] sm:$0xff]   ;;  %v8097_v11 = vld [vmem:[#allocation2 + $0x40] sm:$0xff]   ;;  %v8098_v12 = vld [vmem:[#allocation2 + $0x50] sm:$0xff]   ;;  %s8286_s22 = smov 56   ;;  %s8287_s23 = smov 72   ;;  %vm6396_vm3 = vcmask 130048  }
  0x29   :  { %7015 = vmatprep.subr.bf16.mxu0 %v8278_v0  ;;  %7023 = vmatprep.subr.bf16.mxu1 %v8278_v0  ;;  %v8099_v13 = vld [vmem:[#allocation2 + $0x48] sm:$0xff]   ;;  %v8100_v14 = vld [vmem:[#allocation2 + $0x58] sm:$0xff]   ;;  %v8101_v15 = vld [vmem:[#allocation2 + $0x60] sm:$0xff]   ;;  %s8288_s24 = smov 80   ;;  %s8290_s1 = smov 96   ;;  %vm6398_vm4 = vcmask 195584  }
  0x2a   :  { %v8102_v16 = vld [vmem:[#allocation2 + $0x70] sm:$0xff]   ;;  %v8103_v17 = vld [vmem:[#allocation2 + $0x68] sm:$0xff]   ;;  %v8104_v18 = vld [vmem:[#allocation2 + $0x78] sm:$0xff]   ;;  %s8291_s25 = smov 104   ;;  %s8292_s3 = smov 112   ;;  %vm6401_vm5 = vcmask 326656  }
  0x2b   :  { %v8105_v19 = vld [vmem:[#allocation2 + $0x80] sm:$0xff]   ;;  %v8106_v20 = vld [vmem:[#allocation2 + $0x90] sm:$0xff]   ;;  %v8107_v21 = vld [vmem:[#allocation2 + $0x88] sm:$0xff]   ;;  %s8293_s26 = smov 120   ;;  %vm6403_vm6 = vcmask 392192   ;;  %vm6405_vm7 = vcmask 457728  }
  0x2c   :  { %7016 = vmatpush3.bf16.msra.mxu0 %v8091_v3  ;;  %7024 = vmatpush3.bf16.msra.mxu1 %v8092_v4  ;;  %v8108_v22 = vld [vmem:[#allocation2 + $0x98] sm:$0xff]   ;;  %v8109_v23 = vld [vmem:[#allocation2 + $0xa0] sm:$0xff]   ;;  %v8110_v24 = vld [vmem:[#allocation2 + $0xb0] sm:$0xff]   ;;  %vm6407_vm8 = vcmask 523264   ;;  %vm6409_vm9 = vcmask 588800   ;;  %vm6411_vm10 = vcmask 654336  }
  0x2d   :  { %7029 = vmatprep.subr.bf16.mxu0 %v8278_v0  ;;  %7037 = vmatprep.subr.bf16.mxu1 %v8278_v0  ;;  %v8111_v25 = vld [vmem:[#allocation2 + $0xa8] sm:$0xff]   ;;  %v8112_v26 = vld [vmem:[#allocation2 + $0xb8] sm:$0xff]   ;;  %v8113_v27 = vld [vmem:[#allocation2 + $0xc0] sm:$0xff]   ;;  %vm6413_vm11 = vcmask 719872   ;;  %vm6415_vm12 = vcmask 785408   ;;  %vm6417_vm13 = vcmask 850944  }
  0x2e   :  { %v8114_v28 = vld [vmem:[#allocation2 + $0xd0] sm:$0xff]   ;;  %v8115_v29 = vld [vmem:[#allocation2 + $0xc8] sm:$0xff]   ;;  %v8116_v30 = vld [vmem:[#allocation2 + $0xd8] sm:$0xff]   ;;  %vm6419_vm14 = vcmask 916480   ;;  %vm6421_vm15 = vcmask 982016  }
  0x2f   :  { %7018 = vmatmul.mubr.msk.bf16.vlgmr.msra.gmra.mrb[0].mxu0 %vm86_vm1, %v8373_v6  ;;  %7026 = vmatmul.mubr.msk.bf16.vlgmr.msra.gmra.mrb[0].mxu1 %vm86_vm1, %v8373_v6  ;;  %v8117_v31 = vld [vmem:[#allocation2 + $0xe0] sm:$0xff]   ;;  %v8119_v32 = vld [vmem:[#allocation2 + $0xf0] sm:$0xff]   ;;  %v8118_v33 = vld [vmem:[#allocation2 + $0xe8] sm:$0xff]  }
  0x30   :  { %7030 = vmatpush3.bf16.msra.mxu0 %v8093_v7  ;;  %7038 = vmatpush3.bf16.msra.mxu1 %v8094_v8  ;;  %v8120_v34 = vld [vmem:[#allocation2 + $0xf8] sm:$0xff]   ;;  %v8472_v35 = vld [vmem:[%s9759_s2] ss:$0 sm:$0xff] }
  0x31   :  { %7031 = vmatprep.subr.bf16.mxu0 %v8278_v0  ;;  %7039 = vmatprep.subr.bf16.mxu1 %v8278_v0 }
  0x32   :  { %7033 = vmatprep.mubr.msk.bf16.mxu0 %vm8279_vm0, %v8278_v0  ;;  %7041 = vmatprep.mubr.msk.bf16.mxu1 %vm8279_vm0, %v8278_v0 }
  0x34   :  { %7032 = vmatpush3.bf16.msra.mxu0 %v8095_v9  ;;  %7040 = vmatpush3.bf16.msra.mxu1 %v8096_v10 }
  0x35   :  { %7045 = vmatprep.subr.bf16.mxu0 %v8278_v0  ;;  %7053 = vmatprep.subr.bf16.mxu1 %v8278_v0 }
  0x37   :  { %7034 = vmatmul.mubr.msk.bf16.vlgmr.msra.gmra.mrb[4].mxu0 %vm86_vm1, %v8373_v6  ;;  %7042 = vmatmul.mubr.msk.bf16.vlgmr.msra.gmra.mrb[4].mxu1 %vm86_vm1, %v8373_v6 }
  0x38   :  { %7046 = vmatpush3.bf16.msra.mxu0 %v8097_v11  ;;  %7054 = vmatpush3.bf16.msra.mxu1 %v8098_v12 }
  0x39   :  { %7047 = vmatprep.subr.bf16.mxu0 %v8278_v0  ;;  %7055 = vmatprep.subr.bf16.mxu1 %v8278_v0 }
  0x3a   :  { %7049 = vmatprep.mubr.msk.bf16.mxu0 %vm8279_vm0, %v8278_v0  ;;  %7057 = vmatprep.mubr.msk.bf16.mxu1 %vm8279_vm0, %v8278_v0 }
  0x3c   :  { %7048 = vmatpush3.bf16.msra.mxu0 %v8099_v13  ;;  %7056 = vmatpush3.bf16.msra.mxu1 %v8100_v14 }
  0x3d   :  { %7061 = vmatprep.subr.bf16.mxu0 %v8278_v0  ;;  %7069 = vmatprep.subr.bf16.mxu1 %v8278_v0 }
  0x3f   :  { %7050 = vmatmul.mubr.msk.bf16.vlgmr.msra.gmra.mrb[8].mxu0 %vm86_vm1, %v8373_v6  ;;  %7058 = vmatmul.mubr.msk.bf16.vlgmr.msra.gmra.mrb[8].mxu1 %vm86_vm1, %v8373_v6 }
  0x40   :  { %7062 = vmatpush3.bf16.msra.mxu0 %v8101_v15  ;;  %7070 = vmatpush3.bf16.msra.mxu1 %v8102_v16 }
  0x41   :  { %7063 = vmatprep.subr.bf16.mxu0 %v8278_v0  ;;  %7071 = vmatprep.subr.bf16.mxu1 %v8278_v0 }
  0x42   :  { %7065 = vmatprep.mubr.msk.bf16.mxu0 %vm8279_vm0, %v8278_v0  ;;  %7073 = vmatprep.mubr.msk.bf16.mxu1 %vm8279_vm0, %v8278_v0 }
  0x44   :  { %7064 = vmatpush3.bf16.msra.mxu0 %v8103_v17  ;;  %7072 = vmatpush3.bf16.msra.mxu1 %v8104_v18 }
  0x45   :  { %7077 = vmatprep.subr.bf16.mxu0 %v8278_v0  ;;  %7085 = vmatprep.subr.bf16.mxu1 %v8278_v0 }
  0x47   :  { %7066 = vmatmul.mubr.msk.bf16.vlgmr.msra.gmra.mrb[12].mxu0 %vm86_vm1, %v8373_v6  ;;  %7074 = vmatmul.mubr.msk.bf16.vlgmr.msra.gmra.mrb[12].mxu1 %vm86_vm1, %v8373_v6 }
  0x48   :  { %7078 = vmatpush3.bf16.msra.mxu0 %v8105_v19  ;;  %7086 = vmatpush3.bf16.msra.mxu1 %v8106_v20 }
  0x49   :  { %7079 = vmatprep.subr.bf16.mxu0 %v8278_v0  ;;  %7087 = vmatprep.subr.bf16.mxu1 %v8278_v0 }
  0x4a   :  { %7081 = vmatprep.mubr.msk.bf16.mxu0 %vm8279_vm0, %v8278_v0  ;;  %7089 = vmatprep.mubr.msk.bf16.mxu1 %vm8279_vm0, %v8278_v0 }
  0x4c   :  { %7080 = vmatpush3.bf16.msra.mxu0 %v8107_v21  ;;  %7088 = vmatpush3.bf16.msra.mxu1 %v8108_v22 }
  0x4d   :  { %7093 = vmatprep.subr.bf16.mxu0 %v8278_v0  ;;  %7101 = vmatprep.subr.bf16.mxu1 %v8278_v0 }
  0x4f   :  { %7082 = vmatmul.mubr.msk.bf16.vlgmr.msra.gmra.mrb[16].mxu0 %vm86_vm1, %v8373_v6  ;;  %7090 = vmatmul.mubr.msk.bf16.vlgmr.msra.gmra.mrb[16].mxu1 %vm86_vm1, %v8373_v6 }
  0x50   :  { %7094 = vmatpush3.bf16.msra.mxu0 %v8109_v23  ;;  %7102 = vmatpush3.bf16.msra.mxu1 %v8110_v24 }
  0x51   :  { %7095 = vmatprep.subr.bf16.mxu0 %v8278_v0  ;;  %7103 = vmatprep.subr.bf16.mxu1 %v8278_v0 }
  0x52   :  { %7097 = vmatprep.mubr.msk.bf16.mxu0 %vm8279_vm0, %v8278_v0  ;;  %7105 = vmatprep.mubr.msk.bf16.mxu1 %vm8279_vm0, %v8278_v0 }
  0x54   :  { %7096 = vmatpush3.bf16.msra.mxu0 %v8111_v25  ;;  %7104 = vmatpush3.bf16.msra.mxu1 %v8112_v26 }
  0x55   :  { %7109 = vmatprep.subr.bf16.mxu0 %v8278_v0  ;;  %7117 = vmatprep.subr.bf16.mxu1 %v8278_v0 }
  0x57   :  { %7098 = vmatmul.mubr.msk.bf16.vlgmr.msra.gmra.mrb[20].mxu0 %vm86_vm1, %v8373_v6  ;;  %7106 = vmatmul.mubr.msk.bf16.vlgmr.msra.gmra.mrb[20].mxu1 %vm86_vm1, %v8373_v6 }
  0x58   :  { %7110 = vmatpush3.bf16.msra.mxu0 %v8113_v27  ;;  %7118 = vmatpush3.bf16.msra.mxu1 %v8114_v28 }
  0x59   :  { %7111 = vmatprep.subr.bf16.mxu0 %v8278_v0  ;;  %7119 = vmatprep.subr.bf16.mxu1 %v8278_v0 }
  0x5a   :  { %7113 = vmatprep.mubr.msk.bf16.mxu0 %vm8279_vm0, %v8278_v0  ;;  %7121 = vmatprep.mubr.msk.bf16.mxu1 %vm8279_vm0, %v8278_v0 }
  0x5c   :  { %7112 = vmatpush3.bf16.msra.mxu0 %v8115_v29  ;;  %7120 = vmatpush3.bf16.msra.mxu1 %v8116_v30 }
  0x5d   :  { %7125 = vmatprep.subr.bf16.mxu0 %v8278_v0  ;;  %7133 = vmatprep.subr.bf16.mxu1 %v8278_v0 }
  0x5f   :  { %7114 = vmatmul.mubr.msk.bf16.vlgmr.msra.gmra.mrb[24].mxu0 %vm86_vm1, %v8373_v6  ;;  %7122 = vmatmul.mubr.msk.bf16.vlgmr.msra.gmra.mrb[24].mxu1 %vm86_vm1, %v8373_v6 }
  0x60   :  { %7126 = vmatpush3.bf16.msra.mxu0 %v8117_v31  ;;  %7129 = vmatprep.mubr.msk.bf16.mxu0 %vm8279_vm0, %v8278_v0 }
  0x61   :  { %7127 = vmatprep.subr.bf16.mxu0 %v8278_v0  ;;  %7134 = vmatpush3.bf16.msra.mxu1 %v8119_v32 }
  0x62   :  { %7137 = vmatprep.mubr.msk.bf16.mxu1 %vm8279_vm0, %v8278_v0  ;;  %7135 = vmatprep.subr.bf16.mxu1 %v8278_v0 }
  0x64   :  { %7128 = vmatpush3.bf16.msra.mxu0 %v8118_v33 }
  0x65   :  { %7141 = vmatprep.subr.bf16.mxu0 %v8278_v0  ;;  %7136 = vmatpush3.bf16.msra.mxu1 %v8120_v34 }
  0x66   :  { %7149 = vmatprep.subr.bf16.mxu1 %v8278_v0 }
  0x67   :  { %7130 = vmatmul.mubr.msk.bf16.vlgmr.msra.gmra.mrb[28].mxu0 %vm86_vm1, %v8373_v6 }
  0x68   :  { %7145 = vmatprep.mubr.msk.bf16.mxu0 %vm8279_vm0, %v8278_v0  ;;  %7138 = vmatmul.mubr.msk.bf16.vlgmr.msra.gmra.mrb[28].mxu1 %vm86_vm1, %v8373_v6 }
  0x69   :  { %7153 = vmatprep.mubr.msk.bf16.mxu1 %vm8279_vm0, %v8278_v0 }
 0x102   :  { %v124_v36 = vpop.f32.mrb[0].mxu0  ;;  %v192_v38 = vpop.f32.mrb[0].mxu1 }
 0x103   :  { %v125_v37 = vadd.f32 %v8472_v35, %v124_v36  ;;  %v7019_v39 = vpop.f32.mrb[1].mxu0  ;;  %v193_v40 = vadd.f32 %v8472_v35, %v192_v38  ;;  %v7027_v42 = vpop.f32.mrb[1].mxu1 }
 0x104   :  { %v127_v41 = vpop.f32.mrb[2].mxu0  ;;  %v195_v45 = vpop.f32.mrb[2].mxu1 }
 0x105   :  { %v130_v43 = vmul.f32 0.2, %v125_v37  ;;  %v7020_v44 = vpop.f32.mrb[3].mxu0  ;;  %v198_v46 = vmul.f32 0.2, %v193_v40  ;;  %v7028_v47 = vpop.f32.mrb[3].mxu1 }
 0x107   :  { %v8476_v48 = vmax.f32 %v193_v40, %v198_v46  ;;  %v8478_v49 = vmax.f32 %v125_v37, %v130_v43 }
 0x109   :  { %v200_v51 = vmul.f32 %v8476_v48, %v8476_v48  ;;  %v132_v59 = vmul.f32 %v8478_v49, %v8478_v49 }
 0x10a   :  { %v259_v50 = vpop.f32.mrb[4].mxu0  ;;  %v326_v54 = vpop.f32.mrb[4].mxu1 }
 0x10b   :  { %v260_v52 = vadd.f32 %v8472_v35, %v259_v50  ;;  %v7035_v53 = vpop.f32.mrb[5].mxu0  ;;  %v201_v55 = vsel %vm86_vm1, %v200_v51, 0.0  ;;  %v327_v57 = vadd.f32 %v8472_v35, %v326_v54  ;;  %v7043_v58 = vpop.f32.mrb[5].mxu1  ;;  %v133_v3 = vsel %vm86_vm1, %v132_v59, 0.0 }
 0x10c   :  { %v262_v56 = vpop.f32.mrb[6].mxu0  ;;  %202 = vadd.xlane.f32.xlu0 %v201_v55  ;;  %v329_v62 = vpop.f32.mrb[6].mxu1  ;;  %v8524_v58 = vld [vmem:[#allocation4 + $0x50] sm:$0xff]  }
 0x10d   :  { %v265_v60 = vmul.f32 0.2, %v260_v52  ;;  %v7036_v61 = vpop.f32.mrb[7].mxu0  ;;  %v332_v63 = vmul.f32 0.2, %v327_v57  ;;  %v7044_v1 = vpop.f32.mrb[7].mxu1  ;;  %7142 = vmatpush3.bf16.msra.mxu0 %v8524_v58 }
 0x10e   :  { %7143 = vmatprep.subr.bf16.mxu0 %v8278_v0  ;;  %v8534_v1 = vld [vmem:[#allocation4 + $0x58] sm:$0xff]  }
 0x10f   :  { %v8487_v2 = vmax.f32 %v260_v52, %v265_v60  ;;  %v8490_v4 = vmax.f32 %v327_v57, %v332_v63 }
 0x110   :  { %134 = vadd.xlane.f32.xlu0 %v133_v3  ;;  %v8536_v3 = vld [vmem:[#allocation4 + $0x40] sm:$0xff]  }
 0x111   :  { %v267_v5 = vmul.f32 %v8487_v2, %v8487_v2  ;;  %v334_v14 = vmul.f32 %v8490_v4, %v8490_v4  ;;  %7144 = vmatpush3.bf16.msra.mxu0 %v8534_v1  ;;  %7150 = vmatpush3.bf16.msra.mxu1 %v8536_v3 }
 0x112   :  { %v393_v6 = vpop.f32.mrb[8].mxu0  ;;  %v460_v9 = vpop.f32.mrb[8].mxu1  ;;  %7151 = vmatprep.subr.bf16.mxu1 %v8278_v0  ;;  %7157 = vmatprep.subr.bf16.mxu0 %v8278_v0 }
 0x113   :  { %v394_v7 = vadd.f32 %v8472_v35, %v393_v6  ;;  %v7051_v8 = vpop.f32.mrb[9].mxu0  ;;  %v268_v10 = vsel %vm86_vm1, %v267_v5, 0.0  ;;  %v461_v11 = vadd.f32 %v8472_v35, %v460_v9  ;;  %v7059_v13 = vpop.f32.mrb[9].mxu1  ;;  %v335_v22 = vsel %vm86_vm1, %v334_v14, 0.0 }
 0x114   :  { %v396_v12 = vpop.f32.mrb[10].mxu0  ;;  %269 = vadd.xlane.f32.xlu0 %v268_v10  ;;  %v463_v17 = vpop.f32.mrb[10].mxu1 }
 0x115   :  { %v399_v15 = vmul.f32 0.2, %v394_v7  ;;  %v7052_v16 = vpop.f32.mrb[11].mxu0  ;;  %v466_v18 = vmul.f32 0.2, %v461_v11  ;;  %v7060_v19 = vpop.f32.mrb[11].mxu1 }
 0x117   :  { %v8499_v20 = vmax.f32 %v394_v7, %v399_v15  ;;  %v8501_v21 = vmax.f32 %v461_v11, %v466_v18  ;;  %v8547_v18 = vld [vmem:[#allocation4 + $0x48] sm:$0xff]  }
 0x118   :  { %336 = vadd.xlane.f32.xlu0 %v335_v22  ;;  %7152 = vmatpush3.bf16.msra.mxu1 %v8547_v18 }
 0x119   :  { %v401_v23 = vmul.f32 %v8499_v20, %v8499_v20  ;;  %v468_v29 = vmul.f32 %v8501_v21, %v8501_v21  ;;  %7165 = vmatprep.subr.bf16.mxu1 %v8278_v0 }
 0x11a   :  { %v527_v24 = vpop.f32.mrb[12].mxu0  ;;  %v594_v27 = vpop.f32.mrb[12].mxu1 }
 0x11b   :  { %v528_v25 = vadd.f32 %v8472_v35, %v527_v24  ;;  %v402_v26 = vsel %vm86_vm1, %v401_v23, 0.0  ;;  %v7067_v28 = vpop.f32.mrb[13].mxu0  ;;  %v595_v30 = vadd.f32 %v8472_v35, %v594_v27  ;;  %v7075_v31 = vpop.f32.mrb[13].mxu1  ;;  %v469_v40 = vsel %vm86_vm1, %v468_v29, 0.0 }
 0x11c   :  { %403 = vadd.xlane.f32.xlu1 %v402_v26  ;;  %v530_v32 = vpop.f32.mrb[14].mxu0  ;;  %v597_v34 = vpop.f32.mrb[14].mxu1 }
 0x11d   :  { %v533_v33 = vmul.f32 0.2, %v528_v25  ;;  %v7068_v36 = vpop.f32.mrb[15].mxu0  ;;  %v600_v37 = vmul.f32 0.2, %v595_v30  ;;  %v7076_v38 = vpop.f32.mrb[15].mxu1 }
 0x11f   :  { %v8511_v39 = vmax.f32 %v528_v25, %v533_v33  ;;  %v8514_v41 = vmax.f32 %v595_v30, %v600_v37 }
 0x120   :  { %470 = vadd.xlane.f32.xlu1 %v469_v40 }
 0x121   :  { %v535_v42 = vmul.f32 %v8511_v39, %v8511_v39  ;;  %v602_v44 = vmul.f32 %v8514_v41, %v8514_v41 }
 0x122   :  { %v661_v43 = vpop.f32.mrb[16].mxu0  ;;  %v728_v46 = vpop.f32.mrb[16].mxu1 }
 0x123   :  { %v662_v45 = vadd.f32 %v8472_v35, %v661_v43  ;;  %v536_v47 = vsel %vm86_vm1, %v535_v42, 0.0  ;;  %v7083_v50 = vpop.f32.mrb[17].mxu0  ;;  %v729_v51 = vadd.f32 %v8472_v35, %v728_v46  ;;  %v7091_v52 = vpop.f32.mrb[17].mxu1  ;;  %v603_v56 = vsel %vm86_vm1, %v602_v44, 0.0 }
 0x124   :  { %537 = vadd.xlane.f32.xlu1 %v536_v47  ;;  %v664_v53 = vpop.f32.mrb[18].mxu0  ;;  %v731_v55 = vpop.f32.mrb[18].mxu1 }
 0x125   :  { %v667_v54 = vmul.f32 0.2, %v662_v45  ;;  %v7084_v57 = vpop.f32.mrb[19].mxu0  ;;  %v734_v59 = vmul.f32 0.2, %v729_v51  ;;  %v7092_v60 = vpop.f32.mrb[19].mxu1 }
 0x127   :  { %v8526_v61 = vmax.f32 %v662_v45, %v667_v54  ;;  %v8529_v62 = vmax.f32 %v729_v51, %v734_v59 }
 0x128   :  { %604 = vadd.xlane.f32.xlu1 %v603_v56 }
 0x129   :  { %v669_v63 = vmul.f32 %v8526_v61, %v8526_v61  ;;  %v736_v6 = vmul.f32 %v8529_v62, %v8529_v62 }
 0x12a   :  { %v795_v5 = vpop.f32.mrb[20].mxu0  ;;  %v862_v8 = vpop.f32.mrb[20].mxu1 }
 0x12b   :  { %v796_v7 = vadd.f32 %v8472_v35, %v795_v5  ;;  %v670_v9 = vsel %vm86_vm1, %v669_v63, 0.0  ;;  %v7099_v10 = vpop.f32.mrb[21].mxu0  ;;  %v863_v11 = vadd.f32 %v8472_v35, %v862_v8  ;;  %v737_v12 = vsel %vm86_vm1, %v736_v6, 0.0  ;;  %v7107_v14 = vpop.f32.mrb[21].mxu1 }
 0x12c   :  { %671 = vadd.xlane.f32.xlu0 %v670_v9  ;;  %v798_v13 = vpop.f32.mrb[22].mxu0  ;;  %738 = vadd.xlane.f32.xlu1 %v737_v12  ;;  %v865_v17 = vpop.f32.mrb[22].mxu1 }
 0x12d   :  { %v801_v15 = vmul.f32 0.2, %v796_v7  ;;  %v7100_v16 = vpop.f32.mrb[23].mxu0  ;;  %v868_v19 = vmul.f32 0.2, %v863_v11  ;;  %v7108_v22 = vpop.f32.mrb[23].mxu1 }
 0x12f   :  { %v8550_v23 = vmax.f32 %v796_v7, %v801_v15  ;;  %v8553_v24 = vmax.f32 %v863_v11, %v868_v19 }
 0x131   :  { %v803_v25 = vmul.f32 %v8550_v23, %v8550_v23  ;;  %v870_v26 = vmul.f32 %v8553_v24, %v8553_v24 }
 0x132   :  { %v929_v27 = vpop.f32.mrb[24].mxu0  ;;  %v996_v30 = vpop.f32.mrb[24].mxu1 }
 0x133   :  { %v804_v28 = vsel %vm86_vm1, %v803_v25, 0.0  ;;  %v930_v29 = vadd.f32 %v8472_v35, %v929_v27  ;;  %v7115_v31 = vpop.f32.mrb[25].mxu0  ;;  %v871_v32 = vsel %vm86_vm1, %v870_v26, 0.0  ;;  %v997_v33 = vadd.f32 %v8472_v35, %v996_v30  ;;  %v7123_v36 = vpop.f32.mrb[25].mxu1 }
 0x134   :  { %805 = vadd.xlane.f32.xlu0 %v804_v28  ;;  %v932_v34 = vpop.f32.mrb[26].mxu0  ;;  %872 = vadd.xlane.f32.xlu1 %v871_v32  ;;  %v999_v40 = vpop.f32.mrb[26].mxu1  ;;  %v8587_v28 = vld [vmem:[#allocation4 + $0x70] sm:$0xff]  }
 0x135   :  { %v935_v37 = vmul.f32 0.2, %v930_v29  ;;  %v7116_v38 = vpop.f32.mrb[27].mxu0  ;;  %v1002_v42 = vmul.f32 0.2, %v997_v33  ;;  %v7124_v43 = vpop.f32.mrb[27].mxu1 }
 0x137   :  { %v8564_v44 = vmax.f32 %v930_v29, %v935_v37  ;;  %v8566_v45 = vmax.f32 %v997_v33, %v1002_v42  ;;  %v8595_v37 = vld [vmem:[#allocation4 + $0x78] sm:$0xff]  }
 0x139   :  { %v937_v46 = vmul.f32 %v8564_v44, %v8564_v44  ;;  %v1004_v47 = vmul.f32 %v8566_v45, %v8566_v45 }
 0x13a   :  { %v1063_v50 = vpop.f32.mrb[28].mxu0 }
 0x13b   :  { %v938_v51 = vsel %vm86_vm1, %v937_v46, 0.0  ;;  %v1064_v52 = vadd.f32 %v8472_v35, %v1063_v50  ;;  %v7131_v53 = vpop.f32.mrb[29].mxu0  ;;  %v1005_v54 = vsel %vm86_vm1, %v1004_v47, 0.0  ;;  %v1130_v55 = vpop.f32.mrb[28].mxu1 }
 0x13c   :  { %939 = vadd.xlane.f32.xlu0 %v938_v51  ;;  %v1066_v56 = vpop.f32.mrb[30].mxu0  ;;  %1006 = vadd.xlane.f32.xlu1 %v1005_v54  ;;  %v1131_v59 = vadd.f32 %v8472_v35, %v1130_v55  ;;  %v7139_v63 = vpop.f32.mrb[29].mxu1  ;;  %v8623_v55 = vld [vmem:[#allocation4 + $0x30] sm:$0xff]  }
 0x13d   :  { %v1069_v57 = vmul.f32 0.2, %v1064_v52  ;;  %v7132_v60 = vpop.f32.mrb[31].mxu0  ;;  %v1133_v5 = vpop.f32.mrb[30].mxu1 }
 0x13e   :  { %v1136_v7 = vmul.f32 0.2, %v1131_v59  ;;  %v7140_v8 = vpop.f32.mrb[31].mxu1 }
 0x13f   :  { %v8576_v6 = vmax.f32 %v1064_v52, %v1069_v57 }
 0x140   :  { %v8580_v10 = vmax.f32 %v1131_v59, %v1136_v7  ;;  %v8644_v59 = vld [vmem:[#allocation4 + $0x60] sm:$0xff]   ;;  %v8655_v7 = vld [vmem:[#allocation4 + $0x68] sm:$0xff]  }
 0x141   :  { %v1071_v9 = vmul.f32 %v8576_v6, %v8576_v6 }
 0x142   :  { %v1138_v12 = vmul.f32 %v8580_v10, %v8580_v10 }
 0x143   :  { %v1072_v11 = vsel %vm86_vm1, %v1071_v9, 0.0 }
 0x144   :  { %1073 = vadd.xlane.f32.xlu0 %v1072_v11  ;;  %v1139_v35 = vsel %vm86_vm1, %v1138_v12, 0.0 }
 0x145   :  { %1140 = vadd.xlane.f32.xlu1 %v1139_v35 }
 0x199   :  { %v203_v13 = vpop.xlane.xlu0 %202 }
 0x19a   :  { %v204_v14 = vmul.f32 0.03125, %v203_v13 }
 0x19c   :  { %v205_v15 = vadd.f32 1e-08, %v204_v14 }
 0x19d   :  { %v135_v16 = vpop.xlane.xlu0 %134 }
 0x19e   :  { %8141 = vrsqrt.f32 %v205_v15  ;;  %v137_v17 = vmul.f32 0.03125, %v135_v16 }
 0x1a0   :  { %v138_v19 = vadd.f32 1e-08, %v137_v17 }
 0x1a1   :  { %v270_v36 = vpop.xlane.xlu0 %269 }
 0x1a2   :  { %8143 = vrsqrt.f32 %v138_v19  ;;  %v271_v42 = vmul.f32 0.03125, %v270_v36 }
 0x1a4   :  { %v272_v43 = vadd.f32 1e-08, %v271_v42 }
 0x1a5   :  { %v337_v63 = vpop.xlane.xlu0 %336 }
 0x1a6   :  { %v338_v5 = vmul.f32 0.03125, %v337_v63 }
 0x1a8   :  { %v8142_v22 = vpop.eup %8141 }
 0x1a9   :  { %v404_v25 = vpop.xlane.xlu1 %403  ;;  %v207_v26 = vmul.f32 %v8142_v22, %v8476_v48  ;;  %v8597_v48 = vld [vmem:[#allocation4 + $0x80] sm:$0xff]  }
 0x1aa   :  { %v405_v27 = vmul.f32 0.03125, %v404_v25  ;;  %v8764_v25 = vld [vmem:[#allocation4 + $0x20] sm:$0xff]  }
 0x1ab   :  { %v8589_v29 = vpack.c.bf16 %v207_v26, %v207_v26 }
 0x1ac   :  { %v406_v30 = vadd.f32 1e-08, %v405_v27  ;;  %v8144_v31 = vpop.eup %8143 }
 0x1ad   :  { %v471_v32 = vpop.xlane.xlu1 %470  ;;  %7146 = vmatmul.mubr.msk.bf16.vlgmr.msra.gmra.mrb[32].mxu0 %vm86_vm1, %v8589_v29  ;;  %v140_v34 = vmul.f32 %v8144_v31, %v8478_v49  ;;  %v8608_v49 = vld [vmem:[#allocation4 + $0x88] sm:$0xff]  }
 0x1ae   :  { %8145 = vrsqrt.f32 %v406_v30  ;;  %v472_v33 = vmul.f32 0.03125, %v471_v32  ;;  %7158 = vmatpush3.bf16.msra.mxu0 %v8587_v28  ;;  %7161 = vmatprep.mubr.msk.bf16.mxu0 %vm8279_vm0, %v8278_v0  ;;  %v8774_v31 = vld [vmem:[#allocation4 + $0x28] sm:$0xff]   ;;  %v8776_v32 = vld [vmem:[#allocation4 + $0x10] sm:$0xff]  }
 0x1af   :  { %v8601_v40 = vpack.c.bf16 %v140_v34, %v140_v34  ;;  %7159 = vmatprep.subr.bf16.mxu0 %v8278_v0  ;;  %v8786_v34 = vld [vmem:[#allocation4 + $0x18] sm:$0xff]  }
 0x1b0   :  { %v473_v38 = vadd.f32 1e-08, %v472_v33 }
 0x1b1   :  { %7154 = vmatmul.mubr.msk.bf16.vlgmr.msra.gmra.mrb[32].mxu1 %vm86_vm1, %v8601_v40  ;;  %v538_v51 = vpop.xlane.xlu1 %537 }
 0x1b2   :  { %8147 = vrsqrt.f32 %v473_v38  ;;  %7160 = vmatpush3.bf16.msra.mxu0 %v8595_v37  ;;  %7166 = vmatpush3.bf16.msra.mxu1 %v8597_v48  ;;  %v539_v54 = vmul.f32 0.03125, %v538_v51 }
 0x1b3   :  { %7167 = vmatprep.subr.bf16.mxu1 %v8278_v0  ;;  %7173 = vmatprep.subr.bf16.mxu0 %v8278_v0  ;;  %8149 = vrsqrt.f32 %v272_v43 }
 0x1b4   :  { %7169 = vmatprep.mubr.msk.bf16.mxu1 %vm8279_vm0, %v8278_v0 }
 0x1b5   :  { %v605_v12 = vpop.xlane.xlu1 %604 }
 0x1b6   :  { %7168 = vmatpush3.bf16.msra.mxu1 %v8608_v49  ;;  %v606_v35 = vmul.f32 0.03125, %v605_v12 }
 0x1b7   :  { %7181 = vmatprep.subr.bf16.mxu1 %v8278_v0 }
 0x1b8   :  { %v8146_v46 = vpop.eup %8145 }
 0x1b9   :  { %v408_v47 = vmul.f32 %v8146_v46, %v8499_v20  ;;  %v540_v20 = vadd.f32 1e-08, %v539_v54  ;;  %v739_v26 = vpop.xlane.xlu1 %738 }
 0x1ba   :  { %v740_v27 = vmul.f32 0.03125, %v739_v26 }
 0x1bb   :  { %v8617_v50 = vpack.c.bf16 %v408_v47, %v408_v47  ;;  %8151 = vrsqrt.f32 %v540_v20 }
 0x1bc   :  { %v8148_v52 = vpop.eup %8147  ;;  %v741_v33 = vadd.f32 1e-08, %v740_v27  ;;  %v9103_v27 = vld [vmem:[%s9761_s4] ss:$0 sm:$0xff] }
 0x1bd   :  { %v475_v53 = vmul.f32 %v8148_v52, %v8501_v21  ;;  %7162 = vmatmul.mubr.msk.bf16.vlgmr.msra.gmra.mrb[36].mxu0 %vm86_vm1, %v8617_v50  ;;  %v8634_v21 = vld [vmem:[#allocation4 + $0x38] sm:$0xff]   ;;  %v8150_v57 = vpop.eup %8149 }
 0x1be   :  { %7174 = vmatpush3.bf16.msra.mxu0 %v8536_v3  ;;  %7177 = vmatprep.mubr.msk.bf16.mxu0 %vm8279_vm0, %v8278_v0  ;;  %v274_v60 = vmul.f32 %v8150_v57, %v8487_v2  ;;  %v339_v2 = vadd.f32 1e-08, %v338_v5 }
 0x1bf   :  { %v8627_v56 = vpack.c.bf16 %v475_v53, %v475_v53  ;;  %7175 = vmatprep.subr.bf16.mxu0 %v8278_v0 }
 0x1c0   :  { %v8657_v8 = vpack.c.bf16 %v274_v60, %v274_v60  ;;  %8153 = vrsqrt.f32 %v339_v2 }
 0x1c1   :  { %7170 = vmatmul.mubr.msk.bf16.vlgmr.msra.gmra.mrb[36].mxu1 %vm86_vm1, %v8627_v56 }
 0x1c2   :  { %7176 = vmatpush3.bf16.msra.mxu0 %v8547_v18  ;;  %7182 = vmatpush3.bf16.msra.mxu1 %v8623_v55 }
 0x1c3   :  { %7183 = vmatprep.subr.bf16.mxu1 %v8278_v0  ;;  %7189 = vmatprep.subr.bf16.mxu0 %v8278_v0 }
 0x1c4   :  { %7185 = vmatprep.mubr.msk.bf16.mxu1 %vm8279_vm0, %v8278_v0 }
 0x1c5   :  { %7178 = vmatmul.mubr.msk.bf16.vlgmr.msra.gmra.mrb[40].mxu0 %vm86_vm1, %v8589_v29  ;;  %v8152_v9 = vpop.eup %8151 }
 0x1c6   :  { %7184 = vmatpush3.bf16.msra.mxu1 %v8634_v21  ;;  %7190 = vmatpush3.bf16.msra.mxu0 %v8524_v58  ;;  %v542_v11 = vmul.f32 %v8152_v9, %v8511_v39  ;;  %v607_v39 = vadd.f32 1e-08, %v606_v35 }
 0x1c7   :  { %7191 = vmatprep.subr.bf16.mxu0 %v8278_v0  ;;  %7197 = vmatprep.subr.bf16.mxu1 %v8278_v0 }
 0x1c8   :  { %7193 = vmatprep.mubr.msk.bf16.mxu0 %vm8279_vm0, %v8278_v0  ;;  %v8684_v13 = vpack.c.bf16 %v542_v11, %v542_v11  ;;  %8155 = vrsqrt.f32 %v607_v39 }
 0x1c9   :  { %7186 = vmatmul.mubr.msk.bf16.vlgmr.msra.gmra.mrb[40].mxu1 %vm86_vm1, %v8601_v40 }
 0x1ca   :  { %7192 = vmatpush3.bf16.msra.mxu0 %v8534_v1  ;;  %7198 = vmatpush3.bf16.msra.mxu1 %v8644_v59  ;;  %v8154_v14 = vpop.eup %8153 }
 0x1cb   :  { %7199 = vmatprep.subr.bf16.mxu1 %v8278_v0  ;;  %7205 = vmatprep.subr.bf16.mxu0 %v8278_v0  ;;  %v341_v15 = vmul.f32 %v8154_v14, %v8490_v4 }
 0x1cc   :  { %7201 = vmatprep.mubr.msk.bf16.mxu1 %vm8279_vm0, %v8278_v0 }
 0x1cd   :  { %7194 = vmatmul.mubr.msk.bf16.vlgmr.msra.gmra.mrb[44].mxu0 %vm86_vm1, %v8657_v8  ;;  %v8711_v16 = vpack.c.bf16 %v341_v15, %v341_v15 }
 0x1ce   :  { %7200 = vmatpush3.bf16.msra.mxu1 %v8655_v7  ;;  %7206 = vmatpush3.bf16.msra.mxu0 %v8587_v28 }
 0x1cf   :  { %7207 = vmatprep.subr.bf16.mxu0 %v8278_v0  ;;  %7213 = vmatprep.subr.bf16.mxu1 %v8278_v0 }
 0x1d0   :  { %7209 = vmatprep.mubr.msk.bf16.mxu0 %vm8279_vm0, %v8278_v0 }
 0x1d1   :  { %7202 = vmatmul.mubr.msk.bf16.vlgmr.msra.gmra.mrb[44].mxu1 %vm86_vm1, %v8617_v50 }
 0x1d2   :  { %7208 = vmatpush3.bf16.msra.mxu0 %v8595_v37  ;;  %7214 = vmatpush3.bf16.msra.mxu1 %v8597_v48  ;;  %v8156_v4 = vpop.eup %8155 }
 0x1d3   :  { %7215 = vmatprep.subr.bf16.mxu1 %v8278_v0  ;;  %7221 = vmatprep.subr.bf16.mxu0 %v8278_v0  ;;  %v609_v17 = vmul.f32 %v8156_v4, %v8514_v41  ;;  %v672_v41 = vpop.xlane.xlu0 %671 }
 0x1d4   :  { %7217 = vmatprep.mubr.msk.bf16.mxu1 %vm8279_vm0, %v8278_v0  ;;  %v673_v22 = vmul.f32 0.03125, %v672_v41 }
 0x1d5   :  { %7210 = vmatmul.mubr.msk.bf16.vlgmr.msra.gmra.mrb[48].mxu0 %vm86_vm1, %v8627_v56  ;;  %v8738_v19 = vpack.c.bf16 %v609_v17, %v609_v17 }
 0x1d6   :  { %7216 = vmatpush3.bf16.msra.mxu1 %v8608_v49  ;;  %7222 = vmatpush3.bf16.msra.mxu0 %v8536_v3  ;;  %v674_v30 = vadd.f32 1e-08, %v673_v22 }
 0x1d7   :  { %7223 = vmatprep.subr.bf16.mxu0 %v8278_v0  ;;  %7229 = vmatprep.subr.bf16.mxu1 %v8278_v0  ;;  %v806_v51 = vpop.xlane.xlu0 %805 }
 0x1d8   :  { %7225 = vmatprep.mubr.msk.bf16.mxu0 %vm8279_vm0, %v8278_v0  ;;  %8157 = vrsqrt.f32 %v674_v30  ;;  %v807_v52 = vmul.f32 0.03125, %v806_v51 }
 0x1d9   :  { %7218 = vmatmul.mubr.msk.bf16.vlgmr.msra.gmra.mrb[48].mxu1 %vm86_vm1, %v8684_v13  ;;  %8159 = vrsqrt.f32 %v741_v33 }
 0x1da   :  { %7224 = vmatpush3.bf16.msra.mxu0 %v8547_v18  ;;  %7230 = vmatpush3.bf16.msra.mxu1 %v8623_v55  ;;  %v808_v53 = vadd.f32 1e-08, %v807_v52 }
 0x1db   :  { %7231 = vmatprep.subr.bf16.mxu1 %v8278_v0  ;;  %7237 = vmatprep.subr.bf16.mxu0 %v8278_v0 }
 0x1dc   :  { %7233 = vmatprep.mubr.msk.bf16.mxu1 %vm8279_vm0, %v8278_v0  ;;  %8161 = vrsqrt.f32 %v808_v53 }
 0x1dd   :  { %7226 = vmatmul.mubr.msk.bf16.vlgmr.msra.gmra.mrb[52].mxu0 %vm86_vm1, %v8657_v8 }
 0x1de   :  { %7232 = vmatpush3.bf16.msra.mxu1 %v8634_v21  ;;  %7238 = vmatpush3.bf16.msra.mxu0 %v8524_v58 }
 0x1df   :  { %7239 = vmatprep.subr.bf16.mxu0 %v8278_v0  ;;  %7245 = vmatprep.subr.bf16.mxu1 %v8278_v0 }
 0x1e0   :  { %7241 = vmatprep.mubr.msk.bf16.mxu0 %vm8279_vm0, %v8278_v0 }
 0x1e1   :  { %7234 = vmatmul.mubr.msk.bf16.vlgmr.msra.gmra.mrb[52].mxu1 %vm86_vm1, %v8589_v29 }
 0x1e2   :  { %7240 = vmatpush3.bf16.msra.mxu0 %v8534_v1  ;;  %7246 = vmatpush3.bf16.msra.mxu1 %v8644_v59  ;;  %v8158_v36 = vpop.eup %8157 }
 0x1e3   :  { %7247 = vmatprep.subr.bf16.mxu1 %v8278_v0  ;;  %7253 = vmatprep.subr.bf16.mxu0 %v8278_v0  ;;  %v676_v38 = vmul.f32 %v8158_v36, %v8526_v61  ;;  %v8160_v42 = vpop.eup %8159  ;;  %v8832_v61 = vld [vmem:[#allocation4] sm:$0xff]  }
 0x1e4   :  { %7249 = vmatprep.mubr.msk.bf16.mxu1 %vm8279_vm0, %v8278_v0  ;;  %v743_v43 = vmul.f32 %v8160_v42, %v8529_v62  ;;  %v8844_v62 = vld [vmem:[#allocation4 + $0x8] sm:$0xff]  }
 0x1e5   :  { %7242 = vmatmul.mubr.msk.bf16.vlgmr.msra.gmra.mrb[56].mxu0 %vm86_vm1, %v8711_v16  ;;  %v8822_v46 = vpack.c.bf16 %v676_v38, %v676_v38 }
 0x1e6   :  { %7248 = vmatpush3.bf16.msra.mxu1 %v8655_v7  ;;  %7254 = vmatpush3.bf16.msra.mxu0 %v8587_v28  ;;  %v8834_v47 = vpack.c.bf16 %v743_v43, %v743_v43 }
 0x1e7   :  { %7255 = vmatprep.subr.bf16.mxu0 %v8278_v0  ;;  %7261 = vmatprep.subr.bf16.mxu1 %v8278_v0 }
 0x1e8   :  { %7257 = vmatprep.mubr.msk.bf16.mxu0 %vm8279_vm0, %v8278_v0 }
 0x1e9   :  { %7250 = vmatmul.mubr.msk.bf16.vlgmr.msra.gmra.mrb[56].mxu1 %vm86_vm1, %v8627_v56 }
 0x1ea   :  { %7256 = vmatpush3.bf16.msra.mxu0 %v8595_v37  ;;  %7262 = vmatpush3.bf16.msra.mxu1 %v8597_v48 }
 0x1eb   :  { %7263 = vmatprep.subr.bf16.mxu1 %v8278_v0  ;;  %7269 = vmatprep.subr.bf16.mxu0 %v8278_v0 }
 0x1ec   :  { %7265 = vmatprep.mubr.msk.bf16.mxu1 %vm8279_vm0, %v8278_v0 }
 0x1ed   :  { %7258 = vmatmul.mubr.msk.bf16.vlgmr.msra.gmra.mrb[60].mxu0 %vm86_vm1, %v8684_v13 }
 0x1ee   :  { %7264 = vmatpush3.bf16.msra.mxu1 %v8608_v49  ;;  %7270 = vmatpush3.bf16.msra.mxu0 %v8536_v3 }
 0x1ef   :  { %7271 = vmatprep.subr.bf16.mxu0 %v8278_v0  ;;  %7277 = vmatprep.subr.bf16.mxu1 %v8278_v0 }
 0x1f0   :  { %7273 = vmatprep.mubr.msk.bf16.mxu0 %vm8279_vm0, %v8278_v0 }
 0x1f1   :  { %7266 = vmatmul.mubr.msk.bf16.vlgmr.msra.gmra.mrb[60].mxu1 %vm86_vm1, %v8738_v19 }
 0x1f2   :  { %7272 = vmatpush3.bf16.msra.mxu0 %v8547_v18  ;;  %7278 = vmatpush3.bf16.msra.mxu1 %v8623_v55 }
 0x1f3   :  { %7279 = vmatprep.subr.bf16.mxu1 %v8278_v0  ;;  %7285 = vmatprep.subr.bf16.mxu0 %v8278_v0 }
 0x1f4   :  { %7281 = vmatprep.mubr.msk.bf16.mxu1 %vm8279_vm0, %v8278_v0 }
 0x1f5   :  { %7274 = vmatmul.mubr.msk.bf16.vlgmr.msra.gmra.mrb[64].mxu0 %vm86_vm1, %v8711_v16 }
 0x1f6   :  { %7280 = vmatpush3.bf16.msra.mxu1 %v8634_v21  ;;  %7286 = vmatpush3.bf16.msra.mxu0 %v8644_v59 }
 0x1f7   :  { %7287 = vmatprep.subr.bf16.mxu0 %v8278_v0  ;;  %7293 = vmatprep.subr.bf16.mxu1 %v8278_v0 }
 0x1f8   :  { %7289 = vmatprep.mubr.msk.bf16.mxu0 %vm8279_vm0, %v8278_v0 }
 0x1f9   :  { %7282 = vmatmul.mubr.msk.bf16.vlgmr.msra.gmra.mrb[64].mxu1 %vm86_vm1, %v8657_v8 }
 0x1fa   :  { %7288 = vmatpush3.bf16.msra.mxu0 %v8655_v7  ;;  %7294 = vmatpush3.bf16.msra.mxu1 %v8587_v28 }
 0x1fb   :  { %7295 = vmatprep.subr.bf16.mxu1 %v8278_v0  ;;  %7301 = vmatprep.subr.bf16.mxu0 %v8278_v0 }
 0x1fc   :  { %7297 = vmatprep.mubr.msk.bf16.mxu1 %vm8279_vm0, %v8278_v0 }
 0x1fd   :  { %7290 = vmatmul.mubr.msk.bf16.vlgmr.msra.gmra.mrb[68].mxu0 %vm86_vm1, %v8684_v13 }
 0x1fe   :  { %7296 = vmatpush3.bf16.msra.mxu1 %v8595_v37  ;;  %7302 = vmatpush3.bf16.msra.mxu0 %v8764_v25 }
 0x1ff   :  { %7303 = vmatprep.subr.bf16.mxu0 %v8278_v0  ;;  %7309 = vmatprep.subr.bf16.mxu1 %v8278_v0 }
 0x200   :  { %7305 = vmatprep.mubr.msk.bf16.mxu0 %vm8279_vm0, %v8278_v0 }
 0x201   :  { %7298 = vmatmul.mubr.msk.bf16.vlgmr.msra.gmra.mrb[68].mxu1 %vm86_vm1, %v8738_v19 }
 0x202   :  { %7304 = vmatpush3.bf16.msra.mxu0 %v8774_v31  ;;  %7310 = vmatpush3.bf16.msra.mxu1 %v8776_v32 }
 0x203   :  { %7311 = vmatprep.subr.bf16.mxu1 %v8278_v0  ;;  %7317 = vmatprep.subr.bf16.mxu0 %v8278_v0 }
 0x204   :  { %7313 = vmatprep.mubr.msk.bf16.mxu1 %vm8279_vm0, %v8278_v0 }
 0x205   :  { %7306 = vmatmul.mubr.msk.bf16.vlgmr.msra.gmra.mrb[72].mxu0 %vm86_vm1, %v8589_v29 }
 0x206   :  { %7312 = vmatpush3.bf16.msra.mxu1 %v8786_v34  ;;  %7318 = vmatpush3.bf16.msra.mxu0 %v8536_v3 }
 0x207   :  { %7319 = vmatprep.subr.bf16.mxu0 %v8278_v0  ;;  %7325 = vmatprep.subr.bf16.mxu1 %v8278_v0 }
 0x208   :  { %7321 = vmatprep.mubr.msk.bf16.mxu0 %vm8279_vm0, %v8278_v0 }
 0x209   :  { %7314 = vmatmul.mubr.msk.bf16.vlgmr.msra.gmra.mrb[72].mxu1 %vm86_vm1, %v8601_v40 }
 0x20a   :  { %7320 = vmatpush3.bf16.msra.mxu0 %v8547_v18  ;;  %7326 = vmatpush3.bf16.msra.mxu1 %v8524_v58 }
 0x20b   :  { %7327 = vmatprep.subr.bf16.mxu1 %v8278_v0  ;;  %7333 = vmatprep.subr.bf16.mxu0 %v8278_v0 }
 0x20c   :  { %7329 = vmatprep.mubr.msk.bf16.mxu1 %vm8279_vm0, %v8278_v0 }
 0x20d   :  { %7322 = vmatmul.mubr.msk.bf16.vlgmr.msra.gmra.mrb[76].mxu0 %vm86_vm1, %v8617_v50 }
 0x20e   :  { %7328 = vmatpush3.bf16.msra.mxu1 %v8534_v1  ;;  %7334 = vmatpush3.bf16.msra.mxu0 %v8587_v28 }
 0x20f   :  { %7335 = vmatprep.subr.bf16.mxu0 %v8278_v0  ;;  %7341 = vmatprep.subr.bf16.mxu1 %v8278_v0 }
 0x210   :  { %7337 = vmatprep.mubr.msk.bf16.mxu0 %vm8279_vm0, %v8278_v0 }
 0x211   :  { %7330 = vmatmul.mubr.msk.bf16.vlgmr.msra.gmra.mrb[76].mxu1 %vm86_vm1, %v8627_v56 }
 0x212   :  { %7336 = vmatpush3.bf16.msra.mxu0 %v8595_v37  ;;  %7342 = vmatpush3.bf16.msra.mxu1 %v8597_v48 }
 0x213   :  { %7343 = vmatprep.subr.bf16.mxu1 %v8278_v0  ;;  %7349 = vmatprep.subr.bf16.mxu0 %v8278_v0 }
 0x214   :  { %7345 = vmatprep.mubr.msk.bf16.mxu1 %vm8279_vm0, %v8278_v0 }
 0x215   :  { %7338 = vmatmul.mubr.msk.bf16.vlgmr.msra.gmra.mrb[80].mxu0 %vm86_vm1, %v8822_v46 }
 0x216   :  { %7344 = vmatpush3.bf16.msra.mxu1 %v8608_v49  ;;  %7350 = vmatpush3.bf16.msra.mxu0 %v8776_v32 }
 0x217   :  { %7351 = vmatprep.subr.bf16.mxu0 %v8278_v0  ;;  %7357 = vmatprep.subr.bf16.mxu1 %v8278_v0 }
 0x218   :  { %7353 = vmatprep.mubr.msk.bf16.mxu0 %vm8279_vm0, %v8278_v0 }
 0x219   :  { %7346 = vmatmul.mubr.msk.bf16.vlgmr.msra.gmra.mrb[80].mxu1 %vm86_vm1, %v8834_v47 }
 0x21a   :  { %7352 = vmatpush3.bf16.msra.mxu0 %v8786_v34  ;;  %7358 = vmatpush3.bf16.msra.mxu1 %v8832_v61 }
 0x21b   :  { %7359 = vmatprep.subr.bf16.mxu1 %v8278_v0  ;;  %7365 = vmatprep.subr.bf16.mxu0 %v8278_v0 }
 0x21c   :  { %7361 = vmatprep.mubr.msk.bf16.mxu1 %vm8279_vm0, %v8278_v0 }
 0x21d   :  { %7354 = vmatmul.mubr.msk.bf16.vlgmr.msra.gmra.mrb[84].mxu0 %vm86_vm1, %v8589_v29 }
 0x21e   :  { %7360 = vmatpush3.bf16.msra.mxu1 %v8844_v62  ;;  %7366 = vmatpush3.bf16.msra.mxu0 %v8764_v25 }
 0x21f   :  { %7367 = vmatprep.subr.bf16.mxu0 %v8278_v0  ;;  %7373 = vmatprep.subr.bf16.mxu1 %v8278_v0 }
 0x220   :  { %7369 = vmatprep.mubr.msk.bf16.mxu0 %vm8279_vm0, %v8278_v0 }
 0x221   :  { %7362 = vmatmul.mubr.msk.bf16.vlgmr.msra.gmra.mrb[84].mxu1 %vm86_vm1, %v8601_v40  ;;  %v8162_v40 = vpop.eup %8161 }
 0x222   :  { %7368 = vmatpush3.bf16.msra.mxu0 %v8774_v31  ;;  %7374 = vmatpush3.bf16.msra.mxu1 %v8623_v55  ;;  %v810_v54 = vmul.f32 %v8162_v40, %v8550_v23  ;;  %v873_v23 = vpop.xlane.xlu1 %872 }
 0x223   :  { %7375 = vmatprep.subr.bf16.mxu1 %v8278_v0  ;;  %7381 = vmatprep.subr.bf16.mxu0 %v8278_v0  ;;  %v874_v57 = vmul.f32 0.03125, %v873_v23 }
 0x224   :  { %7377 = vmatprep.mubr.msk.bf16.mxu1 %vm8279_vm0, %v8278_v0  ;;  %v8911_v20 = vpack.c.bf16 %v810_v54, %v810_v54 }
 0x225   :  { %7370 = vmatmul.mubr.msk.bf16.vlgmr.msra.gmra.mrb[88].mxu0 %vm86_vm1, %v8657_v8  ;;  %v875_v60 = vadd.f32 1e-08, %v874_v57 }
 0x226   :  { %7376 = vmatpush3.bf16.msra.mxu1 %v8634_v21  ;;  %7382 = vmatpush3.bf16.msra.mxu0 %v8536_v3  ;;  %v1007_v2 = vpop.xlane.xlu1 %1006 }
 0x227   :  { %7383 = vmatprep.subr.bf16.mxu0 %v8278_v0  ;;  %7389 = vmatprep.subr.bf16.mxu1 %v8278_v0  ;;  %8163 = vrsqrt.f32 %v875_v60  ;;  %v1008_v11 = vmul.f32 0.03125, %v1007_v2  ;;  %v9131_v2 = vld [vmem:[#allocation4 + $0x40] sm:$0xff]  }
 0x228   :  { %7385 = vmatprep.mubr.msk.bf16.mxu0 %vm8279_vm0, %v8278_v0 }
 0x229   :  { %7378 = vmatmul.mubr.msk.bf16.vlgmr.msra.gmra.mrb[88].mxu1 %vm86_vm1, %v8617_v50  ;;  %v1009_v12 = vadd.f32 1e-08, %v1008_v11 }
 0x22a   :  { %7384 = vmatpush3.bf16.msra.mxu0 %v8547_v18  ;;  %7390 = vmatpush3.bf16.msra.mxu1 %v8524_v58 }
 0x22b   :  { %7391 = vmatprep.subr.bf16.mxu1 %v8278_v0  ;;  %7397 = vmatprep.subr.bf16.mxu0 %v8278_v0 }
 0x22c   :  { %7393 = vmatprep.mubr.msk.bf16.mxu1 %vm8279_vm0, %v8278_v0 }
 0x22d   :  { %7386 = vmatmul.mubr.msk.bf16.vlgmr.msra.gmra.mrb[92].mxu0 %vm86_vm1, %v8627_v56 }
 0x22e   :  { %7392 = vmatpush3.bf16.msra.mxu1 %v8534_v1  ;;  %7398 = vmatpush3.bf16.msra.mxu0 %v8644_v59 }
 0x22f   :  { %7399 = vmatprep.subr.bf16.mxu0 %v8278_v0  ;;  %7405 = vmatprep.subr.bf16.mxu1 %v8278_v0 }
 0x230   :  { %7401 = vmatprep.mubr.msk.bf16.mxu0 %vm8279_vm0, %v8278_v0 }
 0x231   :  { %7394 = vmatmul.mubr.msk.bf16.vlgmr.msra.gmra.mrb[92].mxu1 %vm86_vm1, %v8684_v13 }
 0x232   :  { %7400 = vmatpush3.bf16.msra.mxu0 %v8655_v7  ;;  %7406 = vmatpush3.bf16.msra.mxu1 %v8587_v28 }
 0x233   :  { %7407 = vmatprep.subr.bf16.mxu1 %v8278_v0  ;;  %7413 = vmatprep.subr.bf16.mxu0 %v8278_v0 }
 0x234   :  { %7409 = vmatprep.mubr.msk.bf16.mxu1 %vm8279_vm0, %v8278_v0 }
 0x235   :  { %7402 = vmatmul.mubr.msk.bf16.vlgmr.msra.gmra.mrb[96].mxu0 %vm86_vm1, %v8822_v46 }
 0x236   :  { %7408 = vmatpush3.bf16.msra.mxu1 %v8595_v37  ;;  %7414 = vmatpush3.bf16.msra.mxu0 %v8597_v48 }
 0x237   :  { %7415 = vmatprep.subr.bf16.mxu0 %v8278_v0  ;;  %7421 = vmatprep.subr.bf16.mxu1 %v8278_v0 }
 0x238   :  { %7417 = vmatprep.mubr.msk.bf16.mxu0 %vm8279_vm0, %v8278_v0 }
 0x239   :  { %7410 = vmatmul.mubr.msk.bf16.vlgmr.msra.gmra.mrb[96].mxu1 %vm86_vm1, %v8834_v47 }
 0x23a   :  { %7416 = vmatpush3.bf16.msra.mxu0 %v8608_v49  ;;  %7422 = vmatpush3.bf16.msra.mxu1 %v8776_v32 }
 0x23b   :  { %7423 = vmatprep.subr.bf16.mxu1 %v8278_v0  ;;  %7429 = vmatprep.subr.bf16.mxu0 %v8278_v0 }
 0x23c   :  { %7425 = vmatprep.mubr.msk.bf16.mxu1 %vm8279_vm0, %v8278_v0 }
 0x23d   :  { %7418 = vmatmul.mubr.msk.bf16.vlgmr.msra.gmra.mrb[100].mxu0 %vm86_vm1, %v8911_v20 }
 0x23e   :  { %7424 = vmatpush3.bf16.msra.mxu1 %v8786_v34  ;;  %7430 = vmatpush3.bf16.msra.mxu0 %v8832_v61 }
 0x23f   :  { %7431 = vmatprep.subr.bf16.mxu0 %v8278_v0  ;;  %7437 = vmatprep.subr.bf16.mxu1 %v8278_v0 }
 0x240   :  { %7433 = vmatprep.mubr.msk.bf16.mxu0 %vm8279_vm0, %v8278_v0 }
 0x241   :  { %7426 = vmatmul.mubr.msk.bf16.vlgmr.msra.gmra.mrb[100].mxu1 %vm86_vm1, %v8657_v8 }
 0x242   :  { %7432 = vmatpush3.bf16.msra.mxu0 %v8844_v62  ;;  %7438 = vmatpush3.bf16.msra.mxu1 %v8764_v25 }
 0x243   :  { %7439 = vmatprep.subr.bf16.mxu1 %v8278_v0  ;;  %7445 = vmatprep.subr.bf16.mxu0 %v8278_v0 }
 0x244   :  { %7441 = vmatprep.mubr.msk.bf16.mxu1 %vm8279_vm0, %v8278_v0 }
 0x245   :  { %7434 = vmatmul.mubr.msk.bf16.vlgmr.msra.gmra.mrb[104].mxu0 %vm86_vm1, %v8589_v29  ;;  %v8164_v29 = vpop.eup %8163 }
 0x246   :  { %7440 = vmatpush3.bf16.msra.mxu1 %v8774_v31  ;;  %7446 = vmatpush3.bf16.msra.mxu0 %v8623_v55  ;;  %v877_v63 = vmul.f32 %v8164_v29, %v8553_v24  ;;  %v940_v24 = vpop.xlane.xlu0 %939 }
 0x247   :  { %7447 = vmatprep.subr.bf16.mxu0 %v8278_v0  ;;  %7453 = vmatprep.subr.bf16.mxu1 %v8278_v0 }
 0x248   :  { %7449 = vmatprep.mubr.msk.bf16.mxu0 %vm8279_vm0, %v8278_v0  ;;  %v8986_v5 = vpack.c.bf16 %v877_v63, %v877_v63 }
 0x249   :  { %7442 = vmatmul.mubr.msk.bf16.vlgmr.msra.gmra.mrb[104].mxu1 %vm86_vm1, %v8711_v16 }
 0x24a   :  { %7448 = vmatpush3.bf16.msra.mxu0 %v8634_v21  ;;  %7454 = vmatpush3.bf16.msra.mxu1 %v8536_v3  ;;  %v1074_v42 = vpop.xlane.xlu0 %1073 }
 0x24b   :  { %7455 = vmatprep.subr.bf16.mxu1 %v8278_v0  ;;  %7461 = vmatprep.subr.bf16.mxu0 %v8278_v0  ;;  %v1075_v54 = vmul.f32 0.03125, %v1074_v42 }
 0x24c   :  { %7457 = vmatprep.mubr.msk.bf16.mxu1 %vm8279_vm0, %v8278_v0 }
 0x24d   :  { %7450 = vmatmul.mubr.msk.bf16.vlgmr.msra.gmra.mrb[108].mxu0 %vm86_vm1, %v8627_v56 }
 0x24e   :  { %7456 = vmatpush3.bf16.msra.mxu1 %v8547_v18  ;;  %7462 = vmatpush3.bf16.msra.mxu0 %v8524_v58 }
 0x24f   :  { %7463 = vmatprep.subr.bf16.mxu0 %v8278_v0  ;;  %7469 = vmatprep.subr.bf16.mxu1 %v8278_v0 }
 0x250   :  { %7465 = vmatprep.mubr.msk.bf16.mxu0 %vm8279_vm0, %v8278_v0 }
 0x251   :  { %7458 = vmatmul.mubr.msk.bf16.vlgmr.msra.gmra.mrb[108].mxu1 %vm86_vm1, %v8684_v13 }
 0x252   :  { %7464 = vmatpush3.bf16.msra.mxu0 %v8534_v1  ;;  %7470 = vmatpush3.bf16.msra.mxu1 %v8644_v59 }
 0x253   :  { %7471 = vmatprep.subr.bf16.mxu1 %v8278_v0  ;;  %7477 = vmatprep.subr.bf16.mxu0 %v8278_v0 }
 0x254   :  { %7473 = vmatprep.mubr.msk.bf16.mxu1 %vm8279_vm0, %v8278_v0 }
 0x255   :  { %7466 = vmatmul.mubr.msk.bf16.vlgmr.msra.gmra.mrb[112].mxu0 %vm86_vm1, %v8738_v19 }
 0x256   :  { %7472 = vmatpush3.bf16.msra.mxu1 %v8655_v7  ;;  %7478 = vmatpush3.bf16.msra.mxu0 %v8587_v28 }
 0x257   :  { %7479 = vmatprep.subr.bf16.mxu0 %v8278_v0  ;;  %7485 = vmatprep.subr.bf16.mxu1 %v8278_v0 }
 0x258   :  { %7481 = vmatprep.mubr.msk.bf16.mxu0 %vm8279_vm0, %v8278_v0 }
 0x259   :  { %7474 = vmatmul.mubr.msk.bf16.vlgmr.msra.gmra.mrb[112].mxu1 %vm86_vm1, %v8834_v47 }
 0x25a   :  { %7480 = vmatpush3.bf16.msra.mxu0 %v8595_v37  ;;  %7486 = vmatpush3.bf16.msra.mxu1 %v8597_v48 }
 0x25b   :  { %7487 = vmatprep.subr.bf16.mxu1 %v8278_v0  ;;  %7493 = vmatprep.subr.bf16.mxu0 %v8278_v0 }
 0x25c   :  { %7489 = vmatprep.mubr.msk.bf16.mxu1 %vm8279_vm0, %v8278_v0 }
 0x25d   :  { %7482 = vmatmul.mubr.msk.bf16.vlgmr.msra.gmra.mrb[116].mxu0 %vm86_vm1, %v8911_v20 }
 0x25e   :  { %7488 = vmatpush3.bf16.msra.mxu1 %v8608_v49  ;;  %7494 = vmatpush3.bf16.msra.mxu0 %v8776_v32 }
 0x25f   :  { %7495 = vmatprep.subr.bf16.mxu0 %v8278_v0  ;;  %7501 = vmatprep.subr.bf16.mxu1 %v8278_v0 }
 0x260   :  { %7497 = vmatprep.mubr.msk.bf16.mxu0 %vm8279_vm0, %v8278_v0 }
 0x261   :  { %7490 = vmatmul.mubr.msk.bf16.vlgmr.msra.gmra.mrb[116].mxu1 %vm86_vm1, %v8986_v5 }
 0x262   :  { %7496 = vmatpush3.bf16.msra.mxu0 %v8786_v34  ;;  %7502 = vmatpush3.bf16.msra.mxu1 %v8832_v61 }
 0x263   :  { %7503 = vmatprep.subr.bf16.mxu1 %v8278_v0  ;;  %7509 = vmatprep.subr.bf16.mxu0 %v8278_v0 }
 0x264   :  { %7505 = vmatprep.mubr.msk.bf16.mxu1 %vm8279_vm0, %v8278_v0 }
 0x265   :  { %7498 = vmatmul.mubr.msk.bf16.vlgmr.msra.gmra.mrb[120].mxu0 %vm86_vm1, %v8711_v16 }
 0x266   :  { %7504 = vmatpush3.bf16.msra.mxu1 %v8844_v62  ;;  %7510 = vmatpush3.bf16.msra.mxu0 %v8623_v55 }
 0x267   :  { %7511 = vmatprep.subr.bf16.mxu0 %v8278_v0  ;;  %7517 = vmatprep.subr.bf16.mxu1 %v8278_v0 }
 0x268   :  { %7513 = vmatprep.mubr.msk.bf16.mxu0 %vm8279_vm0, %v8278_v0 }
 0x269   :  { %7506 = vmatmul.mubr.msk.bf16.vlgmr.msra.gmra.mrb[120].mxu1 %vm86_vm1, %v8657_v8  ;;  %v941_v8 = vmul.f32 0.03125, %v940_v24 }
 0x26a   :  { %7512 = vmatpush3.bf16.msra.mxu0 %v8634_v21  ;;  %7518 = vmatpush3.bf16.msra.mxu1 %v8536_v3 }
 0x26b   :  { %7519 = vmatprep.subr.bf16.mxu1 %v8278_v0  ;;  %7525 = vmatprep.subr.bf16.mxu0 %v8278_v0  ;;  %v942_v9 = vadd.f32 1e-08, %v941_v8 }
 0x26c   :  { %7521 = vmatprep.mubr.msk.bf16.mxu1 %vm8279_vm0, %v8278_v0 }
 0x26d   :  { %7514 = vmatmul.mubr.msk.bf16.vlgmr.msra.gmra.mrb[124].mxu0 %vm86_vm1, %v8684_v13  ;;  %8165 = vrsqrt.f32 %v942_v9 }
 0x26e   :  { %7520 = vmatpush3.bf16.msra.mxu1 %v8547_v18  ;;  %7526 = vmatpush3.bf16.msra.mxu0 %v8644_v59  ;;  %8167 = vrsqrt.f32 %v1009_v12 }
 0x26f   :  { %7527 = vmatprep.subr.bf16.mxu0 %v8278_v0  ;;  %7533 = vmatprep.subr.bf16.mxu1 %v8278_v0 }
 0x270   :  { %7529 = vmatprep.mubr.msk.bf16.mxu0 %vm8279_vm0, %v8278_v0 }
 0x271   :  { %7522 = vmatmul.mubr.msk.bf16.vlgmr.msra.gmra.mrb[124].mxu1 %vm86_vm1, %v8738_v19 }
 0x272   :  { %7528 = vmatpush3.bf16.msra.mxu0 %v8655_v7  ;;  %7534 = vmatpush3.bf16.msra.mxu1 %v8587_v28 }
 0x273   :  { %7535 = vmatprep.subr.bf16.mxu1 %v8278_v0  ;;  %7541 = vmatprep.subr.bf16.mxu0 %v8278_v0 }
 0x274   :  { %7537 = vmatprep.mubr.msk.bf16.mxu1 %vm8279_vm0, %v8278_v0 }
 0x275   :  { %7530 = vmatmul.mubr.msk.bf16.vlgmr.msra.gmra.mrb[128].mxu0 %vm86_vm1, %v8911_v20 }
 0x276   :  { %7536 = vmatpush3.bf16.msra.mxu1 %v8595_v37  ;;  %7542 = vmatpush3.bf16.msra.mxu0 %v8764_v25 }
 0x277   :  { %7543 = vmatprep.subr.bf16.mxu0 %v8278_v0  ;;  %7549 = vmatprep.subr.bf16.mxu1 %v8278_v0 }
 0x278   :  { %7545 = vmatprep.mubr.msk.bf16.mxu0 %vm8279_vm0, %v8278_v0 }
 0x279   :  { %7538 = vmatmul.mubr.msk.bf16.vlgmr.msra.gmra.mrb[128].mxu1 %vm86_vm1, %v8986_v5 }
 0x27a   :  { %7544 = vmatpush3.bf16.msra.mxu0 %v8774_v31  ;;  %7550 = vmatpush3.bf16.msra.mxu1 %v8776_v32 }
 0x27b   :  { %7551 = vmatprep.subr.bf16.mxu1 %v8278_v0  ;;  %7557 = vmatprep.subr.bf16.mxu0 %v8278_v0 }
 0x27c   :  { %7553 = vmatprep.mubr.msk.bf16.mxu1 %vm8279_vm0, %v8278_v0 }
 0x27d   :  { %7546 = vmatmul.mubr.msk.bf16.vlgmr.msra.gmra.mrb[132].mxu0 %vm86_vm1, %v8627_v56 }
 0x27e   :  { %7552 = vmatpush3.bf16.msra.mxu1 %v8786_v34  ;;  %7558 = vmatpush3.bf16.msra.mxu0 %v8536_v3  ;;  %v8166_v3 = vpop.eup %8165 }
 0x27f   :  { %7559 = vmatprep.subr.bf16.mxu0 %v8278_v0  ;;  %7565 = vmatprep.subr.bf16.mxu1 %v8278_v0  ;;  %v8168_v41 = vpop.eup %8167 }
 0x280   :  { %7561 = vmatprep.mubr.msk.bf16.mxu0 %vm8279_vm0, %v8278_v0  ;;  %v1221_v35 = vpop.f32.mrb[32].mxu0 }
 0x281   :  { %7554 = vmatmul.mubr.msk.bf16.vlgmr.msra.gmra.mrb[132].mxu1 %vm86_vm1, %v8617_v50  ;;  %v7147_v39 = vpop.f32.mrb[33].mxu0 }
 0x282   :  { %7560 = vmatpush3.bf16.msra.mxu0 %v8547_v18  ;;  %7566 = vmatpush3.bf16.msra.mxu1 %v8524_v58  ;;  %v1224_v14 = vpop.f32.mrb[34].mxu0  ;;  %v944_v18 = vmul.f32 %v8166_v3, %v8564_v44  ;;  %v9144_v3 = vld [vmem:[#allocation4 + $0x50] sm:$0xff]  }
 0x283   :  { %7567 = vmatprep.subr.bf16.mxu1 %v8278_v0  ;;  %7573 = vmatprep.subr.bf16.mxu0 %v8278_v0  ;;  %v7148_v15 = vpop.f32.mrb[35].mxu0  ;;  %v9141_v14 = vld [vmem:[#allocation4 + $0x48] sm:$0xff]  }
 0x284   :  { %7569 = vmatprep.mubr.msk.bf16.mxu1 %vm8279_vm0, %v8278_v0  ;;  %v1276_v16 = vpop.f32.mrb[32].mxu1 }
 0x285   :  { %7562 = vmatmul.mubr.msk.bf16.vlgmr.msra.gmra.mrb[136].mxu0 %vm86_vm1, %v8822_v46  ;;  %v1277_v4 = vadd.f32 %v1276_v16, %v1221_v35  ;;  %v7155_v17 = vpop.f32.mrb[33].mxu1 }
 0x286   :  { %7568 = vmatpush3.bf16.msra.mxu1 %v8534_v1  ;;  %7574 = vmatpush3.bf16.msra.mxu0 %v8587_v28  ;;  %v1279_v58 = vpop.f32.mrb[34].mxu1  ;;  %v1011_v1 = vmul.f32 %v8168_v41, %v8566_v45  ;;  %v9078_v28 = vpack.c.bf16 %v944_v18, %v944_v18  ;;  %v9153_v18 = vld [vmem:[#allocation4 + $0x58] sm:$0xff]  }
 0x287   :  { %7575 = vmatprep.subr.bf16.mxu0 %v8278_v0  ;;  %7581 = vmatprep.subr.bf16.mxu1 %v8278_v0  ;;  %v7156_v22 = vpop.f32.mrb[35].mxu1 }
 0x288   :  { %7577 = vmatprep.mubr.msk.bf16.mxu0 %vm8279_vm0, %v8278_v0  ;;  %v9088_v44 = vpack.c.bf16 %v1011_v1, %v1011_v1 }
 0x289   :  { %7570 = vmatmul.mubr.msk.bf16.vlgmr.msra.gmra.mrb[136].mxu1 %vm86_vm1, %v8834_v47 }
 0x28a   :  { %7576 = vmatpush3.bf16.msra.mxu0 %v8595_v37  ;;  %7582 = vmatpush3.bf16.msra.mxu1 %v8597_v48 }
 0x28b   :  { %7583 = vmatprep.subr.bf16.mxu1 %v8278_v0  ;;  %7589 = vmatprep.subr.bf16.mxu0 %v8278_v0 }
 0x28c   :  { %7585 = vmatprep.mubr.msk.bf16.mxu1 %vm8279_vm0, %v8278_v0 }
 0x28d   :  { %7578 = vmatmul.mubr.msk.bf16.vlgmr.msra.gmra.mrb[140].mxu0 %vm86_vm1, %v9078_v28 }
 0x28e   :  { %7584 = vmatpush3.bf16.msra.mxu1 %v8608_v49  ;;  %7590 = vmatpush3.bf16.msra.mxu0 %v8776_v32 }
 0x28f   :  { %7591 = vmatprep.subr.bf16.mxu0 %v8278_v0  ;;  %7597 = vmatprep.subr.bf16.mxu1 %v8278_v0 }
 0x290   :  { %v1336_v45 = vpop.f32.mrb[36].mxu0  ;;  %7593 = vmatprep.mubr.msk.bf16.mxu0 %vm8279_vm0, %v8278_v0 }
 0x291   :  { %v1342_v37 = vadd.f32 %v1336_v45, %v1277_v4  ;;  %v7163_v48 = vpop.f32.mrb[37].mxu0  ;;  %7586 = vmatmul.mubr.msk.bf16.vlgmr.msra.gmra.mrb[140].mxu1 %vm86_vm1, %v9088_v44 }
 0x292   :  { %v1339_v26 = vpop.f32.mrb[38].mxu0  ;;  %7592 = vmatpush3.bf16.msra.mxu0 %v8786_v34  ;;  %7598 = vmatpush3.bf16.msra.mxu1 %v8832_v61  ;;  %v9164_v48 = vld [vmem:[#allocation4 + $0x70] sm:$0xff]  }
 0x293   :  { %v7164_v49 = vpop.f32.mrb[39].mxu0  ;;  %7599 = vmatprep.subr.bf16.mxu1 %v8278_v0  ;;  %7605 = vmatprep.subr.bf16.mxu0 %v8278_v0 }
 0x294   :  { %v1397_v30 = vpop.f32.mrb[36].mxu1  ;;  %7601 = vmatprep.mubr.msk.bf16.mxu1 %vm8279_vm0, %v8278_v0 }
 0x295   :  { %v1403_v33 = vadd.f32 %v1397_v30, %v1342_v37  ;;  %v7171_v36 = vpop.f32.mrb[37].mxu1  ;;  %7594 = vmatmul.mubr.msk.bf16.vlgmr.msra.gmra.mrb[144].mxu0 %vm86_vm1, %v8627_v56 }
 0x296   :  { %v1400_v38 = vpop.f32.mrb[38].mxu1  ;;  %7600 = vmatpush3.bf16.msra.mxu1 %v8844_v62  ;;  %7606 = vmatpush3.bf16.msra.mxu0 %v8764_v25  ;;  %v9173_v36 = vld [vmem:[#allocation4 + $0x78] sm:$0xff]  }
 0x297   :  { %v1410_v43 = vadd.f32 %v9103_v27, %v1403_v33  ;;  %v7172_v51 = vpop.f32.mrb[39].mxu1  ;;  %7607 = vmatprep.subr.bf16.mxu0 %v8278_v0  ;;  %7613 = vmatprep.subr.bf16.mxu1 %v8278_v0  ;;  %v9176_v38 = vld [vmem:[#allocation4 + $0x80] sm:$0xff]  }
 0x298   :  { %v1460_v52 = vpop.f32.mrb[40].mxu0  ;;  %7609 = vmatprep.mubr.msk.bf16.mxu0 %vm8279_vm0, %v8278_v0 }
 0x299   :  { %v1411_v53 = vmul.f32 0.2, %v1410_v43  ;;  %v7179_v40 = vpop.f32.mrb[41].mxu0  ;;  %7602 = vmatmul.mubr.msk.bf16.vlgmr.msra.gmra.mrb[144].mxu1 %vm86_vm1, %v8617_v50 }
 0x29a   :  { %v1463_v23 = vpop.f32.mrb[42].mxu0  ;;  %7608 = vmatpush3.bf16.msra.mxu0 %v8774_v31  ;;  %7614 = vmatpush3.bf16.msra.mxu1 %v8623_v55  ;;  %v1076_v55 = vadd.f32 1e-08, %v1075_v54 }
 0x29b   :  { %v7180_v57 = vpop.f32.mrb[43].mxu0  ;;  %7615 = vmatprep.subr.bf16.mxu1 %v8278_v0  ;;  %7621 = vmatprep.subr.bf16.mxu0 %v8278_v0  ;;  %v9122_v60 = vmax.f32 %v1410_v43, %v1411_v53  ;;  %v9187_v23 = vld [vmem:[#allocation4 + $0x88] sm:$0xff]  }
 0x29c   :  { %v1512_v29 = vpop.f32.mrb[40].mxu1  ;;  %7617 = vmatprep.mubr.msk.bf16.mxu1 %vm8279_vm0, %v8278_v0  ;;  %8169 = vrsqrt.f32 %v1076_v55 }
 0x29d   :  { %v1513_v63 = vadd.f32 %v1512_v29, %v1460_v52  ;;  %v7187_v24 = vpop.f32.mrb[41].mxu1  ;;  %7610 = vmatmul.mubr.msk.bf16.vlgmr.msra.gmra.mrb[148].mxu0 %vm86_vm1, %v8684_v13  ;;  %v1413_v50 = vmul.f32 %v9122_v60, %v9122_v60 }
 0x29e   :  { %v1515_v8 = vpop.f32.mrb[42].mxu1  ;;  %7616 = vmatpush3.bf16.msra.mxu1 %v8634_v21  ;;  %7622 = vmatpush3.bf16.msra.mxu0 %v9131_v2 }
 0x29f   :  { %v7188_v9 = vpop.f32.mrb[43].mxu1  ;;  %v1414_v11 = vsel %vm86_vm1, %v1413_v50, 0.0  ;;  %7623 = vmatprep.subr.bf16.mxu0 %v8278_v0  ;;  %7629 = vmatprep.subr.bf16.mxu1 %v8278_v0 }
 0x2a0   :  { %1415 = vadd.xlane.f32.xlu0 %v1414_v11  ;;  %v1555_v12 = vpop.f32.mrb[44].mxu0  ;;  %7625 = vmatprep.mubr.msk.bf16.mxu0 %vm8279_vm0, %v8278_v0 }
 0x2a1   :  { %v1561_v35 = vadd.f32 %v1555_v12, %v1513_v63  ;;  %v7195_v39 = vpop.f32.mrb[45].mxu0  ;;  %7618 = vmatmul.mubr.msk.bf16.vlgmr.msra.gmra.mrb[148].mxu1 %vm86_vm1, %v8822_v46 }
 0x2a2   :  { %v1558_v21 = vpop.f32.mrb[46].mxu0  ;;  %7624 = vmatpush3.bf16.msra.mxu0 %v9141_v14  ;;  %7630 = vmatpush3.bf16.msra.mxu1 %v9144_v3 }
 0x2a3   :  { %v7196_v15 = vpop.f32.mrb[47].mxu0  ;;  %7631 = vmatprep.subr.bf16.mxu1 %v8278_v0  ;;  %7637 = vmatprep.subr.bf16.mxu0 %v8278_v0 }
 0x2a4   :  { %v1613_v16 = vpop.f32.mrb[44].mxu1  ;;  %7633 = vmatprep.mubr.msk.bf16.mxu1 %vm8279_vm0, %v8278_v0  ;;  %v1141_v15 = vpop.xlane.xlu1 %1140 }
 0x2a5   :  { %v1619_v4 = vadd.f32 %v1613_v16, %v1561_v35  ;;  %v7203_v17 = vpop.f32.mrb[45].mxu1  ;;  %7626 = vmatmul.mubr.msk.bf16.vlgmr.msra.gmra.mrb[152].mxu0 %vm86_vm1, %v8834_v47 }
 0x2a6   :  { %v1616_v58 = vpop.f32.mrb[46].mxu1  ;;  %7632 = vmatpush3.bf16.msra.mxu1 %v9153_v18  ;;  %7638 = vmatpush3.bf16.msra.mxu0 %v8644_v59  ;;  %v8170_v26 = vpop.eup %8169 }
 0x2a7   :  { %v7204_v41 = vpop.f32.mrb[47].mxu1  ;;  %7639 = vmatprep.subr.bf16.mxu0 %v8278_v0  ;;  %7645 = vmatprep.subr.bf16.mxu1 %v8278_v0  ;;  %v1078_v42 = vmul.f32 %v8170_v26, %v8576_v6  ;;  %v9230_v26 = vld [vmem:[#allocation4 + $0x38] sm:$0xff]  }
 0x2a8   :  { %v1654_v22 = vpop.f32.mrb[48].mxu0  ;;  %7641 = vmatprep.mubr.msk.bf16.mxu0 %vm8279_vm0, %v8278_v0  ;;  %v1142_v41 = vmul.f32 0.03125, %v1141_v15 }
 0x2a9   :  { %v1660_v1 = vadd.f32 %v1654_v22, %v1619_v4  ;;  %v7211_v45 = vpop.f32.mrb[49].mxu0  ;;  %7634 = vmatmul.mubr.msk.bf16.vlgmr.msra.gmra.mrb[152].mxu1 %vm86_vm1, %v8911_v20  ;;  %v9191_v6 = vpack.c.bf16 %v1078_v42, %v1078_v42 }
 0x2aa   :  { %v1657_v37 = vpop.f32.mrb[50].mxu0  ;;  %7640 = vmatpush3.bf16.msra.mxu0 %v8655_v7  ;;  %7646 = vmatpush3.bf16.msra.mxu1 %v9164_v48 }
 0x2ab   :  { %v7212_v59 = vpop.f32.mrb[51].mxu0  ;;  %7647 = vmatprep.subr.bf16.mxu1 %v8278_v0  ;;  %7653 = vmatprep.subr.bf16.mxu0 %v8278_v0 }
 0x2ac   :  { %v1698_v49 = vpop.f32.mrb[48].mxu1  ;;  %7649 = vmatprep.mubr.msk.bf16.mxu1 %vm8279_vm0, %v8278_v0 }
 0x2ad   :  { %v1704_v30 = vadd.f32 %v1698_v49, %v1660_v1  ;;  %v7219_v33 = vpop.f32.mrb[49].mxu1  ;;  %7642 = vmatmul.mubr.msk.bf16.vlgmr.msra.gmra.mrb[156].mxu0 %vm86_vm1, %v9078_v28 }
 0x2ae   :  { %v1701_v7 = vpop.f32.mrb[50].mxu1  ;;  %7648 = vmatpush3.bf16.msra.mxu1 %v9173_v36  ;;  %7654 = vmatpush3.bf16.msra.mxu0 %v9176_v38 }
 0x2af   :  { %v1705_v43 = vadd.f32 %v9103_v27, %v1704_v30  ;;  %v7220_v51 = vpop.f32.mrb[51].mxu1  ;;  %7655 = vmatprep.subr.bf16.mxu0 %v8278_v0  ;;  %7661 = vmatprep.subr.bf16.mxu1 %v8278_v0 }
 0x2b0   :  { %v1750_v52 = vpop.f32.mrb[52].mxu0  ;;  %7657 = vmatprep.mubr.msk.bf16.mxu0 %vm8279_vm0, %v8278_v0 }
 0x2b1   :  { %v1706_v53 = vmul.f32 0.2, %v1705_v43  ;;  %v7227_v40 = vpop.f32.mrb[53].mxu0  ;;  %7650 = vmatmul.mubr.msk.bf16.vlgmr.msra.gmra.mrb[156].mxu1 %vm86_vm1, %v9088_v44 }
 0x2b2   :  { %v1753_v54 = vpop.f32.mrb[54].mxu0  ;;  %7656 = vmatpush3.bf16.msra.mxu0 %v9187_v23  ;;  %7662 = vmatpush3.bf16.msra.mxu1 %v8776_v32 }
 0x2b3   :  { %v7228_v57 = vpop.f32.mrb[55].mxu0  ;;  %7663 = vmatprep.subr.bf16.mxu1 %v8278_v0  ;;  %7669 = vmatprep.subr.bf16.mxu0 %v8278_v0  ;;  %v9195_v29 = vmax.f32 %v1705_v43, %v1706_v53 }
 0x2b4   :  { %v1790_v63 = vpop.f32.mrb[52].mxu1  ;;  %7665 = vmatprep.mubr.msk.bf16.mxu1 %vm8279_vm0, %v8278_v0  ;;  %v9250_v57 = vld [vmem:[#allocation4 + $0x60] sm:$0xff]  }
 0x2b5   :  { %v1791_v24 = vadd.f32 %v1790_v63, %v1750_v52  ;;  %v7235_v50 = vpop.f32.mrb[53].mxu1  ;;  %7658 = vmatmul.mubr.msk.bf16.vlgmr.msra.gmra.mrb[160].mxu0 %vm86_vm1, %v9191_v6  ;;  %v1708_v55 = vmul.f32 %v9195_v29, %v9195_v29 }
 0x2b6   :  { %v1793_v8 = vpop.f32.mrb[54].mxu1  ;;  %7664 = vmatpush3.bf16.msra.mxu1 %v8786_v34  ;;  %7670 = vmatpush3.bf16.msra.mxu0 %v8832_v61 }
 0x2b7   :  { %v7236_v9 = vpop.f32.mrb[55].mxu1  ;;  %v1709_v11 = vsel %vm86_vm1, %v1708_v55, 0.0  ;;  %7671 = vmatprep.subr.bf16.mxu0 %v8278_v0  ;;  %7677 = vmatprep.subr.bf16.mxu1 %v8278_v0 }
 0x2b8   :  { %1710 = vadd.xlane.f32.xlu1 %v1709_v11  ;;  %v1833_v12 = vpop.f32.mrb[56].mxu0  ;;  %7673 = vmatprep.mubr.msk.bf16.mxu0 %vm8279_vm0, %v8278_v0 }
 0x2b9   :  { %v1839_v35 = vadd.f32 %v1833_v12, %v1791_v24  ;;  %v7243_v39 = vpop.f32.mrb[57].mxu0  ;;  %7666 = vmatmul.mubr.msk.bf16.vlgmr.msra.gmra.mrb[160].mxu1 %vm86_vm1, %v8684_v13  ;;  %v9263_v12 = vld [vmem:[#allocation4 + $0x68] sm:$0xff]  }
 0x2ba   :  { %v1836_v21 = vpop.f32.mrb[58].mxu0  ;;  %7672 = vmatpush3.bf16.msra.mxu0 %v8844_v62  ;;  %7678 = vmatpush3.bf16.msra.mxu1 %v8764_v25  ;;  %v9221_v25 = vld [vmem:[#allocation4 + $0x30] sm:$0xff]  }
 0x2bb   :  { %v7244_v16 = vpop.f32.mrb[59].mxu0  ;;  %7679 = vmatprep.subr.bf16.mxu1 %v8278_v0  ;;  %7685 = vmatprep.subr.bf16.mxu0 %v8278_v0 }
 0x2bc   :  { %v1874_v4 = vpop.f32.mrb[56].mxu1  ;;  %7681 = vmatprep.mubr.msk.bf16.mxu1 %vm8279_vm0, %v8278_v0 }
 0x2bd   :  { %v1880_v17 = vadd.f32 %v1874_v4, %v1839_v35  ;;  %v7251_v58 = vpop.f32.mrb[57].mxu1  ;;  %7674 = vmatmul.mubr.msk.bf16.vlgmr.msra.gmra.mrb[164].mxu0 %vm86_vm1, %v8627_v56  ;;  %v1143_v56 = vadd.f32 1e-08, %v1142_v41 }
 0x2be   :  { %v1877_v22 = vpop.f32.mrb[58].mxu1  ;;  %7680 = vmatpush3.bf16.msra.mxu1 %v8774_v31  ;;  %7686 = vmatpush3.bf16.msra.mxu0 %v9221_v25 }
 0x2bf   :  { %v7252_v1 = vpop.f32.mrb[59].mxu1  ;;  %7687 = vmatprep.subr.bf16.mxu0 %v8278_v0  ;;  %7693 = vmatprep.subr.bf16.mxu1 %v8278_v0  ;;  %8171 = vrsqrt.f32 %v1143_v56 }
 0x2c0   :  { %v1915_v45 = vpop.f32.mrb[60].mxu0  ;;  %7689 = vmatprep.mubr.msk.bf16.mxu0 %vm8279_vm0, %v8278_v0 }
 0x2c1   :  { %v1921_v37 = vadd.f32 %v1915_v45, %v1880_v17  ;;  %v7259_v59 = vpop.f32.mrb[61].mxu0  ;;  %7682 = vmatmul.mubr.msk.bf16.vlgmr.msra.gmra.mrb[164].mxu1 %vm86_vm1, %v8738_v19 }
 0x2c2   :  { %v1918_v31 = vpop.f32.mrb[62].mxu0  ;;  %7688 = vmatpush3.bf16.msra.mxu0 %v9230_v26  ;;  %7694 = vmatpush3.bf16.msra.mxu1 %v9131_v2 }
 0x2c3   :  { %v7260_v49 = vpop.f32.mrb[63].mxu0  ;;  %7695 = vmatprep.subr.bf16.mxu1 %v8278_v0  ;;  %7701 = vmatprep.subr.bf16.mxu0 %v8278_v0 }
 0x2c4   :  { %v1959_v30 = vpop.f32.mrb[60].mxu1  ;;  %7697 = vmatprep.mubr.msk.bf16.mxu1 %vm8279_vm0, %v8278_v0 }
 0x2c5   :  { %v1965_v33 = vadd.f32 %v1959_v30, %v1921_v37  ;;  %v7267_v7 = vpop.f32.mrb[61].mxu1  ;;  %7690 = vmatmul.mubr.msk.bf16.vlgmr.msra.gmra.mrb[168].mxu0 %vm86_vm1, %v8834_v47 }
 0x2c6   :  { %v1962_v42 = vpop.f32.mrb[62].mxu1  ;;  %7696 = vmatpush3.bf16.msra.mxu1 %v9141_v14  ;;  %7702 = vmatpush3.bf16.msra.mxu0 %v9144_v3 }
 0x2c7   :  { %v1966_v43 = vadd.f32 %v9103_v27, %v1965_v33  ;;  %v7268_v51 = vpop.f32.mrb[63].mxu1  ;;  %7703 = vmatprep.subr.bf16.mxu0 %v8278_v0  ;;  %7709 = vmatprep.subr.bf16.mxu1 %v8278_v0 }
 0x2c8   :  { %v2011_v52 = vpop.f32.mrb[64].mxu0  ;;  %7705 = vmatprep.mubr.msk.bf16.mxu0 %vm8279_vm0, %v8278_v0 }
 0x2c9   :  { %v1967_v53 = vmul.f32 0.2, %v1966_v43  ;;  %v7275_v40 = vpop.f32.mrb[65].mxu0  ;;  %7698 = vmatmul.mubr.msk.bf16.vlgmr.msra.gmra.mrb[168].mxu1 %vm86_vm1, %v8911_v20  ;;  %v8172_v21 = vpop.eup %8171 }
 0x2ca   :  { %v2014_v54 = vpop.f32.mrb[66].mxu0  ;;  %7704 = vmatpush3.bf16.msra.mxu0 %v9153_v18  ;;  %7710 = vmatpush3.bf16.msra.mxu1 %v9250_v57  ;;  %v1145_v41 = vmul.f32 %v8172_v21, %v8580_v10 }
 0x2cb   :  { %v7276_v63 = vpop.f32.mrb[67].mxu0  ;;  %7711 = vmatprep.subr.bf16.mxu1 %v8278_v0  ;;  %7717 = vmatprep.subr.bf16.mxu0 %v8278_v0  ;;  %v9255_v24 = vmax.f32 %v1966_v43, %v1967_v53 }
 0x2cc   :  { %v2051_v50 = vpop.f32.mrb[64].mxu1  ;;  %7713 = vmatprep.mubr.msk.bf16.mxu1 %vm8279_vm0, %v8278_v0  ;;  %v9286_v56 = vpack.c.bf16 %v1145_v41, %v1145_v41 }
 0x2cd   :  { %v2052_v55 = vadd.f32 %v2051_v50, %v2011_v52  ;;  %v7283_v8 = vpop.f32.mrb[65].mxu1  ;;  %7706 = vmatmul.mubr.msk.bf16.vlgmr.msra.gmra.mrb[172].mxu0 %vm86_vm1, %v8986_v5  ;;  %v1969_v9 = vmul.f32 %v9255_v24, %v9255_v24 }
 0x2ce   :  { %v2054_v11 = vpop.f32.mrb[66].mxu1  ;;  %7712 = vmatpush3.bf16.msra.mxu1 %v9263_v12  ;;  %7718 = vmatpush3.bf16.msra.mxu0 %v9164_v48 }
 0x2cf   :  { %v7284_v35 = vpop.f32.mrb[67].mxu1  ;;  %v1970_v39 = vsel %vm86_vm1, %v1969_v9, 0.0  ;;  %7719 = vmatprep.subr.bf16.mxu0 %v8278_v0  ;;  %7725 = vmatprep.subr.bf16.mxu1 %v8278_v0 }
 0x2d0   :  { %1971 = vadd.xlane.f32.xlu0 %v1970_v39  ;;  %v2091_v15 = vpop.f32.mrb[68].mxu0  ;;  %7721 = vmatprep.mubr.msk.bf16.mxu0 %vm8279_vm0, %v8278_v0 }
 0x2d1   :  { %v2097_v16 = vadd.f32 %v2091_v15, %v2052_v55  ;;  %v7291_v4 = vpop.f32.mrb[69].mxu0  ;;  %7714 = vmatmul.mubr.msk.bf16.vlgmr.msra.gmra.mrb[172].mxu1 %vm86_vm1, %v9088_v44 }
 0x2d2   :  { %v2094_v17 = vpop.f32.mrb[70].mxu0  ;;  %7720 = vmatpush3.bf16.msra.mxu0 %v9173_v36  ;;  %7726 = vmatpush3.bf16.msra.mxu1 %v9176_v38 }
 0x2d3   :  { %v7292_v58 = vpop.f32.mrb[71].mxu0  ;;  %7727 = vmatprep.subr.bf16.mxu1 %v8278_v0  ;;  %7733 = vmatprep.subr.bf16.mxu0 %v8278_v0 }
 0x2d4   :  { %v2132_v22 = vpop.f32.mrb[68].mxu1  ;;  %7729 = vmatprep.mubr.msk.bf16.mxu1 %vm8279_vm0, %v8278_v0 }
 0x2d5   :  { %v2138_v1 = vadd.f32 %v2132_v22, %v2097_v16  ;;  %v7299_v45 = vpop.f32.mrb[69].mxu1  ;;  %7722 = vmatmul.mubr.msk.bf16.vlgmr.msra.gmra.mrb[176].mxu0 %vm86_vm1, %v9191_v6  ;;  %v9350_v22 = vld [vmem:[#allocation4 + $0x28] sm:$0xff]  }
 0x2d6   :  { %v2135_v37 = vpop.f32.mrb[70].mxu1  ;;  %7728 = vmatpush3.bf16.msra.mxu1 %v9187_v23  ;;  %7734 = vmatpush3.bf16.msra.mxu0 %v8776_v32 }
 0x2d7   :  { %v2139_v38 = vadd.f32 %v9103_v27, %v2138_v1  ;;  %v7300_v59 = vpop.f32.mrb[71].mxu1  ;;  %7735 = vmatprep.subr.bf16.mxu0 %v8278_v0  ;;  %7741 = vmatprep.subr.bf16.mxu1 %v8278_v0  ;;  %v9353_v1 = vld [vmem:[#allocation4 + $0x10] sm:$0xff]  }
 0x2d8   :  { %v2206_v10 = vpop.f32.mrb[72].mxu0  ;;  %7737 = vmatprep.mubr.msk.bf16.mxu0 %vm8279_vm0, %v8278_v0 }
 0x2d9   :  { %v2140_v31 = vmul.f32 0.2, %v2139_v38  ;;  %v7307_v49 = vpop.f32.mrb[73].mxu0  ;;  %7730 = vmatmul.mubr.msk.bf16.vlgmr.msra.gmra.mrb[176].mxu1 %vm86_vm1, %v9286_v56 }
 0x2da   :  { %v2209_v23 = vpop.f32.mrb[74].mxu0  ;;  %7736 = vmatpush3.bf16.msra.mxu0 %v8786_v34  ;;  %7742 = vmatpush3.bf16.msra.mxu1 %v8832_v61 }
 0x2db   :  { %v7308_v32 = vpop.f32.mrb[75].mxu0  ;;  %7743 = vmatprep.subr.bf16.mxu1 %v8278_v0  ;;  %7749 = vmatprep.subr.bf16.mxu0 %v8278_v0  ;;  %v9298_v30 = vmax.f32 %v2139_v38, %v2140_v31  ;;  %v9366_v23 = vld [vmem:[#allocation4 + $0x18] sm:$0xff]  }
 0x2dc   :  { %v2258_v33 = vpop.f32.mrb[72].mxu1  ;;  %7745 = vmatprep.mubr.msk.bf16.mxu1 %vm8279_vm0, %v8278_v0 }
 0x2dd   :  { %v2259_v7 = vadd.f32 %v2258_v33, %v2206_v10  ;;  %v7315_v42 = vpop.f32.mrb[73].mxu1  ;;  %7738 = vmatmul.mubr.msk.bf16.vlgmr.msra.gmra.mrb[180].mxu0 %vm86_vm1, %v8738_v19  ;;  %v2142_v34 = vmul.f32 %v9298_v30, %v9298_v30 }
 0x2de   :  { %v2261_v61 = vpop.f32.mrb[74].mxu1  ;;  %7744 = vmatpush3.bf16.msra.mxu1 %v8844_v62  ;;  %7750 = vmatpush3.bf16.msra.mxu0 %v9221_v25 }
 0x2df   :  { %v7316_v43 = vpop.f32.mrb[75].mxu1  ;;  %v2143_v51 = vsel %vm86_vm1, %v2142_v34, 0.0  ;;  %7751 = vmatprep.subr.bf16.mxu0 %v8278_v0  ;;  %7757 = vmatprep.subr.bf16.mxu1 %v8278_v0 }
 0x2e0   :  { %2144 = vadd.xlane.f32.xlu1 %v2143_v51  ;;  %v2298_v52 = vpop.f32.mrb[76].mxu0  ;;  %7753 = vmatprep.mubr.msk.bf16.mxu0 %vm8279_vm0, %v8278_v0 }
 0x2e1   :  { %v2304_v19 = vadd.f32 %v2298_v52, %v2259_v7  ;;  %v7323_v53 = vpop.f32.mrb[77].mxu0  ;;  %7746 = vmatmul.mubr.msk.bf16.vlgmr.msra.gmra.mrb[180].mxu1 %vm86_vm1, %v8684_v13 }
 0x2e2   :  { %v2301_v62 = vpop.f32.mrb[78].mxu0  ;;  %7752 = vmatpush3.bf16.msra.mxu0 %v9230_v26  ;;  %7758 = vmatpush3.bf16.msra.mxu1 %v9131_v2 }
 0x2e3   :  { %v7324_v40 = vpop.f32.mrb[79].mxu0  ;;  %7759 = vmatprep.subr.bf16.mxu1 %v8278_v0  ;;  %7765 = vmatprep.subr.bf16.mxu0 %v8278_v0 }
 0x2e4   :  { %v2339_v54 = vpop.f32.mrb[76].mxu1  ;;  %7761 = vmatprep.mubr.msk.bf16.mxu1 %vm8279_vm0, %v8278_v0 }
 0x2e5   :  { %v2345_v63 = vadd.f32 %v2339_v54, %v2304_v19  ;;  %v7331_v50 = vpop.f32.mrb[77].mxu1  ;;  %7754 = vmatmul.mubr.msk.bf16.vlgmr.msra.gmra.mrb[184].mxu0 %vm86_vm1, %v8911_v20 }
 0x2e6   :  { %v2342_v13 = vpop.f32.mrb[78].mxu1  ;;  %7760 = vmatpush3.bf16.msra.mxu1 %v9141_v14  ;;  %7766 = vmatpush3.bf16.msra.mxu0 %v9250_v57 }
 0x2e7   :  { %v7332_v55 = vpop.f32.mrb[79].mxu1  ;;  %7767 = vmatprep.subr.bf16.mxu0 %v8278_v0  ;;  %7773 = vmatprep.subr.bf16.mxu1 %v8278_v0  ;;  %v9394_v13 = vld [vmem:[#allocation4] sm:$0xff]  }
 0x2e8   :  { %v2383_v8 = vpop.f32.mrb[80].mxu0  ;;  %7769 = vmatprep.mubr.msk.bf16.mxu0 %vm8279_vm0, %v8278_v0 }
 0x2e9   :  { %v2389_v9 = vadd.f32 %v2383_v8, %v2345_v63  ;;  %v7339_v11 = vpop.f32.mrb[81].mxu0  ;;  %7762 = vmatmul.mubr.msk.bf16.vlgmr.msra.gmra.mrb[184].mxu1 %vm86_vm1, %v8986_v5 }
 0x2ea   :  { %v2386_v35 = vpop.f32.mrb[82].mxu0  ;;  %7768 = vmatpush3.bf16.msra.mxu0 %v9263_v12  ;;  %7774 = vmatpush3.bf16.msra.mxu1 %v9164_v48  ;;  %v9340_v12 = vld [vmem:[#allocation4 + $0x20] sm:$0xff]  }
 0x2eb   :  { %v7340_v57 = vpop.f32.mrb[83].mxu0  ;;  %7775 = vmatprep.subr.bf16.mxu1 %v8278_v0  ;;  %7781 = vmatprep.subr.bf16.mxu0 %v8278_v0 }
 0x2ec   :  { %v2427_v39 = vpop.f32.mrb[80].mxu1  ;;  %7777 = vmatprep.mubr.msk.bf16.mxu1 %vm8279_vm0, %v8278_v0  ;;  %v9403_v57 = vld [vmem:[#allocation4 + $0x8] sm:$0xff]  }
 0x2ed   :  { %v2433_v21 = vadd.f32 %v2427_v39, %v2389_v9  ;;  %v7347_v15 = vpop.f32.mrb[81].mxu1  ;;  %7770 = vmatmul.mubr.msk.bf16.vlgmr.msra.gmra.mrb[188].mxu0 %vm86_vm1, %v9191_v6 }
 0x2ee   :  { %v2430_v16 = vpop.f32.mrb[82].mxu1  ;;  %7776 = vmatpush3.bf16.msra.mxu1 %v9173_v36  ;;  %7782 = vmatpush3.bf16.msra.mxu0 %v9340_v12 }
 0x2ef   :  { %v2434_v48 = vadd.f32 %v9103_v27, %v2433_v21  ;;  %v7348_v4 = vpop.f32.mrb[83].mxu1  ;;  %7783 = vmatprep.subr.bf16.mxu0 %v8278_v0  ;;  %7789 = vmatprep.subr.bf16.mxu1 %v8278_v0 }
 0x2f0   :  { %v2483_v17 = vpop.f32.mrb[84].mxu0  ;;  %7785 = vmatprep.mubr.msk.bf16.mxu0 %vm8279_vm0, %v8278_v0 }
 0x2f1   :  { %v2435_v58 = vmul.f32 0.2, %v2434_v48  ;;  %v7355_v41 = vpop.f32.mrb[85].mxu0  ;;  %7778 = vmatmul.mubr.msk.bf16.vlgmr.msra.gmra.mrb[188].mxu1 %vm86_vm1, %v9286_v56 }
 0x2f2   :  { %v2486_v36 = vpop.f32.mrb[86].mxu0  ;;  %7784 = vmatpush3.bf16.msra.mxu0 %v9350_v22  ;;  %7790 = vmatpush3.bf16.msra.mxu1 %v9353_v1 }
 0x2f3   :  { %v7356_v45 = vpop.f32.mrb[87].mxu0  ;;  %7791 = vmatprep.subr.bf16.mxu1 %v8278_v0  ;;  %7797 = vmatprep.subr.bf16.mxu0 %v8278_v0  ;;  %v9358_v37 = vmax.f32 %v2434_v48, %v2435_v58 }
 0x2f4   :  { %v2535_v38 = vpop.f32.mrb[84].mxu1  ;;  %7793 = vmatprep.mubr.msk.bf16.mxu1 %vm8279_vm0, %v8278_v0 }
 0x2f5   :  { %v2536_v59 = vadd.f32 %v2535_v38, %v2483_v17  ;;  %v7363_v10 = vpop.f32.mrb[85].mxu1  ;;  %7786 = vmatmul.mubr.msk.bf16.vlgmr.msra.gmra.mrb[192].mxu0 %vm86_vm1, %v8834_v47  ;;  %v2437_v31 = vmul.f32 %v9358_v37, %v9358_v37 }
 0x2f6   :  { %v2538_v49 = vpop.f32.mrb[86].mxu1  ;;  %7792 = vmatpush3.bf16.msra.mxu1 %v9366_v23  ;;  %7798 = vmatpush3.bf16.msra.mxu0 %v9131_v2 }
 0x2f7   :  { %v7364_v32 = vpop.f32.mrb[87].mxu1  ;;  %v2438_v33 = vsel %vm86_vm1, %v2437_v31, 0.0  ;;  %7799 = vmatprep.subr.bf16.mxu0 %v8278_v0  ;;  %7805 = vmatprep.subr.bf16.mxu1 %v8278_v0 }
 0x2f8   :  { %2439 = vadd.xlane.f32.xlu0 %v2438_v33  ;;  %v2575_v7 = vpop.f32.mrb[88].mxu0  ;;  %7801 = vmatprep.mubr.msk.bf16.mxu0 %vm8279_vm0, %v8278_v0 }
 0x2f9   :  { %v2581_v42 = vadd.f32 %v2575_v7, %v2536_v59  ;;  %v7371_v34 = vpop.f32.mrb[89].mxu0  ;;  %7794 = vmatmul.mubr.msk.bf16.vlgmr.msra.gmra.mrb[192].mxu1 %vm86_vm1, %v8822_v46 }
 0x2fa   :  { %v2578_v61 = vpop.f32.mrb[90].mxu0  ;;  %7800 = vmatpush3.bf16.msra.mxu0 %v9141_v14  ;;  %7806 = vmatpush3.bf16.msra.mxu1 %v9144_v3 }
 0x2fb   :  { %v7372_v43 = vpop.f32.mrb[91].mxu0  ;;  %7807 = vmatprep.subr.bf16.mxu1 %v8278_v0  ;;  %7813 = vmatprep.subr.bf16.mxu0 %v8278_v0 }
 0x2fc   :  { %v2616_v51 = vpop.f32.mrb[88].mxu1  ;;  %7809 = vmatprep.mubr.msk.bf16.mxu1 %vm8279_vm0, %v8278_v0 }
 0x2fd   :  { %v2622_v52 = vadd.f32 %v2616_v51, %v2581_v42  ;;  %v7379_v19 = vpop.f32.mrb[89].mxu1  ;;  %7802 = vmatmul.mubr.msk.bf16.vlgmr.msra.gmra.mrb[196].mxu0 %vm86_vm1, %v9078_v28 }
 0x2fe   :  { %v2619_v53 = vpop.f32.mrb[90].mxu1  ;;  %7808 = vmatpush3.bf16.msra.mxu1 %v9153_v18  ;;  %7814 = vmatpush3.bf16.msra.mxu0 %v9353_v1 }
 0x2ff   :  { %v7380_v62 = vpop.f32.mrb[91].mxu1  ;;  %7815 = vmatprep.subr.bf16.mxu0 %v8278_v0  ;;  %7821 = vmatprep.subr.bf16.mxu1 %v8278_v0 }
 0x300   :  { %v2657_v40 = vpop.f32.mrb[92].mxu0  ;;  %7817 = vmatprep.mubr.msk.bf16.mxu0 %vm8279_vm0, %v8278_v0 }
 0x301   :  { %v2663_v54 = vadd.f32 %v2657_v40, %v2622_v52  ;;  %v7387_v63 = vpop.f32.mrb[93].mxu0  ;;  %7810 = vmatmul.mubr.msk.bf16.vlgmr.msra.gmra.mrb[196].mxu1 %vm86_vm1, %v9088_v44 }
 0x302   :  { %v2660_v50 = vpop.f32.mrb[94].mxu0  ;;  %7816 = vmatpush3.bf16.msra.mxu0 %v9366_v23  ;;  %7822 = vmatpush3.bf16.msra.mxu1 %v9394_v13 }
 0x303   :  { %v7388_v55 = vpop.f32.mrb[95].mxu0  ;;  %7823 = vmatprep.subr.bf16.mxu1 %v8278_v0  ;;  %7829 = vmatprep.subr.bf16.mxu0 %v8278_v0 }
 0x304   :  { %v2698_v8 = vpop.f32.mrb[92].mxu1  ;;  %7825 = vmatprep.mubr.msk.bf16.mxu1 %vm8279_vm0, %v8278_v0 }
 0x305   :  { %v2704_v9 = vadd.f32 %v2698_v8, %v2663_v54  ;;  %v7395_v11 = vpop.f32.mrb[93].mxu1  ;;  %7818 = vmatmul.mubr.msk.bf16.vlgmr.msra.gmra.mrb[200].mxu0 %vm86_vm1, %v8834_v47 }
 0x306   :  { %v2701_v35 = vpop.f32.mrb[94].mxu1  ;;  %7824 = vmatpush3.bf16.msra.mxu1 %v9403_v57  ;;  %7830 = vmatpush3.bf16.msra.mxu0 %v9340_v12 }
 0x307   :  { %v7396_v39 = vpop.f32.mrb[95].mxu1  ;;  %7831 = vmatprep.subr.bf16.mxu0 %v8278_v0  ;;  %7837 = vmatprep.subr.bf16.mxu1 %v8278_v0 }
 0x308   :  { %v2739_v21 = vpop.f32.mrb[96].mxu0  ;;  %7833 = vmatprep.mubr.msk.bf16.mxu0 %vm8279_vm0, %v8278_v0 }
 0x309   :  { %v2745_v15 = vadd.f32 %v2739_v21, %v2704_v9  ;;  %v7403_v16 = vpop.f32.mrb[97].mxu0  ;;  %7826 = vmatmul.mubr.msk.bf16.vlgmr.msra.gmra.mrb[200].mxu1 %vm86_vm1, %v8822_v46 }
 0x30a   :  { %v2742_v48 = vpop.f32.mrb[98].mxu0  ;;  %7832 = vmatpush3.bf16.msra.mxu0 %v9350_v22  ;;  %7838 = vmatpush3.bf16.msra.mxu1 %v9221_v25 }
 0x30b   :  { %v7404_v4 = vpop.f32.mrb[99].mxu0  ;;  %7839 = vmatprep.subr.bf16.mxu1 %v8278_v0  ;;  %7845 = vmatprep.subr.bf16.mxu0 %v8278_v0 }
 0x30c   :  { %v2780_v17 = vpop.f32.mrb[96].mxu1  ;;  %7841 = vmatprep.mubr.msk.bf16.mxu1 %vm8279_vm0, %v8278_v0 }
 0x30d   :  { %v2786_v58 = vadd.f32 %v2780_v17, %v2745_v15  ;;  %v7411_v41 = vpop.f32.mrb[97].mxu1  ;;  %7834 = vmatmul.mubr.msk.bf16.vlgmr.msra.gmra.mrb[204].mxu0 %vm86_vm1, %v8911_v20 }
 0x30e   :  { %v2783_v46 = vpop.f32.mrb[98].mxu1  ;;  %7840 = vmatpush3.bf16.msra.mxu1 %v9230_v26  ;;  %7846 = vmatpush3.bf16.msra.mxu0 %v9131_v2 }
 0x30f   :  { %v7412_v36 = vpop.f32.mrb[99].mxu1  ;;  %7847 = vmatprep.subr.bf16.mxu0 %v8278_v0  ;;  %7853 = vmatprep.subr.bf16.mxu1 %v8278_v0 }
 0x310   :  { %v2824_v45 = vpop.f32.mrb[100].mxu0  ;;  %7849 = vmatprep.mubr.msk.bf16.mxu0 %vm8279_vm0, %v8278_v0 }
 0x311   :  { %v2830_v38 = vadd.f32 %v2824_v45, %v2786_v58  ;;  %v7419_v59 = vpop.f32.mrb[101].mxu0  ;;  %7842 = vmatmul.mubr.msk.bf16.vlgmr.msra.gmra.mrb[204].mxu1 %vm86_vm1, %v9078_v28 }
 0x312   :  { %v2827_v10 = vpop.f32.mrb[102].mxu0  ;;  %7848 = vmatpush3.bf16.msra.mxu0 %v9141_v14  ;;  %7854 = vmatpush3.bf16.msra.mxu1 %v9144_v3 }
 0x313   :  { %v2831_v31 = vadd.f32 %v9103_v27, %v2830_v38  ;;  %v7420_v49 = vpop.f32.mrb[103].mxu0  ;;  %7855 = vmatprep.subr.bf16.mxu1 %v8278_v0  ;;  %7861 = vmatprep.subr.bf16.mxu0 %v8278_v0 }
 0x314   :  { %v2876_v32 = vpop.f32.mrb[100].mxu1  ;;  %7857 = vmatprep.mubr.msk.bf16.mxu1 %vm8279_vm0, %v8278_v0 }
 0x315   :  { %v2832_v33 = vmul.f32 0.2, %v2831_v31  ;;  %v7427_v7 = vpop.f32.mrb[101].mxu1  ;;  %7850 = vmatmul.mubr.msk.bf16.vlgmr.msra.gmra.mrb[208].mxu0 %vm86_vm1, %v9088_v44 }
 0x316   :  { %v2879_v28 = vpop.f32.mrb[102].mxu1  ;;  %7856 = vmatpush3.bf16.msra.mxu1 %v9153_v18  ;;  %7862 = vmatpush3.bf16.msra.mxu0 %v9353_v1 }
 0x317   :  { %v7428_v42 = vpop.f32.mrb[103].mxu1  ;;  %7863 = vmatprep.subr.bf16.mxu0 %v8278_v0  ;;  %7869 = vmatprep.subr.bf16.mxu1 %v8278_v0  ;;  %v9442_v34 = vmax.f32 %v2831_v31, %v2832_v33 }
 0x318   :  { %v2916_v61 = vpop.f32.mrb[104].mxu0  ;;  %7865 = vmatprep.mubr.msk.bf16.mxu0 %vm8279_vm0, %v8278_v0 }
 0x319   :  { %v2917_v43 = vadd.f32 %v2916_v61, %v2876_v32  ;;  %v7435_v51 = vpop.f32.mrb[105].mxu0  ;;  %7858 = vmatmul.mubr.msk.bf16.vlgmr.msra.gmra.mrb[208].mxu1 %vm86_vm1, %v9191_v6  ;;  %v2834_v52 = vmul.f32 %v9442_v34, %v9442_v34 }
 0x31a   :  { %v2919_v19 = vpop.f32.mrb[106].mxu0  ;;  %7864 = vmatpush3.bf16.msra.mxu0 %v9366_v23  ;;  %7870 = vmatpush3.bf16.msra.mxu1 %v9394_v13 }
 0x31b   :  { %v7436_v53 = vpop.f32.mrb[107].mxu0  ;;  %v2835_v62 = vsel %vm86_vm1, %v2834_v52, 0.0  ;;  %7871 = vmatprep.subr.bf16.mxu1 %v8278_v0  ;;  %7877 = vmatprep.subr.bf16.mxu0 %v8278_v0 }
 0x31c   :  { %v2956_v40 = vpop.f32.mrb[104].mxu1  ;;  %2836 = vadd.xlane.f32.xlu1 %v2835_v62  ;;  %7873 = vmatprep.mubr.msk.bf16.mxu1 %vm8279_vm0, %v8278_v0  ;;  %v9538_v53 = vld [vmem:[%s9762_s5 + $0x8] sm:$0xff]  }
 0x31d   :  { %v2962_v54 = vadd.f32 %v2956_v40, %v2917_v43  ;;  %v7443_v63 = vpop.f32.mrb[105].mxu1  ;;  %7866 = vmatmul.mubr.msk.bf16.vlgmr.msra.gmra.mrb[212].mxu0 %vm86_vm1, %v8911_v20 }
 0x31e   :  { %v2959_v50 = vpop.f32.mrb[106].mxu1  ;;  %7872 = vmatpush3.bf16.msra.mxu1 %v9403_v57  ;;  %7878 = vmatpush3.bf16.msra.mxu0 %v9340_v12 }
 0x31f   :  { %v7444_v55 = vpop.f32.mrb[107].mxu1  ;;  %7879 = vmatprep.subr.bf16.mxu0 %v8278_v0  ;;  %7885 = vmatprep.subr.bf16.mxu1 %v8278_v0 }
 0x320   :  { %v2997_v8 = vpop.f32.mrb[108].mxu0  ;;  %7881 = vmatprep.mubr.msk.bf16.mxu0 %vm8279_vm0, %v8278_v0 }
 0x321   :  { %v3003_v9 = vadd.f32 %v2997_v8, %v2962_v54  ;;  %v7451_v11 = vpop.f32.mrb[109].mxu0  ;;  %7874 = vmatmul.mubr.msk.bf16.vlgmr.msra.gmra.mrb[212].mxu1 %vm86_vm1, %v8834_v47 }
 0x322   :  { %v3000_v35 = vpop.f32.mrb[110].mxu0  ;;  %7880 = vmatpush3.bf16.msra.mxu0 %v9350_v22  ;;  %7886 = vmatpush3.bf16.msra.mxu1 %v9221_v25 }
 0x323   :  { %v7452_v12 = vpop.f32.mrb[111].mxu0  ;;  %7887 = vmatprep.subr.bf16.mxu1 %v8278_v0  ;;  %7893 = vmatprep.subr.bf16.mxu0 %v8278_v0 }
 0x324   :  { %v3038_v39 = vpop.f32.mrb[108].mxu1  ;;  %7889 = vmatprep.mubr.msk.bf16.mxu1 %vm8279_vm0, %v8278_v0 }
 0x325   :  { %v3044_v21 = vadd.f32 %v3038_v39, %v3003_v9  ;;  %v7459_v15 = vpop.f32.mrb[109].mxu1  ;;  %7882 = vmatmul.mubr.msk.bf16.vlgmr.msra.gmra.mrb[216].mxu0 %vm86_vm1, %v8986_v5 }
 0x326   :  { %v3041_v47 = vpop.f32.mrb[110].mxu1  ;;  %7888 = vmatpush3.bf16.msra.mxu1 %v9230_v26  ;;  %7894 = vmatpush3.bf16.msra.mxu0 %v9131_v2 }
 0x327   :  { %v7460_v22 = vpop.f32.mrb[111].mxu1  ;;  %7895 = vmatprep.subr.bf16.mxu0 %v8278_v0  ;;  %7901 = vmatprep.subr.bf16.mxu1 %v8278_v0 }
 0x328   :  { %v3079_v16 = vpop.f32.mrb[112].mxu0  ;;  %7897 = vmatprep.mubr.msk.bf16.mxu0 %vm8279_vm0, %v8278_v0 }
 0x329   :  { %v3085_v48 = vadd.f32 %v3079_v16, %v3044_v21  ;;  %v7467_v4 = vpop.f32.mrb[113].mxu0  ;;  %7890 = vmatmul.mubr.msk.bf16.vlgmr.msra.gmra.mrb[216].mxu1 %vm86_vm1, %v9088_v44 }
 0x32a   :  { %v3082_v17 = vpop.f32.mrb[114].mxu0  ;;  %7896 = vmatpush3.bf16.msra.mxu0 %v9141_v14  ;;  %7902 = vmatpush3.bf16.msra.mxu1 %v9144_v3 }
 0x32b   :  { %v7468_v58 = vpop.f32.mrb[115].mxu0  ;;  %7903 = vmatprep.subr.bf16.mxu1 %v8278_v0  ;;  %7909 = vmatprep.subr.bf16.mxu0 %v8278_v0 }
 0x32c   :  { %v3120_v41 = vpop.f32.mrb[112].mxu1  ;;  %7905 = vmatprep.mubr.msk.bf16.mxu1 %vm8279_vm0, %v8278_v0 }
 0x32d   :  { %v3126_v46 = vadd.f32 %v3120_v41, %v3085_v48  ;;  %v7475_v36 = vpop.f32.mrb[113].mxu1  ;;  %7898 = vmatmul.mubr.msk.bf16.vlgmr.msra.gmra.mrb[220].mxu0 %vm86_vm1, %v9191_v6  ;;  %v1416_v44 = vpop.xlane.xlu0 %1415 }
 0x32e   :  { %v1417_v45 = vmul.f32 0.03125, %v1416_v44  ;;  %v3123_v38 = vpop.f32.mrb[114].mxu1  ;;  %7904 = vmatpush3.bf16.msra.mxu1 %v9153_v18  ;;  %7910 = vmatpush3.bf16.msra.mxu0 %v9353_v1 }
 0x32f   :  { %v7476_v3 = vpop.f32.mrb[115].mxu1  ;;  %7911 = vmatprep.subr.bf16.mxu0 %v8278_v0  ;;  %7917 = vmatprep.subr.bf16.mxu1 %v8278_v0 }
 0x330   :  { %v1418_v59 = vadd.f32 1e-08, %v1417_v45  ;;  %v3161_v10 = vpop.f32.mrb[116].mxu0  ;;  %7913 = vmatprep.mubr.msk.bf16.mxu0 %vm8279_vm0, %v8278_v0 }
 0x331   :  { %v3167_v31 = vadd.f32 %v3161_v10, %v3126_v46  ;;  %v7483_v49 = vpop.f32.mrb[117].mxu0  ;;  %7906 = vmatmul.mubr.msk.bf16.vlgmr.msra.gmra.mrb[220].mxu1 %vm86_vm1, %v9286_v56  ;;  %v9566_v46 = vld [vmem:[%s9761_s4] ss:$0 sm:$0xff] }
 0x332   :  { %8173 = vrsqrt.f32 %v1418_v59  ;;  %v3164_v32 = vpop.f32.mrb[118].mxu0  ;;  %7912 = vmatpush3.bf16.msra.mxu0 %v9366_v23  ;;  %7918 = vmatpush3.bf16.msra.mxu1 %v9394_v13 }
 0x333   :  { %v7484_v18 = vpop.f32.mrb[119].mxu0  ;;  %7919 = vmatprep.subr.bf16.mxu1 %v8278_v0  ;;  %7925 = vmatprep.subr.bf16.mxu0 %v8278_v0 }
 0x334   :  { %v3205_v1 = vpop.f32.mrb[116].mxu1  ;;  %7921 = vmatprep.mubr.msk.bf16.mxu1 %vm8279_vm0, %v8278_v0 }
 0x335   :  { %v3211_v33 = vadd.f32 %v3205_v1, %v3167_v31  ;;  %v7491_v7 = vpop.f32.mrb[117].mxu1  ;;  %7914 = vmatmul.mubr.msk.bf16.vlgmr.msra.gmra.mrb[224].mxu0 %vm86_vm1, %v8986_v5 }
 0x336   :  { %v3208_v28 = vpop.f32.mrb[118].mxu1  ;;  %7920 = vmatpush3.bf16.msra.mxu1 %v9403_v57  ;;  %7926 = vmatpush3.bf16.msra.mxu0 %v9221_v25 }
 0x337   :  { %v3212_v23 = vadd.f32 %v9103_v27, %v3211_v33  ;;  %v7492_v13 = vpop.f32.mrb[119].mxu1  ;;  %7927 = vmatprep.subr.bf16.mxu0 %v8278_v0  ;;  %7933 = vmatprep.subr.bf16.mxu1 %v8278_v0  ;;  %v9521_v27 = vld [vmem:[%s9762_s5] sm:$0xff]  }
 0x338   :  { %v3257_v42 = vpop.f32.mrb[120].mxu0  ;;  %7929 = vmatprep.mubr.msk.bf16.mxu0 %vm8279_vm0, %v8278_v0 }
 0x339   :  { %v3213_v61 = vmul.f32 0.2, %v3212_v23  ;;  %v7499_v43 = vpop.f32.mrb[121].mxu0  ;;  %7922 = vmatmul.mubr.msk.bf16.vlgmr.msra.gmra.mrb[224].mxu1 %vm86_vm1, %v8911_v20 }
 0x33a   :  { %v3260_v5 = vpop.f32.mrb[122].mxu0  ;;  %7928 = vmatpush3.bf16.msra.mxu0 %v9230_v26  ;;  %7934 = vmatpush3.bf16.msra.mxu1 %v9131_v2 }
 0x33b   :  { %v7500_v25 = vpop.f32.mrb[123].mxu0  ;;  %7935 = vmatprep.subr.bf16.mxu1 %v8278_v0  ;;  %7941 = vmatprep.subr.bf16.mxu0 %v8278_v0  ;;  %v9525_v57 = vmax.f32 %v3212_v23, %v3213_v61 }
 0x33c   :  { %v8174_v51 = vpop.eup %8173  ;;  %v3297_v52 = vpop.f32.mrb[120].mxu1  ;;  %7937 = vmatprep.mubr.msk.bf16.mxu1 %vm8279_vm0, %v8278_v0 }
 0x33d   :  { %v3298_v20 = vadd.f32 %v3297_v52, %v3257_v42  ;;  %v7507_v26 = vpop.f32.mrb[121].mxu1  ;;  %7930 = vmatmul.mubr.msk.bf16.vlgmr.msra.gmra.mrb[228].mxu0 %vm86_vm1, %v9191_v6  ;;  %v3215_v2 = vmul.f32 %v9525_v57, %v9525_v57  ;;  %v1420_v6 = vmul.f32 %v8174_v51, %v9122_v60 }
 0x33e   :  { %v3300_v19 = vpop.f32.mrb[122].mxu1  ;;  %7936 = vmatpush3.bf16.msra.mxu1 %v9141_v14  ;;  %7942 = vmatpush3.bf16.msra.mxu0 %v9521_v27 }
 0x33f   :  { %v7508_v62 = vpop.f32.mrb[123].mxu1  ;;  %v3216_v40 = vsel %vm86_vm1, %v3215_v2, 0.0  ;;  %7943 = vmatprep.subr.bf16.mxu0 %v8278_v0  ;;  %7945 = vmatprep.mubr.msk.bf16.mxu0 %vm8279_vm0, %v8278_v0  ;;  %v5612_v8 = vpack.c.bf16 %v1420_v6, %v1420_v6 }
 0x340   :  { %3217 = vadd.xlane.f32.xlu0 %v3216_v40  ;;  %v3337_v54 = vpop.f32.mrb[124].mxu0  ;;  %7949 = vmatprep.subr.bf16.mxu1 %v8278_v0 }
 0x341   :  { %v3343_v14 = vadd.f32 %v3337_v54, %v3298_v20  ;;  %v7515_v63 = vpop.f32.mrb[125].mxu0  ;;  %7938 = vmatmul.mubr.msk.bf16.vlgmr.msra.gmra.mrb[228].mxu1 %vm86_vm1, %v9286_v56 }
 0x342   :  { %v3340_v50 = vpop.f32.mrb[126].mxu0  ;;  %7944 = vmatpush3.bf16.msra.mxu0 %v9538_v53  ;;  %7950 = vmatpush3.bf16.msra.mxu1 %v9521_v27 }
 0x343   :  { %v7516_v55 = vpop.f32.mrb[127].mxu0  ;;  %7951 = vmatprep.subr.bf16.mxu1 %v8278_v0  ;;  %7953 = vmatprep.mubr.msk.bf16.mxu1 %vm8279_vm0, %v8278_v0 }
 0x344   :  { %v3378_v60 = vpop.f32.mrb[124].mxu1  ;;  %7957 = vmatprep.subr.bf16.mxu0 %v8278_v0 }
 0x345   :  { %v3384_v9 = vadd.f32 %v3378_v60, %v3343_v14  ;;  %v7523_v11 = vpop.f32.mrb[125].mxu1  ;;  %7946 = vmatmul.mubr.msk.bf16.vlgmr.msra.gmra.mrb[232].mxu0 %vm86_vm1, %v5612_v8  ;;  %v1711_v56 = vpop.xlane.xlu1 %1710 }
 0x346   :  { %v1712_v35 = vmul.f32 0.03125, %v1711_v56  ;;  %v3381_v12 = vpop.f32.mrb[126].mxu1  ;;  %7952 = vmatpush3.bf16.msra.mxu1 %v9538_v53  ;;  %7958 = vmatpush3.bf16.msra.mxu0 %v9521_v27 }
 0x347   :  { %v7524_v39 = vpop.f32.mrb[127].mxu1  ;;  %7959 = vmatprep.subr.bf16.mxu0 %v8278_v0  ;;  %7961 = vmatprep.mubr.msk.bf16.mxu0 %vm8279_vm0, %v8278_v0 }
 0x348   :  { %v1713_v21 = vadd.f32 1e-08, %v1712_v35  ;;  %v3419_v15 = vpop.f32.mrb[128].mxu0  ;;  %7965 = vmatprep.subr.bf16.mxu1 %v8278_v0 }
 0x349   :  { %v3425_v47 = vadd.f32 %v3419_v15, %v3384_v9  ;;  %v7531_v22 = vpop.f32.mrb[129].mxu0 }
 0x34a   :  { %8175 = vrsqrt.f32 %v1713_v21  ;;  %v3422_v16 = vpop.f32.mrb[130].mxu0  ;;  %7960 = vmatpush3.bf16.msra.mxu0 %v9538_v53 }
 0x34b   :  { %v7532_v48 = vpop.f32.mrb[131].mxu0  ;;  %7973 = vmatprep.subr.bf16.mxu0 %v8278_v0 }
 0x34c   :  { %v3460_v4 = vpop.f32.mrb[128].mxu1 }
 0x34d   :  { %v3466_v17 = vadd.f32 %v3460_v4, %v3425_v47  ;;  %v7539_v58 = vpop.f32.mrb[129].mxu1 }
 0x34e   :  { %v3463_v41 = vpop.f32.mrb[130].mxu1 }
 0x34f   :  { %v3467_v36 = vadd.f32 %v9566_v46, %v3466_v17  ;;  %v7540_v44 = vpop.f32.mrb[131].mxu1 }
 0x350   :  { %v3512_v45 = vpop.f32.mrb[132].mxu0 }
 0x351   :  { %v3468_v38 = vmul.f32 0.2, %v3467_v36  ;;  %v7547_v3 = vpop.f32.mrb[133].mxu0 }
 0x352   :  { %v3515_v59 = vpop.f32.mrb[134].mxu0 }
 0x353   :  { %v7548_v10 = vpop.f32.mrb[135].mxu0  ;;  %v9569_v31 = vmax.f32 %v3467_v36, %v3468_v38 }
 0x354   :  { %v8176_v49 = vpop.eup %8175  ;;  %v3552_v32 = vpop.f32.mrb[132].mxu1 }
 0x355   :  { %v3553_v18 = vadd.f32 %v3552_v32, %v3512_v45  ;;  %v7555_v1 = vpop.f32.mrb[133].mxu1  ;;  %v3470_v33 = vmul.f32 %v9569_v31, %v9569_v31  ;;  %v1715_v7 = vmul.f32 %v8176_v49, %v9195_v29 }
 0x356   :  { %v3555_v28 = vpop.f32.mrb[134].mxu1 }
 0x357   :  { %v7556_v23 = vpop.f32.mrb[135].mxu1  ;;  %v3471_v13 = vsel %vm86_vm1, %v3470_v33, 0.0  ;;  %v5674_v42 = vpack.c.bf16 %v1715_v7, %v1715_v7 }
 0x358   :  { %3472 = vadd.xlane.f32.xlu1 %v3471_v13  ;;  %v3592_v61 = vpop.f32.mrb[136].mxu0 }
 0x359   :  { %v3598_v43 = vadd.f32 %v3592_v61, %v3553_v18  ;;  %v7563_v5 = vpop.f32.mrb[137].mxu0  ;;  %7954 = vmatmul.mubr.msk.bf16.vlgmr.msra.gmra.mrb[232].mxu1 %vm86_vm1, %v5674_v42 }
 0x35a   :  { %v3595_v25 = vpop.f32.mrb[138].mxu0  ;;  %7966 = vmatpush3.bf16.msra.mxu1 %v9521_v27  ;;  %7969 = vmatprep.mubr.msk.bf16.mxu1 %vm8279_vm0, %v8278_v0 }
 0x35b   :  { %v7564_v51 = vpop.f32.mrb[139].mxu0  ;;  %7967 = vmatprep.subr.bf16.mxu1 %v8278_v0 }
 0x35c   :  { %v3633_v29 = vpop.f32.mrb[136].mxu1 }
 0x35d   :  { %v3639_v52 = vadd.f32 %v3633_v29, %v3598_v43  ;;  %v7571_v20 = vpop.f32.mrb[137].mxu1  ;;  %v1972_v26 = vpop.xlane.xlu0 %1971 }
 0x35e   :  { %v1973_v2 = vmul.f32 0.03125, %v1972_v26  ;;  %v3636_v19 = vpop.f32.mrb[138].mxu1  ;;  %7968 = vmatpush3.bf16.msra.mxu1 %v9538_v53 }
 0x35f   :  { %v7572_v62 = vpop.f32.mrb[139].mxu1  ;;  %7981 = vmatprep.subr.bf16.mxu1 %v8278_v0 }
 0x360   :  { %v1974_v40 = vadd.f32 1e-08, %v1973_v2  ;;  %v3677_v6 = vpop.f32.mrb[140].mxu0 }
 0x361   :  { %v3683_v54 = vadd.f32 %v3677_v6, %v3639_v52  ;;  %v7579_v14 = vpop.f32.mrb[141].mxu0 }
 0x362   :  { %8177 = vrsqrt.f32 %v1974_v40  ;;  %v3680_v63 = vpop.f32.mrb[142].mxu0 }
 0x363   :  { %v7580_v50 = vpop.f32.mrb[143].mxu0 }
 0x364   :  { %v3721_v55 = vpop.f32.mrb[140].mxu1 }
 0x365   :  { %v3727_v8 = vadd.f32 %v3721_v55, %v3683_v54  ;;  %v7587_v60 = vpop.f32.mrb[141].mxu1 }
 0x366   :  { %v3724_v9 = vpop.f32.mrb[142].mxu1 }
 0x367   :  { %v3728_v11 = vadd.f32 %v9566_v46, %v3727_v8  ;;  %v7588_v56 = vpop.f32.mrb[143].mxu1 }
 0x368   :  { %v3773_v35 = vpop.f32.mrb[144].mxu0 }
 0x369   :  { %v3729_v12 = vmul.f32 0.2, %v3728_v11  ;;  %v7595_v39 = vpop.f32.mrb[145].mxu0 }
 0x36a   :  { %v3776_v21 = vpop.f32.mrb[146].mxu0 }
 0x36b   :  { %v7596_v15 = vpop.f32.mrb[147].mxu0  ;;  %v9583_v47 = vmax.f32 %v3728_v11, %v3729_v12 }
 0x36c   :  { %v8178_v22 = vpop.eup %8177  ;;  %v3813_v16 = vpop.f32.mrb[144].mxu1 }
 0x36d   :  { %v3814_v48 = vadd.f32 %v3813_v16, %v3773_v35  ;;  %v7603_v4 = vpop.f32.mrb[145].mxu1  ;;  %v2145_v17 = vpop.xlane.xlu1 %2144  ;;  %v3731_v58 = vmul.f32 %v9583_v47, %v9583_v47  ;;  %v1976_v41 = vmul.f32 %v8178_v22, %v9255_v24 }
 0x36e   :  { %v2146_v36 = vmul.f32 0.03125, %v2145_v17  ;;  %v3816_v44 = vpop.f32.mrb[146].mxu1 }
 0x36f   :  { %v7604_v45 = vpop.f32.mrb[147].mxu1  ;;  %v3732_v38 = vsel %vm86_vm1, %v3731_v58, 0.0  ;;  %v5718_v3 = vpack.c.bf16 %v1976_v41, %v1976_v41 }
 0x370   :  { %v2147_v59 = vadd.f32 1e-08, %v2146_v36  ;;  %3733 = vadd.xlane.f32.xlu0 %v3732_v38  ;;  %v3853_v10 = vpop.f32.mrb[148].mxu0 }
 0x371   :  { %v3859_v49 = vadd.f32 %v3853_v10, %v3814_v48  ;;  %v7611_v32 = vpop.f32.mrb[149].mxu0  ;;  %7962 = vmatmul.mubr.msk.bf16.vlgmr.msra.gmra.mrb[236].mxu0 %vm86_vm1, %v5718_v3 }
 0x372   :  { %8179 = vrsqrt.f32 %v2147_v59  ;;  %v3856_v18 = vpop.f32.mrb[150].mxu0  ;;  %7974 = vmatpush3.bf16.msra.mxu0 %v9521_v27  ;;  %7977 = vmatprep.mubr.msk.bf16.mxu0 %vm8279_vm0, %v8278_v0 }
 0x373   :  { %v7612_v24 = vpop.f32.mrb[151].mxu0  ;;  %7975 = vmatprep.subr.bf16.mxu0 %v8278_v0 }
 0x374   :  { %v3894_v1 = vpop.f32.mrb[148].mxu1 }
 0x375   :  { %v3900_v33 = vadd.f32 %v3894_v1, %v3859_v49  ;;  %v7619_v7 = vpop.f32.mrb[149].mxu1 }
 0x376   :  { %v3897_v28 = vpop.f32.mrb[150].mxu1  ;;  %7976 = vmatpush3.bf16.msra.mxu0 %v9538_v53 }
 0x377   :  { %v7620_v23 = vpop.f32.mrb[151].mxu1  ;;  %7989 = vmatprep.subr.bf16.mxu0 %v8278_v0 }
 0x378   :  { %v3935_v13 = vpop.f32.mrb[152].mxu0 }
 0x379   :  { %v3941_v42 = vadd.f32 %v3935_v13, %v3900_v33  ;;  %v7627_v61 = vpop.f32.mrb[153].mxu0 }
 0x37a   :  { %v3938_v43 = vpop.f32.mrb[154].mxu0 }
 0x37b   :  { %v7628_v5 = vpop.f32.mrb[155].mxu0 }
 0x37c   :  { %v8180_v25 = vpop.eup %8179  ;;  %v3976_v51 = vpop.f32.mrb[152].mxu1 }
 0x37d   :  { %v3982_v29 = vadd.f32 %v3976_v51, %v3941_v42  ;;  %v7635_v52 = vpop.f32.mrb[153].mxu1  ;;  %v2149_v20 = vmul.f32 %v8180_v25, %v9298_v30 }
 0x37e   :  { %v3979_v26 = vpop.f32.mrb[154].mxu1 }
 0x37f   :  { %v7636_v2 = vpop.f32.mrb[155].mxu1  ;;  %v5762_v19 = vpack.c.bf16 %v2149_v20, %v2149_v20 }
 0x380   :  { %v4017_v62 = vpop.f32.mrb[156].mxu0 }
 0x381   :  { %v4023_v40 = vadd.f32 %v4017_v62, %v3982_v29  ;;  %v7643_v6 = vpop.f32.mrb[157].mxu0  ;;  %7970 = vmatmul.mubr.msk.bf16.vlgmr.msra.gmra.mrb[236].mxu1 %vm86_vm1, %v5762_v19 }
 0x382   :  { %v4020_v54 = vpop.f32.mrb[158].mxu0  ;;  %7982 = vmatpush3.bf16.msra.mxu1 %v9521_v27  ;;  %7985 = vmatprep.mubr.msk.bf16.mxu1 %vm8279_vm0, %v8278_v0 }
 0x383   :  { %v7644_v14 = vpop.f32.mrb[159].mxu0  ;;  %7983 = vmatprep.subr.bf16.mxu1 %v8278_v0 }
 0x384   :  { %v4058_v63 = vpop.f32.mrb[156].mxu1 }
 0x385   :  { %v4064_v50 = vadd.f32 %v4058_v63, %v4023_v40  ;;  %v7651_v30 = vpop.f32.mrb[157].mxu1  ;;  %v2440_v55 = vpop.xlane.xlu0 %2439 }
 0x386   :  { %v2441_v8 = vmul.f32 0.03125, %v2440_v55  ;;  %v4061_v60 = vpop.f32.mrb[158].mxu1  ;;  %7984 = vmatpush3.bf16.msra.mxu1 %v9538_v53 }
 0x387   :  { %v7652_v9 = vpop.f32.mrb[159].mxu1  ;;  %7997 = vmatprep.subr.bf16.mxu1 %v8278_v0 }
 0x388   :  { %v2442_v11 = vadd.f32 1e-08, %v2441_v8  ;;  %v4102_v56 = vpop.f32.mrb[160].mxu0 }
 0x389   :  { %v4108_v35 = vadd.f32 %v4102_v56, %v4064_v50  ;;  %v7659_v12 = vpop.f32.mrb[161].mxu0 }
 0x38a   :  { %8181 = vrsqrt.f32 %v2442_v11  ;;  %v4105_v39 = vpop.f32.mrb[162].mxu0 }
 0x38b   :  { %v4109_v21 = vadd.f32 %v9566_v46, %v4108_v35  ;;  %v7660_v15 = vpop.f32.mrb[163].mxu0 }
 0x38c   :  { %v4154_v22 = vpop.f32.mrb[160].mxu1 }
 0x38d   :  { %v4110_v16 = vmul.f32 0.2, %v4109_v21  ;;  %v7667_v48 = vpop.f32.mrb[161].mxu1 }
 0x38e   :  { %v4157_v4 = vpop.f32.mrb[162].mxu1 }
 0x38f   :  { %v7668_v17 = vpop.f32.mrb[163].mxu1  ;;  %v9605_v58 = vmax.f32 %v4109_v21, %v4110_v16 }
 0x390   :  { %v4194_v41 = vpop.f32.mrb[164].mxu0 }
 0x391   :  { %v4195_v36 = vadd.f32 %v4194_v41, %v4154_v22  ;;  %v7675_v44 = vpop.f32.mrb[165].mxu0  ;;  %v4112_v45 = vmul.f32 %v9605_v58, %v9605_v58 }
 0x392   :  { %v4197_v38 = vpop.f32.mrb[166].mxu0 }
 0x393   :  { %v7676_v3 = vpop.f32.mrb[167].mxu0  ;;  %v4113_v59 = vsel %vm86_vm1, %v4112_v45, 0.0 }
 0x394   :  { %v8182_v10 = vpop.eup %8181  ;;  %v4234_v49 = vpop.f32.mrb[164].mxu1  ;;  %4114 = vadd.xlane.f32.xlu1 %v4113_v59 }
 0x395   :  { %v4240_v32 = vadd.f32 %v4234_v49, %v4195_v36  ;;  %v7683_v18 = vpop.f32.mrb[165].mxu1  ;;  %v2444_v24 = vmul.f32 %v8182_v10, %v9358_v37 }
 0x396   :  { %v4237_v1 = vpop.f32.mrb[166].mxu1 }
 0x397   :  { %v7684_v33 = vpop.f32.mrb[167].mxu1  ;;  %v5806_v7 = vpack.c.bf16 %v2444_v24, %v2444_v24 }
 0x398   :  { %v4275_v28 = vpop.f32.mrb[168].mxu0 }
 0x399   :  { %v4281_v23 = vadd.f32 %v4275_v28, %v4240_v32  ;;  %v7691_v13 = vpop.f32.mrb[169].mxu0  ;;  %7978 = vmatmul.mubr.msk.bf16.vlgmr.msra.gmra.mrb[240].mxu0 %vm86_vm1, %v5806_v7 }
 0x39a   :  { %v4278_v42 = vpop.f32.mrb[170].mxu0  ;;  %7990 = vmatpush3.bf16.msra.mxu0 %v9521_v27  ;;  %7993 = vmatprep.mubr.msk.bf16.mxu0 %vm8279_vm0, %v8278_v0 }
 0x39b   :  { %v7692_v61 = vpop.f32.mrb[171].mxu0  ;;  %7991 = vmatprep.subr.bf16.mxu0 %v8278_v0 }
 0x39c   :  { %v4316_v43 = vpop.f32.mrb[168].mxu1 }
 0x39d   :  { %v4322_v5 = vadd.f32 %v4316_v43, %v4281_v23  ;;  %v7699_v37 = vpop.f32.mrb[169].mxu1 }
 0x39e   :  { %v4319_v25 = vpop.f32.mrb[170].mxu1  ;;  %7992 = vmatpush3.bf16.msra.mxu0 %v9538_v53 }
 0x39f   :  { %v7700_v51 = vpop.f32.mrb[171].mxu1  ;;  %8005 = vmatprep.subr.bf16.mxu0 %v8278_v0 }
 0x3a0   :  { %v4357_v29 = vpop.f32.mrb[172].mxu0 }
 0x3a1   :  { %v4363_v52 = vadd.f32 %v4357_v29, %v4322_v5  ;;  %v7707_v20 = vpop.f32.mrb[173].mxu0 }
 0x3a2   :  { %v4360_v26 = vpop.f32.mrb[174].mxu0 }
 0x3a3   :  { %v7708_v2 = vpop.f32.mrb[175].mxu0 }
 0x3a4   :  { %v4398_v19 = vpop.f32.mrb[172].mxu1 }
 0x3a5   :  { %v4404_v62 = vadd.f32 %v4398_v19, %v4363_v52  ;;  %v7715_v40 = vpop.f32.mrb[173].mxu1 }
 0x3a6   :  { %v4401_v6 = vpop.f32.mrb[174].mxu1 }
 0x3a7   :  { %v7716_v54 = vpop.f32.mrb[175].mxu1 }
 0x3a8   :  { %v4439_v14 = vpop.f32.mrb[176].mxu0 }
 0x3a9   :  { %v4445_v63 = vadd.f32 %v4439_v14, %v4404_v62  ;;  %v2837_v50 = vpop.xlane.xlu1 %2836  ;;  %v7723_v30 = vpop.f32.mrb[177].mxu0 }
 0x3aa   :  { %v2838_v55 = vmul.f32 0.03125, %v2837_v50  ;;  %v4442_v8 = vpop.f32.mrb[178].mxu0 }
 0x3ab   :  { %v7724_v60 = vpop.f32.mrb[179].mxu0 }
 0x3ac   :  { %v2839_v9 = vadd.f32 1e-08, %v2838_v55  ;;  %v4483_v11 = vpop.f32.mrb[176].mxu1 }
 0x3ad   :  { %v4489_v56 = vadd.f32 %v4483_v11, %v4445_v63  ;;  %v7731_v35 = vpop.f32.mrb[177].mxu1 }
 0x3ae   :  { %8183 = vrsqrt.f32 %v2839_v9  ;;  %v4486_v12 = vpop.f32.mrb[178].mxu1 }
 0x3af   :  { %v4490_v39 = vadd.f32 %v9566_v46, %v4489_v56  ;;  %v7732_v21 = vpop.f32.mrb[179].mxu1 }
 0x3b0   :  { %v4535_v15 = vpop.f32.mrb[180].mxu0 }
 0x3b1   :  { %v4491_v22 = vmul.f32 0.2, %v4490_v39  ;;  %v7739_v16 = vpop.f32.mrb[181].mxu0 }
 0x3b2   :  { %v4538_v48 = vpop.f32.mrb[182].mxu0 }
 0x3b3   :  { %v7740_v4 = vpop.f32.mrb[183].mxu0  ;;  %v9619_v17 = vmax.f32 %v4490_v39, %v4491_v22 }
 0x3b4   :  { %v4575_v41 = vpop.f32.mrb[180].mxu1 }
 0x3b5   :  { %v4576_v36 = vadd.f32 %v4575_v41, %v4535_v15  ;;  %v7747_v44 = vpop.f32.mrb[181].mxu1  ;;  %v4493_v45 = vmul.f32 %v9619_v17, %v9619_v17 }
 0x3b6   :  { %v4578_v38 = vpop.f32.mrb[182].mxu1 }
 0x3b7   :  { %v7748_v3 = vpop.f32.mrb[183].mxu1  ;;  %v4494_v59 = vsel %vm86_vm1, %v4493_v45, 0.0 }
 0x3b8   :  { %v8184_v10 = vpop.eup %8183  ;;  %4495 = vadd.xlane.f32.xlu0 %v4494_v59  ;;  %v4615_v49 = vpop.f32.mrb[184].mxu0 }
 0x3b9   :  { %v4621_v32 = vadd.f32 %v4615_v49, %v4576_v36  ;;  %v7755_v18 = vpop.f32.mrb[185].mxu0  ;;  %v2841_v24 = vmul.f32 %v8184_v10, %v9442_v34 }
 0x3ba   :  { %v4618_v1 = vpop.f32.mrb[186].mxu0 }
 0x3bb   :  { %v7756_v33 = vpop.f32.mrb[187].mxu0  ;;  %v5850_v7 = vpack.c.bf16 %v2841_v24, %v2841_v24 }
 0x3bc   :  { %v4656_v28 = vpop.f32.mrb[184].mxu1 }
 0x3bd   :  { %v4662_v23 = vadd.f32 %v4656_v28, %v4621_v32  ;;  %v7763_v13 = vpop.f32.mrb[185].mxu1  ;;  %7986 = vmatmul.mubr.msk.bf16.vlgmr.msra.gmra.mrb[240].mxu1 %vm86_vm1, %v5850_v7 }
 0x3be   :  { %v4659_v42 = vpop.f32.mrb[186].mxu1  ;;  %7998 = vmatpush3.bf16.msra.mxu1 %v9521_v27  ;;  %8001 = vmatprep.mubr.msk.bf16.mxu1 %vm8279_vm0, %v8278_v0 }
 0x3bf   :  { %v7764_v61 = vpop.f32.mrb[187].mxu1  ;;  %7999 = vmatprep.subr.bf16.mxu1 %v8278_v0 }
 0x3c0   :  { %v4697_v43 = vpop.f32.mrb[188].mxu0 }
 0x3c1   :  { %v4703_v5 = vadd.f32 %v4697_v43, %v4662_v23  ;;  %v7771_v34 = vpop.f32.mrb[189].mxu0 }
 0x3c2   :  { %v4700_v37 = vpop.f32.mrb[190].mxu0  ;;  %8000 = vmatpush3.bf16.msra.mxu1 %v9538_v53 }
 0x3c3   :  { %v7772_v25 = vpop.f32.mrb[191].mxu0  ;;  %8013 = vmatprep.subr.bf16.mxu1 %v8278_v0 }
 0x3c4   :  { %v4738_v51 = vpop.f32.mrb[188].mxu1 }
 0x3c5   :  { %v4744_v29 = vadd.f32 %v4738_v51, %v4703_v5  ;;  %v7779_v52 = vpop.f32.mrb[189].mxu1 }
 0x3c6   :  { %v4741_v20 = vpop.f32.mrb[190].mxu1 }
 0x3c7   :  { %v4745_v26 = vadd.f32 %v9566_v46, %v4744_v29  ;;  %v7780_v2 = vpop.f32.mrb[191].mxu1 }
 0x3c8   :  { %v4790_v19 = vpop.f32.mrb[192].mxu0 }
 0x3c9   :  { %v4746_v62 = vmul.f32 0.2, %v4745_v26  ;;  %v7787_v40 = vpop.f32.mrb[193].mxu0 }
 0x3ca   :  { %v4793_v6 = vpop.f32.mrb[194].mxu0 }
 0x3cb   :  { %v7788_v54 = vpop.f32.mrb[195].mxu0  ;;  %v9633_v14 = vmax.f32 %v4745_v26, %v4746_v62 }
 0x3cc   :  { %v4830_v63 = vpop.f32.mrb[192].mxu1 }
 0x3cd   :  { %v4831_v50 = vadd.f32 %v4830_v63, %v4790_v19  ;;  %v7795_v30 = vpop.f32.mrb[193].mxu1  ;;  %v3218_v55 = vpop.xlane.xlu0 %3217  ;;  %v4748_v8 = vmul.f32 %v9633_v14, %v9633_v14 }
 0x3ce   :  { %v3219_v60 = vmul.f32 0.03125, %v3218_v55  ;;  %v4833_v9 = vpop.f32.mrb[194].mxu1 }
 0x3cf   :  { %v7796_v11 = vpop.f32.mrb[195].mxu1  ;;  %v4749_v56 = vsel %vm86_vm1, %v4748_v8, 0.0 }
 0x3d0   :  { %v3220_v35 = vadd.f32 1e-08, %v3219_v60  ;;  %4750 = vadd.xlane.f32.xlu1 %v4749_v56  ;;  %v4870_v12 = vpop.f32.mrb[196].mxu0 }
 0x3d1   :  { %v4876_v39 = vadd.f32 %v4870_v12, %v4831_v50  ;;  %v7803_v21 = vpop.f32.mrb[197].mxu0 }
 0x3d2   :  { %8185 = vrsqrt.f32 %v3220_v35  ;;  %v4873_v15 = vpop.f32.mrb[198].mxu0 }
 0x3d3   :  { %v7804_v22 = vpop.f32.mrb[199].mxu0 }
 0x3d4   :  { %v4911_v16 = vpop.f32.mrb[196].mxu1 }
 0x3d5   :  { %v4917_v48 = vadd.f32 %v4911_v16, %v4876_v39  ;;  %v7811_v4 = vpop.f32.mrb[197].mxu1 }
 0x3d6   :  { %v4914_v41 = vpop.f32.mrb[198].mxu1 }
 0x3d7   :  { %v4918_v36 = vadd.f32 %v9566_v46, %v4917_v48  ;;  %v7812_v44 = vpop.f32.mrb[199].mxu1 }
 0x3d8   :  { %v4963_v45 = vpop.f32.mrb[200].mxu0 }
 0x3d9   :  { %v4919_v38 = vmul.f32 0.2, %v4918_v36  ;;  %v7819_v3 = vpop.f32.mrb[201].mxu0 }
 0x3da   :  { %v4966_v59 = vpop.f32.mrb[202].mxu0 }
 0x3db   :  { %v7820_v10 = vpop.f32.mrb[203].mxu0  ;;  %v9639_v49 = vmax.f32 %v4918_v36, %v4919_v38 }
 0x3dc   :  { %v8186_v32 = vpop.eup %8185  ;;  %v5003_v18 = vpop.f32.mrb[200].mxu1 }
 0x3dd   :  { %v5004_v24 = vadd.f32 %v5003_v18, %v4963_v45  ;;  %v7827_v1 = vpop.f32.mrb[201].mxu1  ;;  %v4921_v33 = vmul.f32 %v9639_v49, %v9639_v49  ;;  %v3222_v7 = vmul.f32 %v8186_v32, %v9525_v57 }
 0x3de   :  { %v5006_v28 = vpop.f32.mrb[202].mxu1 }
 0x3df   :  { %v7828_v23 = vpop.f32.mrb[203].mxu1  ;;  %v4922_v13 = vsel %vm86_vm1, %v4921_v33, 0.0  ;;  %v5894_v42 = vpack.c.bf16 %v3222_v7, %v3222_v7 }
 0x3e0   :  { %4923 = vadd.xlane.f32.xlu0 %v4922_v13  ;;  %v5043_v61 = vpop.f32.mrb[204].mxu0 }
 0x3e1   :  { %v5049_v43 = vadd.f32 %v5043_v61, %v5004_v24  ;;  %v7835_v5 = vpop.f32.mrb[205].mxu0  ;;  %7994 = vmatmul.mubr.msk.bf16.vlgmr.msra.gmra.mrb[244].mxu0 %vm86_vm1, %v5894_v42 }
 0x3e2   :  { %v5046_v34 = vpop.f32.mrb[206].mxu0  ;;  %8006 = vmatpush3.bf16.msra.mxu0 %v9521_v27  ;;  %8009 = vmatprep.mubr.msk.bf16.mxu0 %vm8279_vm0, %v8278_v0 }
 0x3e3   :  { %v7836_v37 = vpop.f32.mrb[207].mxu0  ;;  %8007 = vmatprep.subr.bf16.mxu0 %v8278_v0 }
 0x3e4   :  { %v5084_v57 = vpop.f32.mrb[204].mxu1 }
 0x3e5   :  { %v5090_v25 = vadd.f32 %v5084_v57, %v5049_v43  ;;  %v7843_v51 = vpop.f32.mrb[205].mxu1  ;;  %v3473_v29 = vpop.xlane.xlu1 %3472 }
 0x3e6   :  { %v3474_v52 = vmul.f32 0.03125, %v3473_v29  ;;  %v5087_v20 = vpop.f32.mrb[206].mxu1  ;;  %8008 = vmatpush3.bf16.msra.mxu0 %v9538_v53 }
 0x3e7   :  { %v7844_v26 = vpop.f32.mrb[207].mxu1  ;;  %8021 = vmatprep.subr.bf16.mxu0 %v8278_v0 }
 0x3e8   :  { %v3475_v2 = vadd.f32 1e-08, %v3474_v52  ;;  %v5125_v19 = vpop.f32.mrb[208].mxu0 }
 0x3e9   :  { %v5131_v62 = vadd.f32 %v5125_v19, %v5090_v25  ;;  %v7851_v40 = vpop.f32.mrb[209].mxu0 }
 0x3ea   :  { %8187 = vrsqrt.f32 %v3475_v2  ;;  %v5128_v6 = vpop.f32.mrb[210].mxu0 }
 0x3eb   :  { %v7852_v54 = vpop.f32.mrb[211].mxu0 }
 0x3ec   :  { %v5166_v63 = vpop.f32.mrb[208].mxu1 }
 0x3ed   :  { %v5172_v50 = vadd.f32 %v5166_v63, %v5131_v62  ;;  %v7859_v30 = vpop.f32.mrb[209].mxu1 }
 0x3ee   :  { %v5169_v55 = vpop.f32.mrb[210].mxu1 }
 0x3ef   :  { %v5173_v8 = vadd.f32 %v9566_v46, %v5172_v50  ;;  %v7860_v60 = vpop.f32.mrb[211].mxu1 }
 0x3f0   :  { %v5218_v9 = vpop.f32.mrb[212].mxu0 }
 0x3f1   :  { %v5174_v11 = vmul.f32 0.2, %v5173_v8  ;;  %v7867_v56 = vpop.f32.mrb[213].mxu0 }
 0x3f2   :  { %v5221_v35 = vpop.f32.mrb[214].mxu0 }
 0x3f3   :  { %v7868_v12 = vpop.f32.mrb[215].mxu0  ;;  %v9653_v39 = vmax.f32 %v5173_v8, %v5174_v11 }
 0x3f4   :  { %v8188_v21 = vpop.eup %8187  ;;  %v5258_v15 = vpop.f32.mrb[212].mxu1 }
 0x3f5   :  { %v5259_v22 = vadd.f32 %v5258_v15, %v5218_v9  ;;  %v7875_v16 = vpop.f32.mrb[213].mxu1  ;;  %v5176_v48 = vmul.f32 %v9653_v39, %v9653_v39  ;;  %v3477_v4 = vmul.f32 %v8188_v21, %v9569_v31 }
 0x3f6   :  { %v5261_v41 = vpop.f32.mrb[214].mxu1 }
 0x3f7   :  { %v7876_v36 = vpop.f32.mrb[215].mxu1  ;;  %v5177_v44 = vsel %vm86_vm1, %v5176_v48, 0.0  ;;  %v5938_v45 = vpack.c.bf16 %v3477_v4, %v3477_v4 }
 0x3f8   :  { %5178 = vadd.xlane.f32.xlu1 %v5177_v44  ;;  %v5298_v38 = vpop.f32.mrb[216].mxu0 }
 0x3f9   :  { %v5304_v3 = vadd.f32 %v5298_v38, %v5259_v22  ;;  %v7883_v59 = vpop.f32.mrb[217].mxu0  ;;  %8002 = vmatmul.mubr.msk.bf16.vlgmr.msra.gmra.mrb[244].mxu1 %vm86_vm1, %v5938_v45 }
 0x3fa   :  { %v5301_v10 = vpop.f32.mrb[218].mxu0  ;;  %8014 = vmatpush3.bf16.msra.mxu1 %v9521_v27  ;;  %8017 = vmatprep.mubr.msk.bf16.mxu1 %vm8279_vm0, %v8278_v0 }
 0x3fb   :  { %v7884_v32 = vpop.f32.mrb[219].mxu0  ;;  %8015 = vmatprep.subr.bf16.mxu1 %v8278_v0 }
 0x3fc   :  { %v5339_v31 = vpop.f32.mrb[216].mxu1 }
 0x3fd   :  { %v5345_v18 = vadd.f32 %v5339_v31, %v5304_v3  ;;  %v7891_v24 = vpop.f32.mrb[217].mxu1  ;;  %v3734_v1 = vpop.xlane.xlu0 %3733 }
 0x3fe   :  { %v3735_v33 = vmul.f32 0.03125, %v3734_v1  ;;  %v5342_v7 = vpop.f32.mrb[218].mxu1  ;;  %8016 = vmatpush3.bf16.msra.mxu1 %v9538_v53 }
 0x3ff   :  { %v7892_v28 = vpop.f32.mrb[219].mxu1  ;;  %8029 = vmatprep.subr.bf16.mxu1 %v8278_v0 }
 0x400   :  { %v3736_v23 = vadd.f32 1e-08, %v3735_v33  ;;  %v5380_v13 = vpop.f32.mrb[220].mxu0 }
 0x401   :  { %v5386_v42 = vadd.f32 %v5380_v13, %v5345_v18  ;;  %v7899_v61 = vpop.f32.mrb[221].mxu0  ;;  %v9691_v18 = vld [vmem:[%s9763_s6] ss:$0 sm:$0xff]  ;;  %s8281_s6 = smov 16  }
 0x402   :  { %8189 = vrsqrt.f32 %v3736_v23  ;;  %v5383_v43 = vpop.f32.mrb[222].mxu0 }
 0x403   :  { %v7900_v5 = vpop.f32.mrb[223].mxu0 }
 0x404   :  { %v5421_v34 = vpop.f32.mrb[220].mxu1 }
 0x405   :  { %v5427_v37 = vadd.f32 %v5421_v34, %v5386_v42  ;;  %v7907_v57 = vpop.f32.mrb[221].mxu1 }
 0x406   :  { %v5424_v25 = vpop.f32.mrb[222].mxu1 }
 0x407   :  { %v5428_v51 = vadd.f32 %v9566_v46, %v5427_v37  ;;  %v7908_v29 = vpop.f32.mrb[223].mxu1 }
 0x408   :  { %v5473_v52 = vpop.f32.mrb[224].mxu0 }
 0x409   :  { %v5429_v20 = vmul.f32 0.2, %v5428_v51  ;;  %v7915_v26 = vpop.f32.mrb[225].mxu0 }
 0x40a   :  { %v5476_v2 = vpop.f32.mrb[226].mxu0 }
 0x40b   :  { %v7916_v19 = vpop.f32.mrb[227].mxu0  ;;  %v9667_v62 = vmax.f32 %v5428_v51, %v5429_v20 }
 0x40c   :  { %v8190_v40 = vpop.eup %8189  ;;  %v5513_v6 = vpop.f32.mrb[224].mxu1 }
 0x40d   :  { %v5514_v54 = vadd.f32 %v5513_v6, %v5473_v52  ;;  %v7923_v63 = vpop.f32.mrb[225].mxu1  ;;  %v5431_v50 = vmul.f32 %v9667_v62, %v9667_v62  ;;  %v3738_v30 = vmul.f32 %v8190_v40, %v9583_v47 }
 0x40e   :  { %v5516_v55 = vpop.f32.mrb[226].mxu1 }
 0x40f   :  { %v7924_v8 = vpop.f32.mrb[227].mxu1  ;;  %v5432_v60 = vsel %vm86_vm1, %v5431_v50, 0.0  ;;  %v5982_v9 = vpack.c.bf16 %v3738_v30, %v3738_v30 }
 0x410   :  { %5433 = vadd.xlane.f32.xlu0 %v5432_v60  ;;  %v5553_v11 = vpop.f32.mrb[228].mxu0 }
 0x411   :  { %v5559_v56 = vadd.f32 %v5553_v11, %v5514_v54  ;;  %v7931_v35 = vpop.f32.mrb[229].mxu0  ;;  %8010 = vmatmul.mubr.msk.bf16.vlgmr.msra.gmra.mrb[248].mxu0 %vm86_vm1, %v5982_v9 }
 0x412   :  { %v5556_v12 = vpop.f32.mrb[230].mxu0  ;;  %8022 = vmatpush3.bf16.msra.mxu0 %v9521_v27  ;;  %8025 = vmatprep.mubr.msk.bf16.mxu0 %vm8279_vm0, %v8278_v0 }
 0x413   :  { %v7932_v21 = vpop.f32.mrb[231].mxu0  ;;  %8023 = vmatprep.subr.bf16.mxu0 %v8278_v0 }
 0x414   :  { %v5594_v47 = vpop.f32.mrb[228].mxu1 }
 0x415   :  { %v5600_v15 = vadd.f32 %v5594_v47, %v5559_v56  ;;  %v7939_v22 = vpop.f32.mrb[229].mxu1 }
 0x416   :  { %v5597_v16 = vpop.f32.mrb[230].mxu1  ;;  %8024 = vmatpush3.bf16.msra.mxu0 %v9538_v53 }
 0x417   :  { %v5601_v48 = vadd.f32 %v9566_v46, %v5600_v15  ;;  %v7940_v4 = vpop.f32.mrb[231].mxu1  ;;  %8037 = vmatprep.subr.bf16.mxu0 %v8278_v0 }
 0x418   :  { %v9681_v41 = vpop.f32.mrb[232].mxu0 }
 0x419   :  { %v5602_v36 = vmul.f32 0.2, %v5601_v48  ;;  %v7947_v44 = vpop.f32.mrb[233].mxu0 }
 0x41a   :  { %v5671_v45 = vpop.f32.mrb[234].mxu0 }
 0x41b   :  { %v7948_v38 = vpop.f32.mrb[235].mxu0  ;;  %v9683_v3 = vmax.f32 %v5601_v48, %v5602_v36 }
 0x41d   :  { %v5604_v59 = vmul.f32 %v9683_v3, %v9683_v3 }
 0x41f   :  { %v5605_v10 = vsel %vm86_vm1, %v5604_v59, 0.0 }
 0x420   :  { %5606 = vadd.xlane.f32.xlu1 %v5605_v10 }
 0x421   :  { %v4115_v32 = vpop.xlane.xlu1 %4114 }
 0x422   :  { %v4116_v31 = vmul.f32 0.03125, %v4115_v32 }
 0x424   :  { %v4117_v46 = vadd.f32 1e-08, %v4116_v31 }
 0x426   :  { %8191 = vrsqrt.f32 %v4117_v46 }
 0x42c   :  { %v5712_v24 = vpop.f32.mrb[232].mxu1 }
 0x42d   :  { %v5713_v1 = vadd.f32 %v9691_v18, %v5712_v24  ;;  %v7955_v33 = vpop.f32.mrb[233].mxu1 }
 0x42e   :  { %v5715_v7 = vpop.f32.mrb[234].mxu1 }
 0x42f   :  { %v7956_v28 = vpop.f32.mrb[235].mxu1  ;;  %6335 = vrot.lane.b32.xlu0 %v5713_v1, %s8280_s14 }
 0x430   :  { %v8192_v23 = vpop.eup %8191 }
 0x431   :  { %v4119_v13 = vmul.f32 %v8192_v23, %v9605_v58 }
 0x433   :  { %v6026_v42 = vpack.c.bf16 %v4119_v13, %v4119_v13 }
 0x435   :  { %8018 = vmatmul.mubr.msk.bf16.vlgmr.msra.gmra.mrb[248].mxu1 %vm86_vm1, %v6026_v42 }
 0x436   :  { %8030 = vmatpush3.bf16.msra.mxu1 %v9521_v27  ;;  %8033 = vmatprep.mubr.msk.bf16.mxu1 %vm8279_vm0, %v8278_v0 }
 0x437   :  { %8031 = vmatprep.subr.bf16.mxu1 %v8278_v0 }
 0x43a   :  { %8032 = vmatpush3.bf16.msra.mxu1 %v9538_v53 }
 0x43b   :  { %8045 = vmatprep.subr.bf16.mxu1 %v8278_v0 }
 0x444   :  { %v5756_v61 = vpop.f32.mrb[236].mxu0 }
 0x445   :  { %v5757_v43 = vadd.f32 %v9691_v18, %v5756_v61  ;;  %v4496_v5 = vpop.xlane.xlu0 %4495  ;;  %v7963_v34 = vpop.f32.mrb[237].mxu0 }
 0x446   :  { %v4497_v58 = vmul.f32 0.03125, %v4496_v5  ;;  %v5759_v37 = vpop.f32.mrb[238].mxu0 }
 0x447   :  { %6339 = vrot.lane.b32.xlu1 %v5757_v43, %s8281_s6  ;;  %v7964_v57 = vpop.f32.mrb[239].mxu0 }
 0x448   :  { %v4498_v25 = vadd.f32 1e-08, %v4497_v58 }
 0x44a   :  { %8193 = vrsqrt.f32 %v4498_v25 }
 0x454   :  { %v8194_v51 = vpop.eup %8193  ;;  %v5800_v29 = vpop.f32.mrb[236].mxu1 }
 0x455   :  { %v5801_v52 = vadd.f32 %v9691_v18, %v5800_v29  ;;  %v7971_v20 = vpop.f32.mrb[237].mxu1  ;;  %v4500_v26 = vmul.f32 %v8194_v51, %v9619_v17 }
 0x456   :  { %v5803_v2 = vpop.f32.mrb[238].mxu1 }
 0x457   :  { %v7972_v19 = vpop.f32.mrb[239].mxu1  ;;  %6343 = vrot.lane.b32.xlu1 %v5801_v52, %s8282_s15  ;;  %v6070_v40 = vpack.c.bf16 %v4500_v26, %v4500_v26 }
 0x459   :  { %8026 = vmatmul.mubr.msk.bf16.vlgmr.msra.gmra.mrb[252].mxu0 %vm86_vm1, %v6070_v40 }
 0x45a   :  { %8038 = vmatpush3.bf16.msra.mxu0 %v9521_v27  ;;  %8041 = vmatprep.mubr.msk.bf16.mxu0 %vm8279_vm0, %v8278_v0 }
 0x45b   :  { %8039 = vmatprep.subr.bf16.mxu0 %v8278_v0 }
 0x45d   :  { %v4751_v6 = vpop.xlane.xlu1 %4750 }
 0x45e   :  { %v4752_v54 = vmul.f32 0.03125, %v4751_v6  ;;  %8040 = vmatpush3.bf16.msra.mxu0 %v9538_v53  ;;  %v8224_v53 = vld [vmem:[%s9762_s5] sm:$0xff]  }
 0x45f   :  { %8053 = vmatprep.subr.bf16.mxu0 %v8278_v0 }
 0x460   :  { %v4753_v17 = vadd.f32 1e-08, %v4752_v54 }
 0x462   :  { %8195 = vrsqrt.f32 %v4753_v17 }
 0x46c   :  { %v8196_v63 = vpop.eup %8195  ;;  %v5844_v50 = vpop.f32.mrb[240].mxu0 }
 0x46d   :  { %v5845_v30 = vadd.f32 %v9691_v18, %v5844_v50  ;;  %v4924_v55 = vpop.xlane.xlu0 %4923  ;;  %v7979_v8 = vpop.f32.mrb[241].mxu0  ;;  %v4755_v27 = vmul.f32 %v8196_v63, %v9633_v14  ;;  %v8225_v14 = vld [vmem:[%s9762_s5 + $0x8] sm:$0xff]   ;;  %s8284_s5 = smov 40  }
 0x46e   :  { %v4925_v60 = vmul.f32 0.03125, %v4924_v55  ;;  %v5847_v9 = vpop.f32.mrb[242].mxu0 }
 0x46f   :  { %6347 = vrot.lane.b32.xlu1 %v5845_v30, %s8283_s16  ;;  %v7980_v11 = vpop.f32.mrb[243].mxu0  ;;  %v6114_v56 = vpack.c.bf16 %v4755_v27, %v4755_v27 }
 0x470   :  { %v4926_v35 = vadd.f32 1e-08, %v4925_v60 }
 0x471   :  { %8034 = vmatmul.mubr.msk.bf16.vlgmr.msra.gmra.mrb[252].mxu1 %vm86_vm1, %v6114_v56 }
 0x472   :  { %8197 = vrsqrt.f32 %v4926_v35  ;;  %8046 = vmatpush3.bf16.msra.mxu1 %v8224_v53  ;;  %8049 = vmatprep.mubr.msk.bf16.mxu1 %vm8279_vm0, %v8278_v0 }
 0x473   :  { %8047 = vmatprep.subr.bf16.mxu1 %v8278_v0 }
 0x476   :  { %8048 = vmatpush3.bf16.msra.mxu1 %v8225_v14 }
 0x477   :  { %8061 = vmatprep.subr.bf16.mxu1 %v8278_v0 }
 0x47c   :  { %v8198_v12 = vpop.eup %8197 }
 0x47d   :  { %v4928_v21 = vmul.f32 %v8198_v12, %v9639_v49 }
 0x47f   :  { %v6158_v47 = vpack.c.bf16 %v4928_v21, %v4928_v21 }
 0x481   :  { %8042 = vmatmul.mubr.msk.bf16.vlgmr.msra.gmra.mrb[0].mxu0 %vm86_vm1, %v6158_v47 }
 0x482   :  { %8054 = vmatpush3.bf16.msra.mxu0 %v8224_v53  ;;  %8057 = vmatprep.mubr.msk.bf16.mxu0 %vm8279_vm0, %v8278_v0 }
 0x483   :  { %8055 = vmatprep.subr.bf16.mxu0 %v8278_v0 }
 0x485   :  { %v5179_v15 = vpop.xlane.xlu1 %5178 }
 0x486   :  { %v5180_v22 = vmul.f32 0.03125, %v5179_v15  ;;  %8056 = vmatpush3.bf16.msra.mxu0 %v8225_v14 }
 0x488   :  { %v5181_v16 = vadd.f32 1e-08, %v5180_v22 }
 0x48a   :  { %8199 = vrsqrt.f32 %v5181_v16 }
 0x490   :  { %v5888_v48 = vpop.f32.mrb[240].mxu1 }
 0x491   :  { %v5889_v4 = vadd.f32 %v9691_v18, %v5888_v48  ;;  %v7987_v36 = vpop.f32.mrb[241].mxu1 }
 0x492   :  { %v5891_v44 = vpop.f32.mrb[242].mxu1 }
 0x493   :  { %v7988_v49 = vpop.f32.mrb[243].mxu1  ;;  %6351 = vrot.lane.b32.xlu0 %v5889_v4, %s8284_s5 }
 0x494   :  { %v8200_v45 = vpop.eup %8199 }
 0x495   :  { %v5183_v38 = vmul.f32 %v8200_v45, %v9653_v39 }
 0x497   :  { %v6202_v59 = vpack.c.bf16 %v5183_v38, %v5183_v38 }
 0x499   :  { %8050 = vmatmul.mubr.msk.bf16.vlgmr.msra.gmra.mrb[0].mxu1 %vm86_vm1, %v6202_v59 }
 0x49a   :  { %8062 = vmatpush3.bf16.msra.mxu1 %v8224_v53  ;;  %8065 = vmatprep.mubr.msk.bf16.mxu1 %vm8279_vm0, %v8278_v0 }
 0x49b   :  { %8063 = vmatprep.subr.bf16.mxu1 %v8278_v0 }
 0x49d   :  { %v5434_v10 = vpop.xlane.xlu0 %5433 }
 0x49e   :  { %v5435_v32 = vmul.f32 0.03125, %v5434_v10  ;;  %8064 = vmatpush3.bf16.msra.mxu1 %v8225_v14 }
 0x4a0   :  { %v5436_v31 = vadd.f32 1e-08, %v5435_v32 }
 0x4a2   :  { %8201 = vrsqrt.f32 %v5436_v31  ;;  %v6336_v31 = vpop.permute.xlu0 %6335 }
 0x4ac   :  { %v8202_v46 = vpop.eup %8201 }
 0x4ad   :  { %v5438_v24 = vmul.f32 %v8202_v46, %v9667_v62  ;;  %v5607_v1 = vpop.xlane.xlu1 %5606 }
 0x4ae   :  { %v5608_v33 = vmul.f32 0.03125, %v5607_v1 }
 0x4af   :  { %v6246_v39 = vpack.c.bf16 %v5438_v24, %v5438_v24 }
 0x4b0   :  { %v5609_v7 = vadd.f32 1e-08, %v5608_v33 }
 0x4b1   :  { %8058 = vmatmul.mubr.msk.bf16.vlgmr.msra.gmra.mrb[4].mxu0 %vm86_vm1, %v6246_v39  ;;  %v5669_v39 = vadd.f32 %v9691_v18, %v9681_v41 }
 0x4b2   :  { %8203 = vrsqrt.f32 %v5609_v7 }
 0x4b4   :  { %v5932_v28 = vpop.f32.mrb[244].mxu0 }
 0x4b5   :  { %v5933_v23 = vadd.f32 %v9691_v18, %v5932_v28  ;;  %v7995_v13 = vpop.f32.mrb[245].mxu0  ;;  %v6395_v28 = vsel %vm6394_vm2, %v5669_v39, %v6336_v31 }
 0x4b6   :  { %v5935_v0 = vpop.f32.mrb[246].mxu0 }
 0x4b7   :  { %6355 = vrot.lane.b32.xlu1 %v5933_v23, %s8285_s21  ;;  %v7996_v42 = vpop.f32.mrb[247].mxu0 }
 0x4b9   :  { %v6340_v10 = vpop.permute.xlu1 %6339 }
 0x4ba   :  { %v6397_v23 = vsel %vm6396_vm3, %v6395_v28, %v6340_v10 }
 0x4bc   :  { %v8204_v61 = vpop.eup %8203 }
 0x4bd   :  { %v5611_v43 = vmul.f32 %v8204_v61, %v9683_v3 }
 0x4bf   :  { %v6290_v5 = vpack.c.bf16 %v5611_v43, %v5611_v43 }
 0x4c1   :  { %8066 = vmatmul.mubr.msk.bf16.vlgmr.msra.gmra.mrb[4].mxu1 %vm86_vm1, %v6290_v5 }
 0x4c9   :  { %v6344_v32 = vpop.permute.xlu1 %6343 }
 0x4ca   :  { %v6399_v0 = vsel %vm6398_vm4, %v6397_v23, %v6344_v32 }
 0x4cc   :  { %v5976_v62 = vpop.f32.mrb[244].mxu1 }
 0x4cd   :  { %v5977_v34 = vadd.f32 %v9691_v18, %v5976_v62  ;;  %v8003_v58 = vpop.f32.mrb[245].mxu1 }
 0x4ce   :  { %v5979_v37 = vpop.f32.mrb[246].mxu1 }
 0x4cf   :  { %v8004_v57 = vpop.f32.mrb[247].mxu1  ;;  %6359 = vrot.lane.b32.xlu0 %v5977_v34, %s8286_s22 }
 0x4e1   :  { %v6348_v46 = vpop.permute.xlu1 %6347 }
 0x4e2   :  { %v6400_v61 = vsel %vm86_vm1, %v6399_v0, %v6348_v46 }
 0x4e4   :  { %v6020_v25 = vpop.f32.mrb[248].mxu0 }
 0x4e5   :  { %v6021_v51 = vadd.f32 %v9691_v18, %v6020_v25  ;;  %v8011_v29 = vpop.f32.mrb[249].mxu0 }
 0x4e6   :  { %v6023_v52 = vpop.f32.mrb[250].mxu0 }
 0x4e7   :  { %6363 = vrot.lane.b32.xlu1 %v6021_v51, %s8275_s11  ;;  %v8012_v20 = vpop.f32.mrb[251].mxu0  ;;  %s8289_s11 = smov 88  }
 0x505   :  { %v6352_v24 = vpop.permute.xlu0 %6351 }
 0x506   :  { %v6402_v43 = vsel %vm6401_vm5, %v6400_v61, %v6352_v24 }
 0x508   :  { %v6064_v3 = vpop.f32.mrb[248].mxu1 }
 0x509   :  { %v6065_v26 = vadd.f32 %v9691_v18, %v6064_v3  ;;  %v8019_v2 = vpop.f32.mrb[249].mxu1 }
 0x50a   :  { %v6067_v19 = vpop.f32.mrb[250].mxu1 }
 0x50b   :  { %v8020_v40 = vpop.f32.mrb[251].mxu1  ;;  %6367 = vrot.lane.b32.xlu0 %v6065_v26, %s8287_s23 }
 0x529   :  { %v6356_v1 = vpop.permute.xlu1 %6355 }
 0x52a   :  { %v6404_v5 = vsel %vm6403_vm6, %v6402_v43, %v6356_v1 }
 0x52c   :  { %v6108_v6 = vpop.f32.mrb[252].mxu0 }
 0x52d   :  { %v6109_v54 = vadd.f32 %v9691_v18, %v6108_v6  ;;  %v8027_v17 = vpop.f32.mrb[253].mxu0 }
 0x52e   :  { %v6111_v63 = vpop.f32.mrb[254].mxu0 }
 0x52f   :  { %6371 = vrot.lane.b32.xlu1 %v6109_v54, %s8288_s24  ;;  %v8028_v50 = vpop.f32.mrb[255].mxu0 }
 0x541   :  { %v6360_v33 = vpop.permute.xlu0 %6359 }
 0x542   :  { %v6406_v34 = vsel %vm6405_vm7, %v6404_v5, %v6360_v33 }
 0x544   :  { %v6152_v30 = vpop.f32.mrb[252].mxu1 }
 0x545   :  { %v6153_v55 = vadd.f32 %v9691_v18, %v6152_v30  ;;  %v8035_v8 = vpop.f32.mrb[253].mxu1 }
 0x546   :  { %v6155_v27 = vpop.f32.mrb[254].mxu1 }
 0x547   :  { %v8036_v60 = vpop.f32.mrb[255].mxu1  ;;  %6375 = vrot.lane.b32.xlu0 %v6153_v55, %s8289_s11 }
 0x554   :  { %v6196_v9 = vpop.f32.mrb[0].mxu0 }
 0x555   :  { %v6197_v11 = vadd.f32 %v9691_v18, %v6196_v9  ;;  %v8043_v56 = vpop.f32.mrb[1].mxu0 }
 0x556   :  { %v6199_v35 = vpop.f32.mrb[2].mxu0 }
 0x557   :  { %6379 = vrot.lane.b32.xlu1 %v6197_v11, %s8290_s1  ;;  %v8044_v53 = vpop.f32.mrb[3].mxu0 }
 0x559   :  { %v6364_v7 = vpop.permute.xlu1 %6363 }
 0x56c   :  { %v6240_v14 = vpop.f32.mrb[0].mxu1 }
 0x56d   :  { %v6241_v12 = vadd.f32 %v9691_v18, %v6240_v14  ;;  %v8051_v21 = vpop.f32.mrb[1].mxu1 }
 0x56e   :  { %v6243_v47 = vpop.f32.mrb[2].mxu1 }
 0x56f   :  { %v8052_v15 = vpop.f32.mrb[3].mxu1  ;;  %6383 = vrot.lane.b32.xlu0 %v6241_v12, %s8291_s25 }
 0x57d   :  { %v6368_v13 = vpop.permute.xlu0 %6367 }
 0x584   :  { %v6284_v22 = vpop.f32.mrb[4].mxu0 }
 0x585   :  { %v6285_v16 = vadd.f32 %v9691_v18, %v6284_v22  ;;  %v8059_v48 = vpop.f32.mrb[5].mxu0 }
 0x586   :  { %v6287_v4 = vpop.f32.mrb[6].mxu0 }
 0x587   :  { %6387 = vrot.lane.b32.xlu1 %v6285_v16, %s8292_s3  ;;  %v8060_v36 = vpop.f32.mrb[7].mxu0 }
 0x594   :  { %v6328_v44 = vpop.f32.mrb[4].mxu1 }
 0x595   :  { %v6329_v49 = vadd.f32 %v9691_v18, %v6328_v44  ;;  %v8067_v45 = vpop.f32.mrb[5].mxu1  ;;  %v6408_v18 = vsel %vm6407_vm8, %v6406_v34, %v6364_v7 }
 0x596   :  { %v6331_v38 = vpop.f32.mrb[6].mxu1  ;;  %v6410_v58 = vsel %vm6409_vm9, %v6408_v18, %v6368_v13 }
 0x597   :  { %6391 = vrot.lane.b32.xlu0 %v6329_v49, %s8293_s26  ;;  %v8068_v59 = vpop.f32.mrb[7].mxu1 }
 0x5a1   :  { %v6372_v42 = vpop.permute.xlu1 %6371 }
 0x5a2   :  { %v6412_v37 = vsel %vm6411_vm10, %v6410_v58, %v6372_v42 }
 0x5b9   :  { %v6376_v62 = vpop.permute.xlu0 %6375 }
 0x5ba   :  { %v6414_v25 = vsel %vm6413_vm11, %v6412_v37, %v6376_v62 }
 0x5c9   :  { %v6380_v41 = vpop.permute.xlu1 %6379 }
 0x5ca   :  { %v6416_v29 = vsel %vm6415_vm12, %v6414_v25, %v6380_v41 }
 0x5e1   :  { %v6384_v57 = vpop.permute.xlu0 %6383 }
 0x5e2   :  { %v6418_v52 = vsel %vm6417_vm13, %v6416_v29, %v6384_v57 }
 0x5f9   :  { %v6388_v51 = vpop.permute.xlu1 %6387 }
 0x5fa   :  { %v6420_v20 = vsel %vm6419_vm14, %v6418_v52, %v6388_v51 }
 0x609   :  { %v6392_v3 = vpop.permute.xlu0 %6391 }
 0x60a   :  { %v6422_v26 = vsel %vm6421_vm15, %v6420_v20, %v6392_v3 }
 0x60b   :  { %6423 = vst [vmem:[%s9764_s7] sm:$0xff] %v6422_v26 }
 0x60c   :  { %6428 = vsyncpa [#allocation3], 1 }
 0x60d   :  { %6429 = vsyncpa [#allocation5], 1 }

</bundles_post_ra>
